<compile_context>
chip_gen: v7x
topology: tpu7x:2x2x1
jax: 0.10.0
libtpu: 0.0.40
codegen_flags: <defaults>
</compile_context>

<pallas_src>
import functools

import jax
import jax.numpy as jnp
import numpy as np
from jax import lax
from jax.experimental import pallas as pl
from jax.experimental.pallas import tpu as pltpu


# ----------------------------------------------------------------------------
# Fused kernel: LSTM stack + attention + concat/tanh + vocab projection.
# ----------------------------------------------------------------------------
def _make_fused_kernel(L, H):
    def kernel(*refs):
        # inputs : x(B,Td,E), ehs(B,Te,H), h0(L,B,H), c0(L,B,H),
        #          per layer l: w_ih_l(in_l,4H), w_hh_l(H,4H), b_l(1,4H),
        #          attn_w(H,H), attn_b(1,H), cw1(H,H), cw2(H,H), cb(1,H),
        #          vw(H,Vp), vb(1,Vp)
        # outputs: logits(B,Td,Vp), attw(B,Te,Td), hT(L,B,H), cT(L,B,H)
        n_in = 4 + 3 * L + 7
        x_ref, ehs_ref, h0_ref, c0_ref = refs[0:4]
        lstm_refs = refs[4:4 + 3 * L]
        (aw_w_ref, aw_b_ref, cw1_ref, cw2_ref, cb_ref,
         vw_ref, vb_ref) = refs[4 + 3 * L:n_in]
        logits_ref, attw_ref, hT_ref, cT_ref = refs[n_in:n_in + 4]

        B, Td, _ = x_ref.shape
        _, Te, _ = ehs_ref.shape

        # -------------------- LSTM stack (time loop unrolled) ---------------
        layer_in = x_ref[...]                          # (B, Td, in_features)
        h_finals, c_finals = [], []
        for l in range(L):
            w_ih = lstm_refs[3 * l][...]               # (in_l, 4H)
            w_hh = lstm_refs[3 * l + 1][...]           # (H, 4H)
            b = lstm_refs[3 * l + 2][...]              # (1, 4H)

            in_f = layer_in.shape[-1]
            # Hoisted input projection: all T steps in one matmul, off the
            # serial recurrence critical path.
            xw = (jnp.dot(layer_in.reshape(B * Td, in_f), w_ih,
                          preferred_element_type=jnp.float32)
                  + b).reshape(B, Td, 4 * H)

            h = h0_ref[l]                              # (B, H)
            c = c0_ref[l]
            hs_steps = []
            for t in range(Td):                        # fully unrolled
                gates = xw[:, t, :] + jnp.dot(
                    h, w_hh, preferred_element_type=jnp.float32)   # (B, 4H)
                # NOTE: 32-lane-offset gate slices are fine at H=32; use
                # 128-aligned gate packing / lane masks once H >= 128.
                i = jax.nn.sigmoid(gates[:, 0 * H:1 * H])
                f = jax.nn.sigmoid(gates[:, 1 * H:2 * H])
                g = jnp.tanh(gates[:, 2 * H:3 * H])
                o = jax.nn.sigmoid(gates[:, 3 * H:4 * H])
                c = f * c + i * g
                h = o * jnp.tanh(c)
                hs_steps.append(h)
            h_finals.append(h)
            c_finals.append(c)
            layer_in = jnp.stack(hs_steps, axis=1)     # (B, Td, H)
            # TODO(synk): inter-layer dropout (training mode) not implemented.

        hs = layer_in                                   # (B, Td, H)
        hT_ref[...] = jnp.stack(h_finals, axis=0)       # (L, B, H)
        cT_ref[...] = jnp.stack(c_finals, axis=0)

        # -------------------- Attention + output projections ----------------
        ehs = ehs_ref[...]                              # (B, Te, H)
        # attn linear over all B*Te rows at once.
        ae = (jnp.dot(ehs.reshape(B * Te, H), aw_w_ref[...],
                      preferred_element_type=jnp.float32)
              + aw_b_ref[...]).reshape(B, Te, H)

        ctx_rows = []
        for bi in range(B):                             # B tiny; unrolled
            # s = attn(ehs_b) @ hs_b^T  -> (Te, Td); softmax over Te.
            s = lax.dot_general(ae[bi], hs[bi], (((1,), (1,)), ((), ())),
                                preferred_element_type=jnp.float32)
            m = jnp.max(s, axis=0, keepdims=True)
            e = jnp.exp(s - m)
            aw = e * pl.reciprocal(jnp.sum(e, axis=0, keepdims=True),
                                   approx=True)
            attw_ref[bi] = aw
            # context = aw^T @ ehs_b  -> (Td, H)
            ctx_rows.append(
                lax.dot_general(aw, ehs[bi], (((0,), (0,)), ((), ())),
                                preferred_element_type=jnp.float32))
        ctx = jnp.concatenate(ctx_rows, axis=0)         # (B*Td, H), b-major

        hs_flat = hs.reshape(B * Td, H)
        # concat([hs, ctx]) @ W_c == hs @ W_c[:H] + ctx @ W_c[H:]
        out = jnp.tanh(
            jnp.dot(hs_flat, cw1_ref[...], preferred_element_type=jnp.float32)
            + jnp.dot(ctx, cw2_ref[...], preferred_element_type=jnp.float32)
            + cb_ref[...])
        logits = (jnp.dot(out, vw_ref[...], preferred_element_type=jnp.float32)
                  + vb_ref[...])                        # (B*Td, Vp) lane-dense
        logits_ref[...] = logits.reshape(B, Td, logits.shape[-1])

    return kernel


# ----------------------------------------------------------------------------
# Wrapper: one fused pallas_call, lane-dense padded vocab, explicit VMEM specs.
# ----------------------------------------------------------------------------
def attn_decoder_forward(params, vec_source, ehs, state):
    h0, c0 = state                                      # each (L, B, H)
    L, B, H = h0.shape
    Td = vec_source.shape[1]
    Te = ehs.shape[1]
    V = params["vocab_w"].shape[1]
    Vp = ((V + 127) // 128) * 128

    # Lane-dense vocab projection: pad V to a multiple of 128 (params are jit
    # constants here, so the pad folds at compile time); slice afterwards.
    vw = jnp.pad(params["vocab_w"], ((0, 0), (0, Vp - V)))
    vb = jnp.pad(params["vocab_b"], ((0, 0), (0, Vp - V)))

    lstm_flat = []
    for w_ih, w_hh, b in params["lstm"]:
        lstm_flat += [w_ih, w_hh, b]

    inputs = (vec_source, ehs, h0, c0, *lstm_flat,
              params["attn_w"], params["attn_b"],
              params["concat_w1"], params["concat_w2"], params["concat_b"],
              vw, vb)

    vmem = lambda: pl.BlockSpec(memory_space=pltpu.MemorySpace.VMEM)
    out_shape = (jax.ShapeDtypeStruct((B, Td, Vp), jnp.float32),
                 jax.ShapeDtypeStruct((B, Te, Td), jnp.float32),
                 jax.ShapeDtypeStruct((L, B, H), jnp.float32),
                 jax.ShapeDtypeStruct((L, B, H), jnp.float32))

    # Single fused launch; everything resident in VMEM at these sizes.
    # TODO(synk): at realistic sizes (H~1k, V~32k) tile the vocab weight over
    # an N grid axis (64 MiB VMEM on v7x) and split B across TensorCores.
    logits_p, attw, hT, cT = pl.pallas_call(
        _make_fused_kernel(L, H),
        out_shape=out_shape,
        in_specs=[vmem() for _ in inputs],
        out_specs=tuple(vmem() for _ in out_shape),
    )(*inputs)

    return logits_p[..., :V], (hT, cT), attw


# ----------------------------------------------------------------------------
# Pure-JAX reference mirroring the PyTorch module (correctness check).
# ----------------------------------------------------------------------------
def ref_forward(params, vec_source, ehs, state):
    h0, c0 = state
    num_layers = h0.shape[0]
    H = h0.shape[-1]

    x = vec_source
    hT, cT = [], []
    for l in range(num_layers):
        w_ih, w_hh, b = params["lstm"][l]
        hl, cl = h0[l], c0[l]
        outs = []
        for t in range(x.shape[1]):
            gates = x[:, t, :] @ w_ih + hl @ w_hh + b
            i = jax.nn.sigmoid(gates[:, :H])
            f = jax.nn.sigmoid(gates[:, H:2 * H])
            g = jnp.tanh(gates[:, 2 * H:3 * H])
            o = jax.nn.sigmoid(gates[:, 3 * H:])
            cl = f * cl + i * g
            hl = o * jnp.tanh(cl)
            outs.append(hl)
        x = jnp.stack(outs, axis=1)
        hT.append(hl)
        cT.append(cl)
    hs = x

    ae = ehs @ params["attn_w"] + params["attn_b"]
    s = jnp.einsum("bte,bde->btd", ae, hs)              # (B, Te, Td)
    aw = jax.nn.softmax(s, axis=1)
    ctx = jnp.einsum("btd,bth->bdh", aw, ehs)           # (B, Td, H)
    cat = jnp.concatenate([hs, ctx], axis=2)
    concat_w = jnp.concatenate([params["concat_w1"], params["concat_w2"]], axis=0)
    out = jnp.tanh(cat @ concat_w + params["concat_b"])
    logits = out @ params["vocab_w"] + params["vocab_b"]
    return logits, (jnp.stack(hT), jnp.stack(cT)), aw


# ----------------------------------------------------------------------------
# Main
# ----------------------------------------------------------------------------
if __name__ == "__main__":
    B, T_dec, T_enc = 2, 8, 8
    E, H, V, L = 16, 32, 48, 2   # embedding_dim, hidden_dim, vocab_size, num_layers

    key = jax.random.PRNGKey(0)
    ks = list(jax.random.split(key, 32))
    nk = lambda: ks.pop()
    rnd = lambda shape, s=0.1: (s * jax.random.normal(nk(), shape)).astype(jnp.float32)

    params = {
        "lstm": [
            (rnd((E if l == 0 else H, 4 * H)),   # W_ih^T
             rnd((H, 4 * H)),                    # W_hh^T
             rnd((1, 4 * H)))                    # b_ih + b_hh (combined)
            for l in range(L)
        ],
        "attn_w": rnd((H, H)), "attn_b": rnd((1, H)),
        "concat_w1": rnd((H, H)), "concat_w2": rnd((H, H)), "concat_b": rnd((1, H)),
        "vocab_w": rnd((H, V)), "vocab_b": rnd((1, V)),
    }

    vec_source = rnd((B, T_dec, E), 1.0)
    ehs = rnd((B, T_enc, H), 1.0)
    state = (rnd((L, B, H), 1.0), rnd((L, B, H), 1.0))

    fwd = jax.jit(functools.partial(attn_decoder_forward, params))
    logits, new_state, attw = fwd(vec_source, ehs, state)
    jax.block_until_ready((logits, new_state, attw))

    # Check against the pure-JAX reference.
    r_logits, r_state, r_attw = ref_forward(params, vec_source, ehs, state)
    np.testing.assert_allclose(np.asarray(logits), np.asarray(r_logits),
                               rtol=2e-3, atol=2e-3)
    np.testing.assert_allclose(np.asarray(attw), np.asarray(r_attw),
                               rtol=2e-3, atol=2e-3)
    np.testing.assert_allclose(np.asarray(new_state[0]), np.asarray(r_state[0]),
                               rtol=2e-3, atol=2e-3)
    np.testing.assert_allclose(np.asarray(new_state[1]), np.asarray(r_state[1]),
                               rtol=2e-3, atol=2e-3)

    assert logits.shape == (B, T_dec, V)
    assert attw.shape == (B, T_enc, T_dec)
    assert new_state[0].shape == (L, B, H) and new_state[1].shape == (L, B, H)
    print("KERNEL_OK")
</pallas_src>

<mosaic_0001>
module attributes {stable_mosaic.version = 11 : i64} {
  func.func @kernel(%arg0: memref<2x8x16xf32, #tpu.memory_space<vmem>>, %arg1: memref<2x8x32xf32, #tpu.memory_space<vmem>>, %arg2: memref<2x2x32xf32, #tpu.memory_space<vmem>>, %arg3: memref<2x2x32xf32, #tpu.memory_space<vmem>>, %arg4: memref<16x128xf32, #tpu.memory_space<vmem>>, %arg5: memref<32x128xf32, #tpu.memory_space<vmem>>, %arg6: memref<1x128xf32, #tpu.memory_space<vmem>>, %arg7: memref<32x128xf32, #tpu.memory_space<vmem>>, %arg8: memref<32x128xf32, #tpu.memory_space<vmem>>, %arg9: memref<1x128xf32, #tpu.memory_space<vmem>>, %arg10: memref<32x32xf32, #tpu.memory_space<vmem>>, %arg11: memref<1x32xf32, #tpu.memory_space<vmem>>, %arg12: memref<32x32xf32, #tpu.memory_space<vmem>>, %arg13: memref<32x32xf32, #tpu.memory_space<vmem>>, %arg14: memref<1x32xf32, #tpu.memory_space<vmem>>, %arg15: memref<32x128xf32, #tpu.memory_space<vmem>>, %arg16: memref<1x128xf32, #tpu.memory_space<vmem>>, %arg17: memref<2x8x128xf32, #tpu.memory_space<vmem>>, %arg18: memref<2x8x8xf32, #tpu.memory_space<vmem>>, %arg19: memref<2x2x32xf32, #tpu.memory_space<vmem>>, %arg20: memref<2x2x32xf32, #tpu.memory_space<vmem>>) attributes {dimension_semantics = [], scalar_prefetch = 0 : i64, scratch_operands = 0 : i64, tpu.core_type = #tpu.core_type<tc>} {
    %c0 = arith.constant 0 : index
    %c0_0 = arith.constant 0 : index
    %c0_1 = arith.constant 0 : index
    %0 = vector.load %arg0[%c0, %c0_0, %c0_1] : memref<2x8x16xf32, #tpu.memory_space<vmem>>, vector<2x8x16xf32>
    %c0_2 = arith.constant 0 : index
    %c0_3 = arith.constant 0 : index
    %1 = vector.load %arg4[%c0_2, %c0_3] : memref<16x128xf32, #tpu.memory_space<vmem>>, vector<16x128xf32>
    %c0_4 = arith.constant 0 : index
    %c0_5 = arith.constant 0 : index
    %2 = vector.load %arg5[%c0_4, %c0_5] : memref<32x128xf32, #tpu.memory_space<vmem>>, vector<32x128xf32>
    %c0_6 = arith.constant 0 : index
    %c0_7 = arith.constant 0 : index
    %3 = vector.load %arg6[%c0_6, %c0_7] : memref<1x128xf32, #tpu.memory_space<vmem>>, vector<1x128xf32>
    %4 = vector.shape_cast %0 : vector<2x8x16xf32> to vector<16x16xf32>
    %cst = arith.constant dense<0.000000e+00> : vector<16x128xf32>
    %5 = tpu.matmul %4, %1, %cst {dimension_numbers = #tpu.dot_dimension_numbers<[1], [0], [0], [1], [0, 0, 1, 1], [], []>} : vector<16x16xf32>, vector<16x128xf32>, vector<16x128xf32> -> vector<16x128xf32>
    %6 = vector.broadcast %3 : vector<1x128xf32> to vector<16x128xf32>
    %7 = arith.addf %5, %6 : vector<16x128xf32>
    %8 = vector.shape_cast %7 : vector<16x128xf32> to vector<2x8x128xf32>
    %c0_8 = arith.constant 0 : index
    %c0_9 = arith.constant 0 : index
    %c0_10 = arith.constant 0 : index
    %9 = vector.load %arg2[%c0_8, %c0_9, %c0_10] : memref<2x2x32xf32, #tpu.memory_space<vmem>>, vector<1x2x32xf32>
    %10 = vector.shape_cast %9 : vector<1x2x32xf32> to vector<2x32xf32>
    %c0_11 = arith.constant 0 : index
    %c0_12 = arith.constant 0 : index
    %c0_13 = arith.constant 0 : index
    %11 = vector.load %arg3[%c0_11, %c0_12, %c0_13] : memref<2x2x32xf32, #tpu.memory_space<vmem>>, vector<1x2x32xf32>
    %12 = vector.shape_cast %11 : vector<1x2x32xf32> to vector<2x32xf32>
    %13 = vector.extract_strided_slice %8 {offsets = [0, 0, 0], sizes = [2, 1, 128], strides = [1, 1, 1]} : vector<2x8x128xf32> to vector<2x1x128xf32>
    %14 = vector.shape_cast %13 : vector<2x1x128xf32> to vector<2x128xf32>
    %cst_14 = arith.constant dense<0.000000e+00> : vector<2x128xf32>
    %15 = tpu.matmul %10, %2, %cst_14 {dimension_numbers = #tpu.dot_dimension_numbers<[1], [0], [0], [1], [0, 0, 1, 1], [], []>} : vector<2x32xf32>, vector<32x128xf32>, vector<2x128xf32> -> vector<2x128xf32>
    %16 = arith.addf %14, %15 : vector<2x128xf32>
    %17 = vector.extract_strided_slice %16 {offsets = [0, 0], sizes = [2, 32], strides = [1, 1]} : vector<2x128xf32> to vector<2x32xf32>
    %18 = arith.negf %17 : vector<2x32xf32>
    %19 = math.exp %18 : vector<2x32xf32>
    %cst_15 = arith.constant 1.000000e+00 : f32
    %20 = vector.broadcast %cst_15 : f32 to vector<2x32xf32>
    %21 = arith.addf %20, %19 : vector<2x32xf32>
    %22 = arith.divf %20, %21 : vector<2x32xf32>
    %23 = vector.extract_strided_slice %16 {offsets = [0, 32], sizes = [2, 32], strides = [1, 1]} : vector<2x128xf32> to vector<2x32xf32>
    %24 = arith.negf %23 : vector<2x32xf32>
    %25 = math.exp %24 : vector<2x32xf32>
    %cst_16 = arith.constant 1.000000e+00 : f32
    %26 = vector.broadcast %cst_16 : f32 to vector<2x32xf32>
    %27 = arith.addf %26, %25 : vector<2x32xf32>
    %28 = arith.divf %26, %27 : vector<2x32xf32>
    %29 = vector.extract_strided_slice %16 {offsets = [0, 64], sizes = [2, 32], strides = [1, 1]} : vector<2x128xf32> to vector<2x32xf32>
    %30 = math.tanh %29 : vector<2x32xf32>
    %31 = vector.extract_strided_slice %16 {offsets = [0, 96], sizes = [2, 32], strides = [1, 1]} : vector<2x128xf32> to vector<2x32xf32>
    %32 = arith.negf %31 : vector<2x32xf32>
    %33 = math.exp %32 : vector<2x32xf32>
    %cst_17 = arith.constant 1.000000e+00 : f32
    %34 = vector.broadcast %cst_17 : f32 to vector<2x32xf32>
    %35 = arith.addf %34, %33 : vector<2x32xf32>
    %36 = arith.divf %34, %35 : vector<2x32xf32>
    %37 = arith.mulf %28, %12 : vector<2x32xf32>
    %38 = arith.mulf %22, %30 : vector<2x32xf32>
    %39 = arith.addf %37, %38 : vector<2x32xf32>
    %40 = math.tanh %39 : vector<2x32xf32>
    %41 = arith.mulf %36, %40 : vector<2x32xf32>
    %42 = vector.extract_strided_slice %8 {offsets = [0, 1, 0], sizes = [2, 1, 128], strides = [1, 1, 1]} : vector<2x8x128xf32> to vector<2x1x128xf32>
    %43 = vector.shape_cast %42 : vector<2x1x128xf32> to vector<2x128xf32>
    %cst_18 = arith.constant dense<0.000000e+00> : vector<2x128xf32>
    %44 = tpu.matmul %41, %2, %cst_18 {dimension_numbers = #tpu.dot_dimension_numbers<[1], [0], [0], [1], [0, 0, 1, 1], [], []>} : vector<2x32xf32>, vector<32x128xf32>, vector<2x128xf32> -> vector<2x128xf32>
    %45 = arith.addf %43, %44 : vector<2x128xf32>
    %46 = vector.extract_strided_slice %45 {offsets = [0, 0], sizes = [2, 32], strides = [1, 1]} : vector<2x128xf32> to vector<2x32xf32>
    %47 = arith.negf %46 : vector<2x32xf32>
    %48 = math.exp %47 : vector<2x32xf32>
    %cst_19 = arith.constant 1.000000e+00 : f32
    %49 = vector.broadcast %cst_19 : f32 to vector<2x32xf32>
    %50 = arith.addf %49, %48 : vector<2x32xf32>
    %51 = arith.divf %49, %50 : vector<2x32xf32>
    %52 = vector.extract_strided_slice %45 {offsets = [0, 32], sizes = [2, 32], strides = [1, 1]} : vector<2x128xf32> to vector<2x32xf32>
    %53 = arith.negf %52 : vector<2x32xf32>
    %54 = math.exp %53 : vector<2x32xf32>
    %cst_20 = arith.constant 1.000000e+00 : f32
    %55 = vector.broadcast %cst_20 : f32 to vector<2x32xf32>
    %56 = arith.addf %55, %54 : vector<2x32xf32>
    %57 = arith.divf %55, %56 : vector<2x32xf32>
    %58 = vector.extract_strided_slice %45 {offsets = [0, 64], sizes = [2, 32], strides = [1, 1]} : vector<2x128xf32> to vector<2x32xf32>
    %59 = math.tanh %58 : vector<2x32xf32>
    %60 = vector.extract_strided_slice %45 {offsets = [0, 96], sizes = [2, 32], strides = [1, 1]} : vector<2x128xf32> to vector<2x32xf32>
    %61 = arith.negf %60 : vector<2x32xf32>
    %62 = math.exp %61 : vector<2x32xf32>
    %cst_21 = arith.constant 1.000000e+00 : f32
    %63 = vector.broadcast %cst_21 : f32 to vector<2x32xf32>
    %64 = arith.addf %63, %62 : vector<2x32xf32>
    %65 = arith.divf %63, %64 : vector<2x32xf32>
    %66 = arith.mulf %57, %39 : vector<2x32xf32>
    %67 = arith.mulf %51, %59 : vector<2x32xf32>
    %68 = arith.addf %66, %67 : vector<2x32xf32>
    %69 = math.tanh %68 : vector<2x32xf32>
    %70 = arith.mulf %65, %69 : vector<2x32xf32>
    %71 = vector.extract_strided_slice %8 {offsets = [0, 2, 0], sizes = [2, 1, 128], strides = [1, 1, 1]} : vector<2x8x128xf32> to vector<2x1x128xf32>
    %72 = vector.shape_cast %71 : vector<2x1x128xf32> to vector<2x128xf32>
    %cst_22 = arith.constant dense<0.000000e+00> : vector<2x128xf32>
    %73 = tpu.matmul %70, %2, %cst_22 {dimension_numbers = #tpu.dot_dimension_numbers<[1], [0], [0], [1], [0, 0, 1, 1], [], []>} : vector<2x32xf32>, vector<32x128xf32>, vector<2x128xf32> -> vector<2x128xf32>
    %74 = arith.addf %72, %73 : vector<2x128xf32>
    %75 = vector.extract_strided_slice %74 {offsets = [0, 0], sizes = [2, 32], strides = [1, 1]} : vector<2x128xf32> to vector<2x32xf32>
    %76 = arith.negf %75 : vector<2x32xf32>
    %77 = math.exp %76 : vector<2x32xf32>
    %cst_23 = arith.constant 1.000000e+00 : f32
    %78 = vector.broadcast %cst_23 : f32 to vector<2x32xf32>
    %79 = arith.addf %78, %77 : vector<2x32xf32>
    %80 = arith.divf %78, %79 : vector<2x32xf32>
    %81 = vector.extract_strided_slice %74 {offsets = [0, 32], sizes = [2, 32], strides = [1, 1]} : vector<2x128xf32> to vector<2x32xf32>
    %82 = arith.negf %81 : vector<2x32xf32>
    %83 = math.exp %82 : vector<2x32xf32>
    %cst_24 = arith.constant 1.000000e+00 : f32
    %84 = vector.broadcast %cst_24 : f32 to vector<2x32xf32>
    %85 = arith.addf %84, %83 : vector<2x32xf32>
    %86 = arith.divf %84, %85 : vector<2x32xf32>
    %87 = vector.extract_strided_slice %74 {offsets = [0, 64], sizes = [2, 32], strides = [1, 1]} : vector<2x128xf32> to vector<2x32xf32>
    %88 = math.tanh %87 : vector<2x32xf32>
    %89 = vector.extract_strided_slice %74 {offsets = [0, 96], sizes = [2, 32], strides = [1, 1]} : vector<2x128xf32> to vector<2x32xf32>
    %90 = arith.negf %89 : vector<2x32xf32>
    %91 = math.exp %90 : vector<2x32xf32>
    %cst_25 = arith.constant 1.000000e+00 : f32
    %92 = vector.broadcast %cst_25 : f32 to vector<2x32xf32>
    %93 = arith.addf %92, %91 : vector<2x32xf32>
    %94 = arith.divf %92, %93 : vector<2x32xf32>
    %95 = arith.mulf %86, %68 : vector<2x32xf32>
    %96 = arith.mulf %80, %88 : vector<2x32xf32>
    %97 = arith.addf %95, %96 : vector<2x32xf32>
    %98 = math.tanh %97 : vector<2x32xf32>
    %99 = arith.mulf %94, %98 : vector<2x32xf32>
    %100 = vector.extract_strided_slice %8 {offsets = [0, 3, 0], sizes = [2, 1, 128], strides = [1, 1, 1]} : vector<2x8x128xf32> to vector<2x1x128xf32>
    %101 = vector.shape_cast %100 : vector<2x1x128xf32> to vector<2x128xf32>
    %cst_26 = arith.constant dense<0.000000e+00> : vector<2x128xf32>
    %102 = tpu.matmul %99, %2, %cst_26 {dimension_numbers = #tpu.dot_dimension_numbers<[1], [0], [0], [1], [0, 0, 1, 1], [], []>} : vector<2x32xf32>, vector<32x128xf32>, vector<2x128xf32> -> vector<2x128xf32>
    %103 = arith.addf %101, %102 : vector<2x128xf32>
    %104 = vector.extract_strided_slice %103 {offsets = [0, 0], sizes = [2, 32], strides = [1, 1]} : vector<2x128xf32> to vector<2x32xf32>
    %105 = arith.negf %104 : vector<2x32xf32>
    %106 = math.exp %105 : vector<2x32xf32>
    %cst_27 = arith.constant 1.000000e+00 : f32
    %107 = vector.broadcast %cst_27 : f32 to vector<2x32xf32>
    %108 = arith.addf %107, %106 : vector<2x32xf32>
    %109 = arith.divf %107, %108 : vector<2x32xf32>
    %110 = vector.extract_strided_slice %103 {offsets = [0, 32], sizes = [2, 32], strides = [1, 1]} : vector<2x128xf32> to vector<2x32xf32>
    %111 = arith.negf %110 : vector<2x32xf32>
    %112 = math.exp %111 : vector<2x32xf32>
    %cst_28 = arith.constant 1.000000e+00 : f32
    %113 = vector.broadcast %cst_28 : f32 to vector<2x32xf32>
    %114 = arith.addf %113, %112 : vector<2x32xf32>
    %115 = arith.divf %113, %114 : vector<2x32xf32>
    %116 = vector.extract_strided_slice %103 {offsets = [0, 64], sizes = [2, 32], strides = [1, 1]} : vector<2x128xf32> to vector<2x32xf32>
    %117 = math.tanh %116 : vector<2x32xf32>
    %118 = vector.extract_strided_slice %103 {offsets = [0, 96], sizes = [2, 32], strides = [1, 1]} : vector<2x128xf32> to vector<2x32xf32>
    %119 = arith.negf %118 : vector<2x32xf32>
    %120 = math.exp %119 : vector<2x32xf32>
    %cst_29 = arith.constant 1.000000e+00 : f32
    %121 = vector.broadcast %cst_29 : f32 to vector<2x32xf32>
    %122 = arith.addf %121, %120 : vector<2x32xf32>
    %123 = arith.divf %121, %122 : vector<2x32xf32>
    %124 = arith.mulf %115, %97 : vector<2x32xf32>
    %125 = arith.mulf %109, %117 : vector<2x32xf32>
    %126 = arith.addf %124, %125 : vector<2x32xf32>
    %127 = math.tanh %126 : vector<2x32xf32>
    %128 = arith.mulf %123, %127 : vector<2x32xf32>
    %129 = vector.extract_strided_slice %8 {offsets = [0, 4, 0], sizes = [2, 1, 128], strides = [1, 1, 1]} : vector<2x8x128xf32> to vector<2x1x128xf32>
    %130 = vector.shape_cast %129 : vector<2x1x128xf32> to vector<2x128xf32>
    %cst_30 = arith.constant dense<0.000000e+00> : vector<2x128xf32>
    %131 = tpu.matmul %128, %2, %cst_30 {dimension_numbers = #tpu.dot_dimension_numbers<[1], [0], [0], [1], [0, 0, 1, 1], [], []>} : vector<2x32xf32>, vector<32x128xf32>, vector<2x128xf32> -> vector<2x128xf32>
    %132 = arith.addf %130, %131 : vector<2x128xf32>
    %133 = vector.extract_strided_slice %132 {offsets = [0, 0], sizes = [2, 32], strides = [1, 1]} : vector<2x128xf32> to vector<2x32xf32>
    %134 = arith.negf %133 : vector<2x32xf32>
    %135 = math.exp %134 : vector<2x32xf32>
    %cst_31 = arith.constant 1.000000e+00 : f32
    %136 = vector.broadcast %cst_31 : f32 to vector<2x32xf32>
    %137 = arith.addf %136, %135 : vector<2x32xf32>
    %138 = arith.divf %136, %137 : vector<2x32xf32>
    %139 = vector.extract_strided_slice %132 {offsets = [0, 32], sizes = [2, 32], strides = [1, 1]} : vector<2x128xf32> to vector<2x32xf32>
    %140 = arith.negf %139 : vector<2x32xf32>
    %141 = math.exp %140 : vector<2x32xf32>
    %cst_32 = arith.constant 1.000000e+00 : f32
    %142 = vector.broadcast %cst_32 : f32 to vector<2x32xf32>
    %143 = arith.addf %142, %141 : vector<2x32xf32>
    %144 = arith.divf %142, %143 : vector<2x32xf32>
    %145 = vector.extract_strided_slice %132 {offsets = [0, 64], sizes = [2, 32], strides = [1, 1]} : vector<2x128xf32> to vector<2x32xf32>
    %146 = math.tanh %145 : vector<2x32xf32>
    %147 = vector.extract_strided_slice %132 {offsets = [0, 96], sizes = [2, 32], strides = [1, 1]} : vector<2x128xf32> to vector<2x32xf32>
    %148 = arith.negf %147 : vector<2x32xf32>
    %149 = math.exp %148 : vector<2x32xf32>
    %cst_33 = arith.constant 1.000000e+00 : f32
    %150 = vector.broadcast %cst_33 : f32 to vector<2x32xf32>
    %151 = arith.addf %150, %149 : vector<2x32xf32>
    %152 = arith.divf %150, %151 : vector<2x32xf32>
    %153 = arith.mulf %144, %126 : vector<2x32xf32>
    %154 = arith.mulf %138, %146 : vector<2x32xf32>
    %155 = arith.addf %153, %154 : vector<2x32xf32>
    %156 = math.tanh %155 : vector<2x32xf32>
    %157 = arith.mulf %152, %156 : vector<2x32xf32>
    %158 = vector.extract_strided_slice %8 {offsets = [0, 5, 0], sizes = [2, 1, 128], strides = [1, 1, 1]} : vector<2x8x128xf32> to vector<2x1x128xf32>
    %159 = vector.shape_cast %158 : vector<2x1x128xf32> to vector<2x128xf32>
    %cst_34 = arith.constant dense<0.000000e+00> : vector<2x128xf32>
    %160 = tpu.matmul %157, %2, %cst_34 {dimension_numbers = #tpu.dot_dimension_numbers<[1], [0], [0], [1], [0, 0, 1, 1], [], []>} : vector<2x32xf32>, vector<32x128xf32>, vector<2x128xf32> -> vector<2x128xf32>
    %161 = arith.addf %159, %160 : vector<2x128xf32>
    %162 = vector.extract_strided_slice %161 {offsets = [0, 0], sizes = [2, 32], strides = [1, 1]} : vector<2x128xf32> to vector<2x32xf32>
    %163 = arith.negf %162 : vector<2x32xf32>
    %164 = math.exp %163 : vector<2x32xf32>
    %cst_35 = arith.constant 1.000000e+00 : f32
    %165 = vector.broadcast %cst_35 : f32 to vector<2x32xf32>
    %166 = arith.addf %165, %164 : vector<2x32xf32>
    %167 = arith.divf %165, %166 : vector<2x32xf32>
    %168 = vector.extract_strided_slice %161 {offsets = [0, 32], sizes = [2, 32], strides = [1, 1]} : vector<2x128xf32> to vector<2x32xf32>
    %169 = arith.negf %168 : vector<2x32xf32>
    %170 = math.exp %169 : vector<2x32xf32>
    %cst_36 = arith.constant 1.000000e+00 : f32
    %171 = vector.broadcast %cst_36 : f32 to vector<2x32xf32>
    %172 = arith.addf %171, %170 : vector<2x32xf32>
    %173 = arith.divf %171, %172 : vector<2x32xf32>
    %174 = vector.extract_strided_slice %161 {offsets = [0, 64], sizes = [2, 32], strides = [1, 1]} : vector<2x128xf32> to vector<2x32xf32>
    %175 = math.tanh %174 : vector<2x32xf32>
    %176 = vector.extract_strided_slice %161 {offsets = [0, 96], sizes = [2, 32], strides = [1, 1]} : vector<2x128xf32> to vector<2x32xf32>
    %177 = arith.negf %176 : vector<2x32xf32>
    %178 = math.exp %177 : vector<2x32xf32>
    %cst_37 = arith.constant 1.000000e+00 : f32
    %179 = vector.broadcast %cst_37 : f32 to vector<2x32xf32>
    %180 = arith.addf %179, %178 : vector<2x32xf32>
    %181 = arith.divf %179, %180 : vector<2x32xf32>
    %182 = arith.mulf %173, %155 : vector<2x32xf32>
    %183 = arith.mulf %167, %175 : vector<2x32xf32>
    %184 = arith.addf %182, %183 : vector<2x32xf32>
    %185 = math.tanh %184 : vector<2x32xf32>
    %186 = arith.mulf %181, %185 : vector<2x32xf32>
    %187 = vector.extract_strided_slice %8 {offsets = [0, 6, 0], sizes = [2, 1, 128], strides = [1, 1, 1]} : vector<2x8x128xf32> to vector<2x1x128xf32>
    %188 = vector.shape_cast %187 : vector<2x1x128xf32> to vector<2x128xf32>
    %cst_38 = arith.constant dense<0.000000e+00> : vector<2x128xf32>
    %189 = tpu.matmul %186, %2, %cst_38 {dimension_numbers = #tpu.dot_dimension_numbers<[1], [0], [0], [1], [0, 0, 1, 1], [], []>} : vector<2x32xf32>, vector<32x128xf32>, vector<2x128xf32> -> vector<2x128xf32>
    %190 = arith.addf %188, %189 : vector<2x128xf32>
    %191 = vector.extract_strided_slice %190 {offsets = [0, 0], sizes = [2, 32], strides = [1, 1]} : vector<2x128xf32> to vector<2x32xf32>
    %192 = arith.negf %191 : vector<2x32xf32>
    %193 = math.exp %192 : vector<2x32xf32>
    %cst_39 = arith.constant 1.000000e+00 : f32
    %194 = vector.broadcast %cst_39 : f32 to vector<2x32xf32>
    %195 = arith.addf %194, %193 : vector<2x32xf32>
    %196 = arith.divf %194, %195 : vector<2x32xf32>
    %197 = vector.extract_strided_slice %190 {offsets = [0, 32], sizes = [2, 32], strides = [1, 1]} : vector<2x128xf32> to vector<2x32xf32>
    %198 = arith.negf %197 : vector<2x32xf32>
    %199 = math.exp %198 : vector<2x32xf32>
    %cst_40 = arith.constant 1.000000e+00 : f32
    %200 = vector.broadcast %cst_40 : f32 to vector<2x32xf32>
    %201 = arith.addf %200, %199 : vector<2x32xf32>
    %202 = arith.divf %200, %201 : vector<2x32xf32>
    %203 = vector.extract_strided_slice %190 {offsets = [0, 64], sizes = [2, 32], strides = [1, 1]} : vector<2x128xf32> to vector<2x32xf32>
    %204 = math.tanh %203 : vector<2x32xf32>
    %205 = vector.extract_strided_slice %190 {offsets = [0, 96], sizes = [2, 32], strides = [1, 1]} : vector<2x128xf32> to vector<2x32xf32>
    %206 = arith.negf %205 : vector<2x32xf32>
    %207 = math.exp %206 : vector<2x32xf32>
    %cst_41 = arith.constant 1.000000e+00 : f32
    %208 = vector.broadcast %cst_41 : f32 to vector<2x32xf32>
    %209 = arith.addf %208, %207 : vector<2x32xf32>
    %210 = arith.divf %208, %209 : vector<2x32xf32>
    %211 = arith.mulf %202, %184 : vector<2x32xf32>
    %212 = arith.mulf %196, %204 : vector<2x32xf32>
    %213 = arith.addf %211, %212 : vector<2x32xf32>
    %214 = math.tanh %213 : vector<2x32xf32>
    %215 = arith.mulf %210, %214 : vector<2x32xf32>
    %216 = vector.extract_strided_slice %8 {offsets = [0, 7, 0], sizes = [2, 1, 128], strides = [1, 1, 1]} : vector<2x8x128xf32> to vector<2x1x128xf32>
    %217 = vector.shape_cast %216 : vector<2x1x128xf32> to vector<2x128xf32>
    %cst_42 = arith.constant dense<0.000000e+00> : vector<2x128xf32>
    %218 = tpu.matmul %215, %2, %cst_42 {dimension_numbers = #tpu.dot_dimension_numbers<[1], [0], [0], [1], [0, 0, 1, 1], [], []>} : vector<2x32xf32>, vector<32x128xf32>, vector<2x128xf32> -> vector<2x128xf32>
    %219 = arith.addf %217, %218 : vector<2x128xf32>
    %220 = vector.extract_strided_slice %219 {offsets = [0, 0], sizes = [2, 32], strides = [1, 1]} : vector<2x128xf32> to vector<2x32xf32>
    %221 = arith.negf %220 : vector<2x32xf32>
    %222 = math.exp %221 : vector<2x32xf32>
    %cst_43 = arith.constant 1.000000e+00 : f32
    %223 = vector.broadcast %cst_43 : f32 to vector<2x32xf32>
    %224 = arith.addf %223, %222 : vector<2x32xf32>
    %225 = arith.divf %223, %224 : vector<2x32xf32>
    %226 = vector.extract_strided_slice %219 {offsets = [0, 32], sizes = [2, 32], strides = [1, 1]} : vector<2x128xf32> to vector<2x32xf32>
    %227 = arith.negf %226 : vector<2x32xf32>
    %228 = math.exp %227 : vector<2x32xf32>
    %cst_44 = arith.constant 1.000000e+00 : f32
    %229 = vector.broadcast %cst_44 : f32 to vector<2x32xf32>
    %230 = arith.addf %229, %228 : vector<2x32xf32>
    %231 = arith.divf %229, %230 : vector<2x32xf32>
    %232 = vector.extract_strided_slice %219 {offsets = [0, 64], sizes = [2, 32], strides = [1, 1]} : vector<2x128xf32> to vector<2x32xf32>
    %233 = math.tanh %232 : vector<2x32xf32>
    %234 = vector.extract_strided_slice %219 {offsets = [0, 96], sizes = [2, 32], strides = [1, 1]} : vector<2x128xf32> to vector<2x32xf32>
    %235 = arith.negf %234 : vector<2x32xf32>
    %236 = math.exp %235 : vector<2x32xf32>
    %cst_45 = arith.constant 1.000000e+00 : f32
    %237 = vector.broadcast %cst_45 : f32 to vector<2x32xf32>
    %238 = arith.addf %237, %236 : vector<2x32xf32>
    %239 = arith.divf %237, %238 : vector<2x32xf32>
    %240 = arith.mulf %231, %213 : vector<2x32xf32>
    %241 = arith.mulf %225, %233 : vector<2x32xf32>
    %242 = arith.addf %240, %241 : vector<2x32xf32>
    %243 = math.tanh %242 : vector<2x32xf32>
    %244 = arith.mulf %239, %243 : vector<2x32xf32>
    %245 = vector.shape_cast %41 : vector<2x32xf32> to vector<2x1x32xf32>
    %246 = vector.shape_cast %70 : vector<2x32xf32> to vector<2x1x32xf32>
    %247 = vector.shape_cast %99 : vector<2x32xf32> to vector<2x1x32xf32>
    %248 = vector.shape_cast %128 : vector<2x32xf32> to vector<2x1x32xf32>
    %249 = vector.shape_cast %157 : vector<2x32xf32> to vector<2x1x32xf32>
    %250 = vector.shape_cast %186 : vector<2x32xf32> to vector<2x1x32xf32>
    %251 = vector.shape_cast %215 : vector<2x32xf32> to vector<2x1x32xf32>
    %252 = vector.shape_cast %244 : vector<2x32xf32> to vector<2x1x32xf32>
    %253 = tpu.concatenate %245, %246, %247, %248, %249, %250, %251, %252 in 1 : vector<2x1x32xf32>, vector<2x1x32xf32>, vector<2x1x32xf32>, vector<2x1x32xf32>, vector<2x1x32xf32>, vector<2x1x32xf32>, vector<2x1x32xf32>, vector<2x1x32xf32> -> vector<2x8x32xf32>
    %c0_46 = arith.constant 0 : index
    %c0_47 = arith.constant 0 : index
    %254 = vector.load %arg7[%c0_46, %c0_47] : memref<32x128xf32, #tpu.memory_space<vmem>>, vector<32x128xf32>
    %c0_48 = arith.constant 0 : index
    %c0_49 = arith.constant 0 : index
    %255 = vector.load %arg8[%c0_48, %c0_49] : memref<32x128xf32, #tpu.memory_space<vmem>>, vector<32x128xf32>
    %c0_50 = arith.constant 0 : index
    %c0_51 = arith.constant 0 : index
    %256 = vector.load %arg9[%c0_50, %c0_51] : memref<1x128xf32, #tpu.memory_space<vmem>>, vector<1x128xf32>
    %257 = vector.shape_cast %253 : vector<2x8x32xf32> to vector<16x32xf32>
    %cst_52 = arith.constant dense<0.000000e+00> : vector<16x128xf32>
    %258 = tpu.matmul %257, %254, %cst_52 {dimension_numbers = #tpu.dot_dimension_numbers<[1], [0], [0], [1], [0, 0, 1, 1], [], []>} : vector<16x32xf32>, vector<32x128xf32>, vector<16x128xf32> -> vector<16x128xf32>
    %259 = vector.broadcast %256 : vector<1x128xf32> to vector<16x128xf32>
    %260 = arith.addf %258, %259 : vector<16x128xf32>
    %261 = vector.shape_cast %260 : vector<16x128xf32> to vector<2x8x128xf32>
    %c1 = arith.constant 1 : index
    %c0_53 = arith.constant 0 : index
    %c0_54 = arith.constant 0 : index
    %262 = vector.load %arg2[%c1, %c0_53, %c0_54] : memref<2x2x32xf32, #tpu.memory_space<vmem>>, vector<1x2x32xf32>
    %263 = vector.shape_cast %262 : vector<1x2x32xf32> to vector<2x32xf32>
    %c1_55 = arith.constant 1 : index
    %c0_56 = arith.constant 0 : index
    %c0_57 = arith.constant 0 : index
    %264 = vector.load %arg3[%c1_55, %c0_56, %c0_57] : memref<2x2x32xf32, #tpu.memory_space<vmem>>, vector<1x2x32xf32>
    %265 = vector.shape_cast %264 : vector<1x2x32xf32> to vector<2x32xf32>
    %266 = vector.extract_strided_slice %261 {offsets = [0, 0, 0], sizes = [2, 1, 128], strides = [1, 1, 1]} : vector<2x8x128xf32> to vector<2x1x128xf32>
    %267 = vector.shape_cast %266 : vector<2x1x128xf32> to vector<2x128xf32>
    %cst_58 = arith.constant dense<0.000000e+00> : vector<2x128xf32>
    %268 = tpu.matmul %263, %255, %cst_58 {dimension_numbers = #tpu.dot_dimension_numbers<[1], [0], [0], [1], [0, 0, 1, 1], [], []>} : vector<2x32xf32>, vector<32x128xf32>, vector<2x128xf32> -> vector<2x128xf32>
    %269 = arith.addf %267, %268 : vector<2x128xf32>
    %270 = vector.extract_strided_slice %269 {offsets = [0, 0], sizes = [2, 32], strides = [1, 1]} : vector<2x128xf32> to vector<2x32xf32>
    %271 = arith.negf %270 : vector<2x32xf32>
    %272 = math.exp %271 : vector<2x32xf32>
    %cst_59 = arith.constant 1.000000e+00 : f32
    %273 = vector.broadcast %cst_59 : f32 to vector<2x32xf32>
    %274 = arith.addf %273, %272 : vector<2x32xf32>
    %275 = arith.divf %273, %274 : vector<2x32xf32>
    %276 = vector.extract_strided_slice %269 {offsets = [0, 32], sizes = [2, 32], strides = [1, 1]} : vector<2x128xf32> to vector<2x32xf32>
    %277 = arith.negf %276 : vector<2x32xf32>
    %278 = math.exp %277 : vector<2x32xf32>
    %cst_60 = arith.constant 1.000000e+00 : f32
    %279 = vector.broadcast %cst_60 : f32 to vector<2x32xf32>
    %280 = arith.addf %279, %278 : vector<2x32xf32>
    %281 = arith.divf %279, %280 : vector<2x32xf32>
    %282 = vector.extract_strided_slice %269 {offsets = [0, 64], sizes = [2, 32], strides = [1, 1]} : vector<2x128xf32> to vector<2x32xf32>
    %283 = math.tanh %282 : vector<2x32xf32>
    %284 = vector.extract_strided_slice %269 {offsets = [0, 96], sizes = [2, 32], strides = [1, 1]} : vector<2x128xf32> to vector<2x32xf32>
    %285 = arith.negf %284 : vector<2x32xf32>
    %286 = math.exp %285 : vector<2x32xf32>
    %cst_61 = arith.constant 1.000000e+00 : f32
    %287 = vector.broadcast %cst_61 : f32 to vector<2x32xf32>
    %288 = arith.addf %287, %286 : vector<2x32xf32>
    %289 = arith.divf %287, %288 : vector<2x32xf32>
    %290 = arith.mulf %281, %265 : vector<2x32xf32>
    %291 = arith.mulf %275, %283 : vector<2x32xf32>
    %292 = arith.addf %290, %291 : vector<2x32xf32>
    %293 = math.tanh %292 : vector<2x32xf32>
    %294 = arith.mulf %289, %293 : vector<2x32xf32>
    %295 = vector.extract_strided_slice %261 {offsets = [0, 1, 0], sizes = [2, 1, 128], strides = [1, 1, 1]} : vector<2x8x128xf32> to vector<2x1x128xf32>
    %296 = vector.shape_cast %295 : vector<2x1x128xf32> to vector<2x128xf32>
    %cst_62 = arith.constant dense<0.000000e+00> : vector<2x128xf32>
    %297 = tpu.matmul %294, %255, %cst_62 {dimension_numbers = #tpu.dot_dimension_numbers<[1], [0], [0], [1], [0, 0, 1, 1], [], []>} : vector<2x32xf32>, vector<32x128xf32>, vector<2x128xf32> -> vector<2x128xf32>
    %298 = arith.addf %296, %297 : vector<2x128xf32>
    %299 = vector.extract_strided_slice %298 {offsets = [0, 0], sizes = [2, 32], strides = [1, 1]} : vector<2x128xf32> to vector<2x32xf32>
    %300 = arith.negf %299 : vector<2x32xf32>
    %301 = math.exp %300 : vector<2x32xf32>
    %cst_63 = arith.constant 1.000000e+00 : f32
    %302 = vector.broadcast %cst_63 : f32 to vector<2x32xf32>
    %303 = arith.addf %302, %301 : vector<2x32xf32>
    %304 = arith.divf %302, %303 : vector<2x32xf32>
    %305 = vector.extract_strided_slice %298 {offsets = [0, 32], sizes = [2, 32], strides = [1, 1]} : vector<2x128xf32> to vector<2x32xf32>
    %306 = arith.negf %305 : vector<2x32xf32>
    %307 = math.exp %306 : vector<2x32xf32>
    %cst_64 = arith.constant 1.000000e+00 : f32
    %308 = vector.broadcast %cst_64 : f32 to vector<2x32xf32>
    %309 = arith.addf %308, %307 : vector<2x32xf32>
    %310 = arith.divf %308, %309 : vector<2x32xf32>
    %311 = vector.extract_strided_slice %298 {offsets = [0, 64], sizes = [2, 32], strides = [1, 1]} : vector<2x128xf32> to vector<2x32xf32>
    %312 = math.tanh %311 : vector<2x32xf32>
    %313 = vector.extract_strided_slice %298 {offsets = [0, 96], sizes = [2, 32], strides = [1, 1]} : vector<2x128xf32> to vector<2x32xf32>
    %314 = arith.negf %313 : vector<2x32xf32>
    %315 = math.exp %314 : vector<2x32xf32>
    %cst_65 = arith.constant 1.000000e+00 : f32
    %316 = vector.broadcast %cst_65 : f32 to vector<2x32xf32>
    %317 = arith.addf %316, %315 : vector<2x32xf32>
    %318 = arith.divf %316, %317 : vector<2x32xf32>
    %319 = arith.mulf %310, %292 : vector<2x32xf32>
    %320 = arith.mulf %304, %312 : vector<2x32xf32>
    %321 = arith.addf %319, %320 : vector<2x32xf32>
    %322 = math.tanh %321 : vector<2x32xf32>
    %323 = arith.mulf %318, %322 : vector<2x32xf32>
    %324 = vector.extract_strided_slice %261 {offsets = [0, 2, 0], sizes = [2, 1, 128], strides = [1, 1, 1]} : vector<2x8x128xf32> to vector<2x1x128xf32>
    %325 = vector.shape_cast %324 : vector<2x1x128xf32> to vector<2x128xf32>
    %cst_66 = arith.constant dense<0.000000e+00> : vector<2x128xf32>
    %326 = tpu.matmul %323, %255, %cst_66 {dimension_numbers = #tpu.dot_dimension_numbers<[1], [0], [0], [1], [0, 0, 1, 1], [], []>} : vector<2x32xf32>, vector<32x128xf32>, vector<2x128xf32> -> vector<2x128xf32>
    %327 = arith.addf %325, %326 : vector<2x128xf32>
    %328 = vector.extract_strided_slice %327 {offsets = [0, 0], sizes = [2, 32], strides = [1, 1]} : vector<2x128xf32> to vector<2x32xf32>
    %329 = arith.negf %328 : vector<2x32xf32>
    %330 = math.exp %329 : vector<2x32xf32>
    %cst_67 = arith.constant 1.000000e+00 : f32
    %331 = vector.broadcast %cst_67 : f32 to vector<2x32xf32>
    %332 = arith.addf %331, %330 : vector<2x32xf32>
    %333 = arith.divf %331, %332 : vector<2x32xf32>
    %334 = vector.extract_strided_slice %327 {offsets = [0, 32], sizes = [2, 32], strides = [1, 1]} : vector<2x128xf32> to vector<2x32xf32>
    %335 = arith.negf %334 : vector<2x32xf32>
    %336 = math.exp %335 : vector<2x32xf32>
    %cst_68 = arith.constant 1.000000e+00 : f32
    %337 = vector.broadcast %cst_68 : f32 to vector<2x32xf32>
    %338 = arith.addf %337, %336 : vector<2x32xf32>
    %339 = arith.divf %337, %338 : vector<2x32xf32>
    %340 = vector.extract_strided_slice %327 {offsets = [0, 64], sizes = [2, 32], strides = [1, 1]} : vector<2x128xf32> to vector<2x32xf32>
    %341 = math.tanh %340 : vector<2x32xf32>
    %342 = vector.extract_strided_slice %327 {offsets = [0, 96], sizes = [2, 32], strides = [1, 1]} : vector<2x128xf32> to vector<2x32xf32>
    %343 = arith.negf %342 : vector<2x32xf32>
    %344 = math.exp %343 : vector<2x32xf32>
    %cst_69 = arith.constant 1.000000e+00 : f32
    %345 = vector.broadcast %cst_69 : f32 to vector<2x32xf32>
    %346 = arith.addf %345, %344 : vector<2x32xf32>
    %347 = arith.divf %345, %346 : vector<2x32xf32>
    %348 = arith.mulf %339, %321 : vector<2x32xf32>
    %349 = arith.mulf %333, %341 : vector<2x32xf32>
    %350 = arith.addf %348, %349 : vector<2x32xf32>
    %351 = math.tanh %350 : vector<2x32xf32>
    %352 = arith.mulf %347, %351 : vector<2x32xf32>
    %353 = vector.extract_strided_slice %261 {offsets = [0, 3, 0], sizes = [2, 1, 128], strides = [1, 1, 1]} : vector<2x8x128xf32> to vector<2x1x128xf32>
    %354 = vector.shape_cast %353 : vector<2x1x128xf32> to vector<2x128xf32>
    %cst_70 = arith.constant dense<0.000000e+00> : vector<2x128xf32>
    %355 = tpu.matmul %352, %255, %cst_70 {dimension_numbers = #tpu.dot_dimension_numbers<[1], [0], [0], [1], [0, 0, 1, 1], [], []>} : vector<2x32xf32>, vector<32x128xf32>, vector<2x128xf32> -> vector<2x128xf32>
    %356 = arith.addf %354, %355 : vector<2x128xf32>
    %357 = vector.extract_strided_slice %356 {offsets = [0, 0], sizes = [2, 32], strides = [1, 1]} : vector<2x128xf32> to vector<2x32xf32>
    %358 = arith.negf %357 : vector<2x32xf32>
    %359 = math.exp %358 : vector<2x32xf32>
    %cst_71 = arith.constant 1.000000e+00 : f32
    %360 = vector.broadcast %cst_71 : f32 to vector<2x32xf32>
    %361 = arith.addf %360, %359 : vector<2x32xf32>
    %362 = arith.divf %360, %361 : vector<2x32xf32>
    %363 = vector.extract_strided_slice %356 {offsets = [0, 32], sizes = [2, 32], strides = [1, 1]} : vector<2x128xf32> to vector<2x32xf32>
    %364 = arith.negf %363 : vector<2x32xf32>
    %365 = math.exp %364 : vector<2x32xf32>
    %cst_72 = arith.constant 1.000000e+00 : f32
    %366 = vector.broadcast %cst_72 : f32 to vector<2x32xf32>
    %367 = arith.addf %366, %365 : vector<2x32xf32>
    %368 = arith.divf %366, %367 : vector<2x32xf32>
    %369 = vector.extract_strided_slice %356 {offsets = [0, 64], sizes = [2, 32], strides = [1, 1]} : vector<2x128xf32> to vector<2x32xf32>
    %370 = math.tanh %369 : vector<2x32xf32>
    %371 = vector.extract_strided_slice %356 {offsets = [0, 96], sizes = [2, 32], strides = [1, 1]} : vector<2x128xf32> to vector<2x32xf32>
    %372 = arith.negf %371 : vector<2x32xf32>
    %373 = math.exp %372 : vector<2x32xf32>
    %cst_73 = arith.constant 1.000000e+00 : f32
    %374 = vector.broadcast %cst_73 : f32 to vector<2x32xf32>
    %375 = arith.addf %374, %373 : vector<2x32xf32>
    %376 = arith.divf %374, %375 : vector<2x32xf32>
    %377 = arith.mulf %368, %350 : vector<2x32xf32>
    %378 = arith.mulf %362, %370 : vector<2x32xf32>
    %379 = arith.addf %377, %378 : vector<2x32xf32>
    %380 = math.tanh %379 : vector<2x32xf32>
    %381 = arith.mulf %376, %380 : vector<2x32xf32>
    %382 = vector.extract_strided_slice %261 {offsets = [0, 4, 0], sizes = [2, 1, 128], strides = [1, 1, 1]} : vector<2x8x128xf32> to vector<2x1x128xf32>
    %383 = vector.shape_cast %382 : vector<2x1x128xf32> to vector<2x128xf32>
    %cst_74 = arith.constant dense<0.000000e+00> : vector<2x128xf32>
    %384 = tpu.matmul %381, %255, %cst_74 {dimension_numbers = #tpu.dot_dimension_numbers<[1], [0], [0], [1], [0, 0, 1, 1], [], []>} : vector<2x32xf32>, vector<32x128xf32>, vector<2x128xf32> -> vector<2x128xf32>
    %385 = arith.addf %383, %384 : vector<2x128xf32>
    %386 = vector.extract_strided_slice %385 {offsets = [0, 0], sizes = [2, 32], strides = [1, 1]} : vector<2x128xf32> to vector<2x32xf32>
    %387 = arith.negf %386 : vector<2x32xf32>
    %388 = math.exp %387 : vector<2x32xf32>
    %cst_75 = arith.constant 1.000000e+00 : f32
    %389 = vector.broadcast %cst_75 : f32 to vector<2x32xf32>
    %390 = arith.addf %389, %388 : vector<2x32xf32>
    %391 = arith.divf %389, %390 : vector<2x32xf32>
    %392 = vector.extract_strided_slice %385 {offsets = [0, 32], sizes = [2, 32], strides = [1, 1]} : vector<2x128xf32> to vector<2x32xf32>
    %393 = arith.negf %392 : vector<2x32xf32>
    %394 = math.exp %393 : vector<2x32xf32>
    %cst_76 = arith.constant 1.000000e+00 : f32
    %395 = vector.broadcast %cst_76 : f32 to vector<2x32xf32>
    %396 = arith.addf %395, %394 : vector<2x32xf32>
    %397 = arith.divf %395, %396 : vector<2x32xf32>
    %398 = vector.extract_strided_slice %385 {offsets = [0, 64], sizes = [2, 32], strides = [1, 1]} : vector<2x128xf32> to vector<2x32xf32>
    %399 = math.tanh %398 : vector<2x32xf32>
    %400 = vector.extract_strided_slice %385 {offsets = [0, 96], sizes = [2, 32], strides = [1, 1]} : vector<2x128xf32> to vector<2x32xf32>
    %401 = arith.negf %400 : vector<2x32xf32>
    %402 = math.exp %401 : vector<2x32xf32>
    %cst_77 = arith.constant 1.000000e+00 : f32
    %403 = vector.broadcast %cst_77 : f32 to vector<2x32xf32>
    %404 = arith.addf %403, %402 : vector<2x32xf32>
    %405 = arith.divf %403, %404 : vector<2x32xf32>
    %406 = arith.mulf %397, %379 : vector<2x32xf32>
    %407 = arith.mulf %391, %399 : vector<2x32xf32>
    %408 = arith.addf %406, %407 : vector<2x32xf32>
    %409 = math.tanh %408 : vector<2x32xf32>
    %410 = arith.mulf %405, %409 : vector<2x32xf32>
    %411 = vector.extract_strided_slice %261 {offsets = [0, 5, 0], sizes = [2, 1, 128], strides = [1, 1, 1]} : vector<2x8x128xf32> to vector<2x1x128xf32>
    %412 = vector.shape_cast %411 : vector<2x1x128xf32> to vector<2x128xf32>
    %cst_78 = arith.constant dense<0.000000e+00> : vector<2x128xf32>
    %413 = tpu.matmul %410, %255, %cst_78 {dimension_numbers = #tpu.dot_dimension_numbers<[1], [0], [0], [1], [0, 0, 1, 1], [], []>} : vector<2x32xf32>, vector<32x128xf32>, vector<2x128xf32> -> vector<2x128xf32>
    %414 = arith.addf %412, %413 : vector<2x128xf32>
    %415 = vector.extract_strided_slice %414 {offsets = [0, 0], sizes = [2, 32], strides = [1, 1]} : vector<2x128xf32> to vector<2x32xf32>
    %416 = arith.negf %415 : vector<2x32xf32>
    %417 = math.exp %416 : vector<2x32xf32>
    %cst_79 = arith.constant 1.000000e+00 : f32
    %418 = vector.broadcast %cst_79 : f32 to vector<2x32xf32>
    %419 = arith.addf %418, %417 : vector<2x32xf32>
    %420 = arith.divf %418, %419 : vector<2x32xf32>
    %421 = vector.extract_strided_slice %414 {offsets = [0, 32], sizes = [2, 32], strides = [1, 1]} : vector<2x128xf32> to vector<2x32xf32>
    %422 = arith.negf %421 : vector<2x32xf32>
    %423 = math.exp %422 : vector<2x32xf32>
    %cst_80 = arith.constant 1.000000e+00 : f32
    %424 = vector.broadcast %cst_80 : f32 to vector<2x32xf32>
    %425 = arith.addf %424, %423 : vector<2x32xf32>
    %426 = arith.divf %424, %425 : vector<2x32xf32>
    %427 = vector.extract_strided_slice %414 {offsets = [0, 64], sizes = [2, 32], strides = [1, 1]} : vector<2x128xf32> to vector<2x32xf32>
    %428 = math.tanh %427 : vector<2x32xf32>
    %429 = vector.extract_strided_slice %414 {offsets = [0, 96], sizes = [2, 32], strides = [1, 1]} : vector<2x128xf32> to vector<2x32xf32>
    %430 = arith.negf %429 : vector<2x32xf32>
    %431 = math.exp %430 : vector<2x32xf32>
    %cst_81 = arith.constant 1.000000e+00 : f32
    %432 = vector.broadcast %cst_81 : f32 to vector<2x32xf32>
    %433 = arith.addf %432, %431 : vector<2x32xf32>
    %434 = arith.divf %432, %433 : vector<2x32xf32>
    %435 = arith.mulf %426, %408 : vector<2x32xf32>
    %436 = arith.mulf %420, %428 : vector<2x32xf32>
    %437 = arith.addf %435, %436 : vector<2x32xf32>
    %438 = math.tanh %437 : vector<2x32xf32>
    %439 = arith.mulf %434, %438 : vector<2x32xf32>
    %440 = vector.extract_strided_slice %261 {offsets = [0, 6, 0], sizes = [2, 1, 128], strides = [1, 1, 1]} : vector<2x8x128xf32> to vector<2x1x128xf32>
    %441 = vector.shape_cast %440 : vector<2x1x128xf32> to vector<2x128xf32>
    %cst_82 = arith.constant dense<0.000000e+00> : vector<2x128xf32>
    %442 = tpu.matmul %439, %255, %cst_82 {dimension_numbers = #tpu.dot_dimension_numbers<[1], [0], [0], [1], [0, 0, 1, 1], [], []>} : vector<2x32xf32>, vector<32x128xf32>, vector<2x128xf32> -> vector<2x128xf32>
    %443 = arith.addf %441, %442 : vector<2x128xf32>
    %444 = vector.extract_strided_slice %443 {offsets = [0, 0], sizes = [2, 32], strides = [1, 1]} : vector<2x128xf32> to vector<2x32xf32>
    %445 = arith.negf %444 : vector<2x32xf32>
    %446 = math.exp %445 : vector<2x32xf32>
    %cst_83 = arith.constant 1.000000e+00 : f32
    %447 = vector.broadcast %cst_83 : f32 to vector<2x32xf32>
    %448 = arith.addf %447, %446 : vector<2x32xf32>
    %449 = arith.divf %447, %448 : vector<2x32xf32>
    %450 = vector.extract_strided_slice %443 {offsets = [0, 32], sizes = [2, 32], strides = [1, 1]} : vector<2x128xf32> to vector<2x32xf32>
    %451 = arith.negf %450 : vector<2x32xf32>
    %452 = math.exp %451 : vector<2x32xf32>
    %cst_84 = arith.constant 1.000000e+00 : f32
    %453 = vector.broadcast %cst_84 : f32 to vector<2x32xf32>
    %454 = arith.addf %453, %452 : vector<2x32xf32>
    %455 = arith.divf %453, %454 : vector<2x32xf32>
    %456 = vector.extract_strided_slice %443 {offsets = [0, 64], sizes = [2, 32], strides = [1, 1]} : vector<2x128xf32> to vector<2x32xf32>
    %457 = math.tanh %456 : vector<2x32xf32>
    %458 = vector.extract_strided_slice %443 {offsets = [0, 96], sizes = [2, 32], strides = [1, 1]} : vector<2x128xf32> to vector<2x32xf32>
    %459 = arith.negf %458 : vector<2x32xf32>
    %460 = math.exp %459 : vector<2x32xf32>
    %cst_85 = arith.constant 1.000000e+00 : f32
    %461 = vector.broadcast %cst_85 : f32 to vector<2x32xf32>
    %462 = arith.addf %461, %460 : vector<2x32xf32>
    %463 = arith.divf %461, %462 : vector<2x32xf32>
    %464 = arith.mulf %455, %437 : vector<2x32xf32>
    %465 = arith.mulf %449, %457 : vector<2x32xf32>
    %466 = arith.addf %464, %465 : vector<2x32xf32>
    %467 = math.tanh %466 : vector<2x32xf32>
    %468 = arith.mulf %463, %467 : vector<2x32xf32>
    %469 = vector.extract_strided_slice %261 {offsets = [0, 7, 0], sizes = [2, 1, 128], strides = [1, 1, 1]} : vector<2x8x128xf32> to vector<2x1x128xf32>
    %470 = vector.shape_cast %469 : vector<2x1x128xf32> to vector<2x128xf32>
    %cst_86 = arith.constant dense<0.000000e+00> : vector<2x128xf32>
    %471 = tpu.matmul %468, %255, %cst_86 {dimension_numbers = #tpu.dot_dimension_numbers<[1], [0], [0], [1], [0, 0, 1, 1], [], []>} : vector<2x32xf32>, vector<32x128xf32>, vector<2x128xf32> -> vector<2x128xf32>
    %472 = arith.addf %470, %471 : vector<2x128xf32>
    %473 = vector.extract_strided_slice %472 {offsets = [0, 0], sizes = [2, 32], strides = [1, 1]} : vector<2x128xf32> to vector<2x32xf32>
    %474 = arith.negf %473 : vector<2x32xf32>
    %475 = math.exp %474 : vector<2x32xf32>
    %cst_87 = arith.constant 1.000000e+00 : f32
    %476 = vector.broadcast %cst_87 : f32 to vector<2x32xf32>
    %477 = arith.addf %476, %475 : vector<2x32xf32>
    %478 = arith.divf %476, %477 : vector<2x32xf32>
    %479 = vector.extract_strided_slice %472 {offsets = [0, 32], sizes = [2, 32], strides = [1, 1]} : vector<2x128xf32> to vector<2x32xf32>
    %480 = arith.negf %479 : vector<2x32xf32>
    %481 = math.exp %480 : vector<2x32xf32>
    %cst_88 = arith.constant 1.000000e+00 : f32
    %482 = vector.broadcast %cst_88 : f32 to vector<2x32xf32>
    %483 = arith.addf %482, %481 : vector<2x32xf32>
    %484 = arith.divf %482, %483 : vector<2x32xf32>
    %485 = vector.extract_strided_slice %472 {offsets = [0, 64], sizes = [2, 32], strides = [1, 1]} : vector<2x128xf32> to vector<2x32xf32>
    %486 = math.tanh %485 : vector<2x32xf32>
    %487 = vector.extract_strided_slice %472 {offsets = [0, 96], sizes = [2, 32], strides = [1, 1]} : vector<2x128xf32> to vector<2x32xf32>
    %488 = arith.negf %487 : vector<2x32xf32>
    %489 = math.exp %488 : vector<2x32xf32>
    %cst_89 = arith.constant 1.000000e+00 : f32
    %490 = vector.broadcast %cst_89 : f32 to vector<2x32xf32>
    %491 = arith.addf %490, %489 : vector<2x32xf32>
    %492 = arith.divf %490, %491 : vector<2x32xf32>
    %493 = arith.mulf %484, %466 : vector<2x32xf32>
    %494 = arith.mulf %478, %486 : vector<2x32xf32>
    %495 = arith.addf %493, %494 : vector<2x32xf32>
    %496 = math.tanh %495 : vector<2x32xf32>
    %497 = arith.mulf %492, %496 : vector<2x32xf32>
    %498 = vector.shape_cast %294 : vector<2x32xf32> to vector<2x1x32xf32>
    %499 = vector.shape_cast %323 : vector<2x32xf32> to vector<2x1x32xf32>
    %500 = vector.shape_cast %352 : vector<2x32xf32> to vector<2x1x32xf32>
    %501 = vector.shape_cast %381 : vector<2x32xf32> to vector<2x1x32xf32>
    %502 = vector.shape_cast %410 : vector<2x32xf32> to vector<2x1x32xf32>
    %503 = vector.shape_cast %439 : vector<2x32xf32> to vector<2x1x32xf32>
    %504 = vector.shape_cast %468 : vector<2x32xf32> to vector<2x1x32xf32>
    %505 = vector.shape_cast %497 : vector<2x32xf32> to vector<2x1x32xf32>
    %506 = tpu.concatenate %498, %499, %500, %501, %502, %503, %504, %505 in 1 : vector<2x1x32xf32>, vector<2x1x32xf32>, vector<2x1x32xf32>, vector<2x1x32xf32>, vector<2x1x32xf32>, vector<2x1x32xf32>, vector<2x1x32xf32>, vector<2x1x32xf32> -> vector<2x8x32xf32>
    %507 = vector.shape_cast %244 : vector<2x32xf32> to vector<1x2x32xf32>
    %508 = vector.shape_cast %497 : vector<2x32xf32> to vector<1x2x32xf32>
    %509 = tpu.concatenate %507, %508 in 0 : vector<1x2x32xf32>, vector<1x2x32xf32> -> vector<2x2x32xf32>
    %c0_90 = arith.constant 0 : index
    %c0_91 = arith.constant 0 : index
    %c0_92 = arith.constant 0 : index
    %510 = vector.load %arg19[%c0_90, %c0_91, %c0_92] : memref<2x2x32xf32, #tpu.memory_space<vmem>>, vector<2x2x32xf32>
    tpu.vector_store %arg19[%c0_90, %c0_91, %c0_92], %509 {strides = array<i32>} : memref<2x2x32xf32, #tpu.memory_space<vmem>>, vector<2x2x32xf32>,
    %511 = vector.shape_cast %242 : vector<2x32xf32> to vector<1x2x32xf32>
    %512 = vector.shape_cast %495 : vector<2x32xf32> to vector<1x2x32xf32>
    %513 = tpu.concatenate %511, %512 in 0 : vector<1x2x32xf32>, vector<1x2x32xf32> -> vector<2x2x32xf32>
    %c0_93 = arith.constant 0 : index
    %c0_94 = arith.constant 0 : index
    %c0_95 = arith.constant 0 : index
    %514 = vector.load %arg20[%c0_93, %c0_94, %c0_95] : memref<2x2x32xf32, #tpu.memory_space<vmem>>, vector<2x2x32xf32>
    tpu.vector_store %arg20[%c0_93, %c0_94, %c0_95], %513 {strides = array<i32>} : memref<2x2x32xf32, #tpu.memory_space<vmem>>, vector<2x2x32xf32>,
    %c0_96 = arith.constant 0 : index
    %c0_97 = arith.constant 0 : index
    %c0_98 = arith.constant 0 : index
    %515 = vector.load %arg1[%c0_96, %c0_97, %c0_98] : memref<2x8x32xf32, #tpu.memory_space<vmem>>, vector<2x8x32xf32>
    %516 = vector.shape_cast %515 : vector<2x8x32xf32> to vector<16x32xf32>
    %c0_99 = arith.constant 0 : index
    %c0_100 = arith.constant 0 : index
    %517 = vector.load %arg10[%c0_99, %c0_100] : memref<32x32xf32, #tpu.memory_space<vmem>>, vector<32x32xf32>
    %cst_101 = arith.constant dense<0.000000e+00> : vector<16x32xf32>
    %518 = tpu.matmul %516, %517, %cst_101 {dimension_numbers = #tpu.dot_dimension_numbers<[1], [0], [0], [1], [0, 0, 1, 1], [], []>} : vector<16x32xf32>, vector<32x32xf32>, vector<16x32xf32> -> vector<16x32xf32>
    %c0_102 = arith.constant 0 : index
    %c0_103 = arith.constant 0 : index
    %519 = vector.load %arg11[%c0_102, %c0_103] : memref<1x32xf32, #tpu.memory_space<vmem>>, vector<1x32xf32>
    %520 = vector.broadcast %519 : vector<1x32xf32> to vector<16x32xf32>
    %521 = arith.addf %518, %520 : vector<16x32xf32>
    %522 = vector.shape_cast %521 : vector<16x32xf32> to vector<2x8x32xf32>
    %523 = vector.extract_strided_slice %522 {offsets = [0, 0, 0], sizes = [1, 8, 32], strides = [1, 1, 1]} : vector<2x8x32xf32> to vector<1x8x32xf32>
    %524 = vector.shape_cast %523 : vector<1x8x32xf32> to vector<8x32xf32>
    %525 = vector.extract_strided_slice %506 {offsets = [0, 0, 0], sizes = [1, 8, 32], strides = [1, 1, 1]} : vector<2x8x32xf32> to vector<1x8x32xf32>
    %526 = vector.shape_cast %525 : vector<1x8x32xf32> to vector<8x32xf32>
    %cst_104 = arith.constant dense<0.000000e+00> : vector<8x8xf32>
    %527 = tpu.matmul %524, %526, %cst_104 {dimension_numbers = #tpu.dot_dimension_numbers<[1], [1], [0], [0], [0, 0, 1, 0], [], []>} : vector<8x32xf32>, vector<8x32xf32>, vector<8x8xf32> -> vector<8x8xf32>
    %cst_105 = arith.constant dense<0xFF800000> : vector<8xf32>
    %528 = vector.multi_reduction <maximumf>, %527, %cst_105 [0] : vector<8x8xf32> to vector<8xf32>
    %529 = vector.shape_cast %528 : vector<8xf32> to vector<1x8xf32>
    %530 = vector.broadcast %529 : vector<1x8xf32> to vector<8x8xf32>
    %531 = arith.subf %527, %530 : vector<8x8xf32>
    %532 = math.exp %531 : vector<8x8xf32>
    %cst_106 = arith.constant dense<0.000000e+00> : vector<8xf32>
    %533 = vector.multi_reduction <add>, %532, %cst_106 [0] : vector<8x8xf32> to vector<8xf32>
    %534 = vector.shape_cast %533 : vector<8xf32> to vector<1x8xf32>
    %535 = tpu.reciprocal %534 {approx = true} : vector<1x8xf32> -> vector<1x8xf32>
    %536 = vector.broadcast %535 : vector<1x8xf32> to vector<8x8xf32>
    %537 = arith.mulf %532, %536 : vector<8x8xf32>
    %c0_107 = arith.constant 0 : index
    %c0_108 = arith.constant 0 : index
    %c0_109 = arith.constant 0 : index
    %538 = vector.load %arg18[%c0_107, %c0_108, %c0_109] : memref<2x8x8xf32, #tpu.memory_space<vmem>>, vector<1x8x8xf32>
    %539 = vector.shape_cast %538 : vector<1x8x8xf32> to vector<8x8xf32>
    %540 = vector.shape_cast %537 : vector<8x8xf32> to vector<1x8x8xf32>
    tpu.vector_store %arg18[%c0_107, %c0_108, %c0_109], %540 {strides = array<i32>} : memref<2x8x8xf32, #tpu.memory_space<vmem>>, vector<1x8x8xf32>,
    %541 = vector.extract_strided_slice %515 {offsets = [0, 0, 0], sizes = [1, 8, 32], strides = [1, 1, 1]} : vector<2x8x32xf32> to vector<1x8x32xf32>
    %542 = vector.shape_cast %541 : vector<1x8x32xf32> to vector<8x32xf32>
    %cst_110 = arith.constant dense<0.000000e+00> : vector<8x32xf32>
    %543 = tpu.matmul %537, %542, %cst_110 {dimension_numbers = #tpu.dot_dimension_numbers<[0], [0], [1], [1], [0, 1, 1, 1], [], []>} : vector<8x8xf32>, vector<8x32xf32>, vector<8x32xf32> -> vector<8x32xf32>
    %544 = vector.extract_strided_slice %522 {offsets = [1, 0, 0], sizes = [1, 8, 32], strides = [1, 1, 1]} : vector<2x8x32xf32> to vector<1x8x32xf32>
    %545 = vector.shape_cast %544 : vector<1x8x32xf32> to vector<8x32xf32>
    %546 = vector.extract_strided_slice %506 {offsets = [1, 0, 0], sizes = [1, 8, 32], strides = [1, 1, 1]} : vector<2x8x32xf32> to vector<1x8x32xf32>
    %547 = vector.shape_cast %546 : vector<1x8x32xf32> to vector<8x32xf32>
    %cst_111 = arith.constant dense<0.000000e+00> : vector<8x8xf32>
    %548 = tpu.matmul %545, %547, %cst_111 {dimension_numbers = #tpu.dot_dimension_numbers<[1], [1], [0], [0], [0, 0, 1, 0], [], []>} : vector<8x32xf32>, vector<8x32xf32>, vector<8x8xf32> -> vector<8x8xf32>
    %cst_112 = arith.constant dense<0xFF800000> : vector<8xf32>
    %549 = vector.multi_reduction <maximumf>, %548, %cst_112 [0] : vector<8x8xf32> to vector<8xf32>
    %550 = vector.shape_cast %549 : vector<8xf32> to vector<1x8xf32>
    %551 = vector.broadcast %550 : vector<1x8xf32> to vector<8x8xf32>
    %552 = arith.subf %548, %551 : vector<8x8xf32>
    %553 = math.exp %552 : vector<8x8xf32>
    %cst_113 = arith.constant dense<0.000000e+00> : vector<8xf32>
    %554 = vector.multi_reduction <add>, %553, %cst_113 [0] : vector<8x8xf32> to vector<8xf32>
    %555 = vector.shape_cast %554 : vector<8xf32> to vector<1x8xf32>
    %556 = tpu.reciprocal %555 {approx = true} : vector<1x8xf32> -> vector<1x8xf32>
    %557 = vector.broadcast %556 : vector<1x8xf32> to vector<8x8xf32>
    %558 = arith.mulf %553, %557 : vector<8x8xf32>
    %c1_114 = arith.constant 1 : index
    %c0_115 = arith.constant 0 : index
    %c0_116 = arith.constant 0 : index
    %559 = vector.load %arg18[%c1_114, %c0_115, %c0_116] : memref<2x8x8xf32, #tpu.memory_space<vmem>>, vector<1x8x8xf32>
    %560 = vector.shape_cast %559 : vector<1x8x8xf32> to vector<8x8xf32>
    %561 = vector.shape_cast %558 : vector<8x8xf32> to vector<1x8x8xf32>
    tpu.vector_store %arg18[%c1_114, %c0_115, %c0_116], %561 {strides = array<i32>} : memref<2x8x8xf32, #tpu.memory_space<vmem>>, vector<1x8x8xf32>,
    %562 = vector.extract_strided_slice %515 {offsets = [1, 0, 0], sizes = [1, 8, 32], strides = [1, 1, 1]} : vector<2x8x32xf32> to vector<1x8x32xf32>
    %563 = vector.shape_cast %562 : vector<1x8x32xf32> to vector<8x32xf32>
    %cst_117 = arith.constant dense<0.000000e+00> : vector<8x32xf32>
    %564 = tpu.matmul %558, %563, %cst_117 {dimension_numbers = #tpu.dot_dimension_numbers<[0], [0], [1], [1], [0, 1, 1, 1], [], []>} : vector<8x8xf32>, vector<8x32xf32>, vector<8x32xf32> -> vector<8x32xf32>
    %565 = tpu.concatenate %543, %564 in 0 : vector<8x32xf32>, vector<8x32xf32> -> vector<16x32xf32>
    %566 = vector.shape_cast %506 : vector<2x8x32xf32> to vector<16x32xf32>
    %c0_118 = arith.constant 0 : index
    %c0_119 = arith.constant 0 : index
    %567 = vector.load %arg12[%c0_118, %c0_119] : memref<32x32xf32, #tpu.memory_space<vmem>>, vector<32x32xf32>
    %cst_120 = arith.constant dense<0.000000e+00> : vector<16x32xf32>
    %568 = tpu.matmul %566, %567, %cst_120 {dimension_numbers = #tpu.dot_dimension_numbers<[1], [0], [0], [1], [0, 0, 1, 1], [], []>} : vector<16x32xf32>, vector<32x32xf32>, vector<16x32xf32> -> vector<16x32xf32>
    %c0_121 = arith.constant 0 : index
    %c0_122 = arith.constant 0 : index
    %569 = vector.load %arg13[%c0_121, %c0_122] : memref<32x32xf32, #tpu.memory_space<vmem>>, vector<32x32xf32>
    %cst_123 = arith.constant dense<0.000000e+00> : vector<16x32xf32>
    %570 = tpu.matmul %565, %569, %cst_123 {dimension_numbers = #tpu.dot_dimension_numbers<[1], [0], [0], [1], [0, 0, 1, 1], [], []>} : vector<16x32xf32>, vector<32x32xf32>, vector<16x32xf32> -> vector<16x32xf32>
    %571 = arith.addf %568, %570 : vector<16x32xf32>
    %c0_124 = arith.constant 0 : index
    %c0_125 = arith.constant 0 : index
    %572 = vector.load %arg14[%c0_124, %c0_125] : memref<1x32xf32, #tpu.memory_space<vmem>>, vector<1x32xf32>
    %573 = vector.broadcast %572 : vector<1x32xf32> to vector<16x32xf32>
    %574 = arith.addf %571, %573 : vector<16x32xf32>
    %575 = math.tanh %574 : vector<16x32xf32>
    %c0_126 = arith.constant 0 : index
    %c0_127 = arith.constant 0 : index
    %576 = vector.load %arg15[%c0_126, %c0_127] : memref<32x128xf32, #tpu.memory_space<vmem>>, vector<32x128xf32>
    %cst_128 = arith.constant dense<0.000000e+00> : vector<16x128xf32>
    %577 = tpu.matmul %575, %576, %cst_128 {dimension_numbers = #tpu.dot_dimension_numbers<[1], [0], [0], [1], [0, 0, 1, 1], [], []>} : vector<16x32xf32>, vector<32x128xf32>, vector<16x128xf32> -> vector<16x128xf32>
    %c0_129 = arith.constant 0 : index
    %c0_130 = arith.constant 0 : index
    %578 = vector.load %arg16[%c0_129, %c0_130] : memref<1x128xf32, #tpu.memory_space<vmem>>, vector<1x128xf32>
    %579 = vector.broadcast %578 : vector<1x128xf32> to vector<16x128xf32>
    %580 = arith.addf %577, %579 : vector<16x128xf32>
    %581 = vector.shape_cast %580 : vector<16x128xf32> to vector<2x8x128xf32>
    %c0_131 = arith.constant 0 : index
    %c0_132 = arith.constant 0 : index
    %c0_133 = arith.constant 0 : index
    %582 = vector.load %arg17[%c0_131, %c0_132, %c0_133] : memref<2x8x128xf32, #tpu.memory_space<vmem>>, vector<2x8x128xf32>
    tpu.vector_store %arg17[%c0_131, %c0_132, %c0_133], %581 {strides = array<i32>} : memref<2x8x128xf32, #tpu.memory_space<vmem>>, vector<2x8x128xf32>,
    return
  }
}

</mosaic_0001>

<bundles_post_ra>
// kernel: attn_decoder_forward.1
= control target key start
LH: loop header
LB: loop body
LE: loop exit
PB: predicated region body
PF: predicated region fallthrough
CT: control target
= control target key end

     0   :  { %s5564_s0 = inlined_call_operand.hbm [shape: f32[2,8,16], index: 0, kind: input, shape index: {}]   ;;  %s5565_s1 = inlined_call_operand.hbm [shape: f32[2,8,32], index: 1, kind: input, shape index: {}]   ;;  %s5566_s2 = inlined_call_operand.vmem [shape: f32[2,2,32], index: 2, kind: input, shape index: {}]   ;;  %s5567_s3 = inlined_call_operand.vmem [shape: f32[2,2,32], index: 3, kind: input, shape index: {}]   ;;  %s5568_s4 = inlined_call_operand.hbm [shape: f32[16,128], index: 4, kind: input, shape index: {}]   ;;  %s5569_s5 = inlined_call_operand.hbm [shape: f32[32,128], index: 5, kind: input, shape index: {}]   ;;  %s5570_s6 = inlined_call_operand.vmem [shape: f32[1,128], index: 6, kind: input, shape index: {}]   ;;  %s5571_s7 = inlined_call_operand.hbm [shape: f32[32,128], index: 7, kind: input, shape index: {}]   ;;  %s5572_s8 = inlined_call_operand.hbm [shape: f32[32,128], index: 8, kind: input, shape index: {}]   ;;  %s5573_s9 = inlined_call_operand.vmem [shape: f32[1,128], index: 9, kind: input, shape index: {}]   ;;  %s5574_s10 = inlined_call_operand.hbm [shape: f32[32,32], index: 10, kind: input, shape index: {}]   ;;  %s5575_s11 = inlined_call_operand.vmem [shape: f32[1,32], index: 11, kind: input, shape index: {}]   ;;  %s5576_s12 = inlined_call_operand.hbm [shape: f32[32,32], index: 12, kind: input, shape index: {}]   ;;  %s5577_s13 = inlined_call_operand.hbm [shape: f32[32,32], index: 13, kind: input, shape index: {}]   ;;  %s5578_s14 = inlined_call_operand.vmem [shape: f32[1,32], index: 14, kind: input, shape index: {}]   ;;  %s5579_s15 = inlined_call_operand.vmem [shape: f32[32,128], index: 15, kind: input, shape index: {}]   ;;  %s5580_s16 = inlined_call_operand.vmem [shape: f32[1,128], index: 16, kind: input, shape index: {}]   ;;  %s5581_s17 = inlined_call_operand.hbm [shape: f32[2,8,128], index: 17, kind: output, shape index: {0}]   ;;  %s5582_s18 = inlined_call_operand.hbm [shape: f32[2,8,8], index: 18, kind: output, shape index: {1}]   ;;  %s5583_s19 = inlined_call_operand.hbm [shape: f32[2,2,32], index: 19, kind: output, shape index: {2}]   ;;  %s5584_s20 = inlined_call_operand.hbm [shape: f32[2,2,32], index: 20, kind: output, shape index: {3}]  }
   0x1   :  { %5591 = sst [smem:[#allocation31_spill]] %s5564_s0 }
   0x2   :  { %5592 = sst [smem:[#allocation32_spill]] %s5565_s1 }
   0x3   :  { %5593 = sst [smem:[#allocation33_spill]] %s5566_s2 }
   0x4   :  { %5594 = sst [smem:[#allocation34_spill]] %s5567_s3 }
   0x5   :  { %5595 = sst [smem:[#allocation35_spill]] %s5568_s4 }
   0x6   :  { %5596 = sst [smem:[#allocation36_spill]] %s5581_s17 }
   0x7   :  { %26 = vsyncpa [#allocation3], 0 }
   0x8   :  { %27 = vsyncpa [#allocation6], 0 }
   0x9   :  { %28 = vsyncpa [#allocation9], 0 }
   0xa   :  { %29 = vsyncpa [#allocation12], 0 }
   0xb   :  { %30 = vsyncpa [#allocation15], 0 }
   0xc   :  { %31 = vsyncpa [#allocation4], 0 }
   0xd   :  { %32 = vsyncpa [#allocation19], 0 }
   0xe   :  { %33 = vsyncpa [#allocation22], 0  ;;  %s4721_s1 = smov [#allocation5]   ;;  %s4722_s23 = smov [#allocation8]  }
   0xf   :  { %s51_s22 = sshll.u32 %s4721_s1, 4  ;;  %s79_s24 = sshll.u32 %s4722_s23, 4  ;;  %s52_s22 = int_to_ptr.vmem [resolvable:$true] %s51_s22  ;;  %s4848_s24 = int_to_ptr.vmem [resolvable:$true] %s79_s24 }
  0x10   :  { %s5597_s3 = sld [smem:[#allocation32_spill]] }
  0x16   :  { %s4419_s26 = scalar_lea.hbm %s5597_s3, 256 }
  0x17   :  { %p4420_p0 = scmp.ne.s32.totalorder %s5597_s3, %s4419_s26  ;;  %p4423_p1 = scmp.lt.u32.totalorder %s4419_s26, %s5597_s3 }
  0x19   :  { %p4425_p2 = pnand %p4423_p1, %p4420_p0 }
  0x1b   :  { %4428 = shalt.err (!%p4425_p2)
}
  0x1c   :  { %s4429_s30 = scalar_lea.vmem %s52_s22, 256  ;;  %p4434_p4 = scmp.lt.s32.totalorder %s52_s22, %s52_s22 }
  0x1d   :  { %p4430_p3 = scmp.ne.s32.totalorder %s52_s22, %s4429_s30  ;;  %p4435_p5 = scmp.lt.s32.totalorder %s4429_s30, %s4429_s30 }
  0x1f   :  { %p4436_p6 = por %p4435_p5, %p4434_p4 }
  0x21   :  { %p4437_p7 = pnand %p4436_p6, %p4430_p3 }
  0x23   :  { %4440 = shalt.err (!%p4437_p7)
}
  0x24   :  { %s4723_s0 = smov 128   ;;  %s4724_s21 = smov 8  }
  0x25   :  { %57 = dma.hbm_to_vmem [thread:$0]  %s5597_s3, 256, %s52_s22, [#allocation6], %s4723_s0, %s4723_s0, %s4724_s21  }
  0x26   :  { %s4441_s26 = scalar_lea.hbm %s5569_s5, 512 }
  0x27   :  { %p4442_p8 = scmp.ne.s32.totalorder %s5569_s5, %s4441_s26  ;;  %p4445_p9 = scmp.lt.u32.totalorder %s4441_s26, %s5569_s5 }
  0x29   :  { %p4447_p10 = pnand %p4445_p9, %p4442_p8 }
  0x2b   :  { %4450 = shalt.err (!%p4447_p10)
}
  0x2c   :  { %s4451_s30 = scalar_lea.vmem %s4848_s24, 512  ;;  %p4456_p12 = scmp.lt.s32.totalorder %s4848_s24, %s4848_s24 }
  0x2d   :  { %p4452_p11 = scmp.ne.s32.totalorder %s4848_s24, %s4451_s30  ;;  %p4457_p13 = scmp.lt.s32.totalorder %s4451_s30, %s4451_s30 }
  0x2f   :  { %p4458_p0 = por %p4457_p13, %p4456_p12 }
  0x31   :  { %p4459_p1 = pnand %p4458_p0, %p4452_p11 }
  0x33   :  { %4462 = shalt.err (!%p4459_p1)
}
  0x34   :  { %85 = dma.hbm_to_vmem [thread:$0]  %s5569_s5, 512, %s4848_s24, [#allocation9], %s4723_s0, %s4723_s0, %s4724_s21  }
  0x35   :  { %s4725_s1 = smov [#allocation11]   ;;  %s4726_s2 = smov [#allocation14]  }
  0x36   :  { %s105_s23 = sshll.u32 %s4725_s1, 4  ;;  %s133_s25 = sshll.u32 %s4726_s2, 4  ;;  %s106_s23 = int_to_ptr.vmem [resolvable:$true] %s105_s23  ;;  %s4885_s25 = int_to_ptr.vmem [resolvable:$true] %s133_s25 }
  0x37   :  { %s4463_s28 = scalar_lea.hbm %s5572_s8, 512 }
  0x38   :  { %p4464_p2 = scmp.ne.s32.totalorder %s5572_s8, %s4463_s28  ;;  %p4467_p3 = scmp.lt.u32.totalorder %s4463_s28, %s5572_s8 }
  0x3a   :  { %p4469_p4 = pnand %p4467_p3, %p4464_p2 }
  0x3c   :  { %4472 = shalt.err (!%p4469_p4)
}
  0x3d   :  { %s4473_s5 = scalar_lea.vmem %s106_s23, 512  ;;  %p4478_p6 = scmp.lt.s32.totalorder %s106_s23, %s106_s23 }
  0x3e   :  { %p4474_p5 = scmp.ne.s32.totalorder %s106_s23, %s4473_s5  ;;  %p4479_p7 = scmp.lt.s32.totalorder %s4473_s5, %s4473_s5 }
  0x40   :  { %p4480_p8 = por %p4479_p7, %p4478_p6 }
  0x42   :  { %p4481_p9 = pnand %p4480_p8, %p4474_p5 }
  0x44   :  { %4484 = shalt.err (!%p4481_p9)
}
  0x45   :  { %111 = dma.hbm_to_vmem [thread:$0]  %s5572_s8, 512, %s106_s23, [#allocation12], %s4723_s0, %s4723_s0, %s4724_s21  }
  0x46   :  { %s4485_s17 = scalar_lea.hbm %s5576_s12, 512 }
  0x47   :  { %p4486_p10 = scmp.ne.s32.totalorder %s5576_s12, %s4485_s17  ;;  %p4489_p11 = scmp.lt.u32.totalorder %s4485_s17, %s5576_s12 }
  0x49   :  { %p4491_p12 = pnand %p4489_p11, %p4486_p10 }
  0x4b   :  { %4494 = shalt.err (!%p4491_p12)
}
  0x4c   :  { %s4495_s4 = scalar_lea.vmem %s4885_s25, 512  ;;  %p4500_p0 = scmp.lt.s32.totalorder %s4885_s25, %s4885_s25 }
  0x4d   :  { %p4496_p13 = scmp.ne.s32.totalorder %s4885_s25, %s4495_s4  ;;  %p4501_p1 = scmp.lt.s32.totalorder %s4495_s4, %s4495_s4 }
  0x4f   :  { %p4502_p2 = por %p4501_p1, %p4500_p0 }
  0x51   :  { %p4503_p3 = pnand %p4502_p2, %p4496_p13 }
  0x53   :  { %4506 = shalt.err (!%p4503_p3)
}
  0x54   :  { %139 = dma.hbm_to_vmem [thread:$0]  %s5576_s12, 512, %s4885_s25, [#allocation15], %s4723_s0, %s4723_s0, %s4724_s21  }
  0x55   :  { %s4727_s29 = smov [#allocation2]   ;;  %s4728_s5 = smov [#allocation7]  }
  0x56   :  { %s39_s30 = sshll.u32 %s4727_s29, 4  ;;  %s67_s24 = sshll.u32 %s4728_s5, 4  ;;  %s40_s30 = int_to_ptr.vmem [resolvable:$true] %s39_s30  ;;  %s4922_s24 = int_to_ptr.vmem [resolvable:$true] %s67_s24 }
  0x57   :  { %s5598_s1 = sld [smem:[#allocation31_spill]] }
  0x5d   :  { %s4507_s17 = scalar_lea.hbm %s5598_s1, 256 }
  0x5e   :  { %p4508_p4 = scmp.ne.s32.totalorder %s5598_s1, %s4507_s17  ;;  %p4511_p5 = scmp.lt.u32.totalorder %s4507_s17, %s5598_s1 }
  0x60   :  { %p4513_p6 = pnand %p4511_p5, %p4508_p4 }
  0x62   :  { %4516 = shalt.err (!%p4513_p6)
}
  0x63   :  { %s4517_s12 = scalar_lea.vmem %s40_s30, 256  ;;  %p4522_p8 = scmp.lt.s32.totalorder %s40_s30, %s40_s30 }
  0x64   :  { %p4518_p7 = scmp.ne.s32.totalorder %s40_s30, %s4517_s12  ;;  %p4523_p9 = scmp.lt.s32.totalorder %s4517_s12, %s4517_s12 }
  0x66   :  { %p4524_p10 = por %p4523_p9, %p4522_p8 }
  0x68   :  { %p4525_p11 = pnand %p4524_p10, %p4518_p7 }
  0x6a   :  { %4528 = shalt.err (!%p4525_p11)
}
  0x6b   :  { %45 = dma.hbm_to_vmem [thread:$0]  %s5598_s1, 256, %s40_s30, [#allocation3], %s4723_s0, %s4723_s0, %s4724_s21  }
  0x6c   :  { %s5599_s29 = sld [smem:[#allocation35_spill]] }
  0x72   :  { %s4529_s5 = scalar_lea.hbm %s5599_s29, 256 }
  0x73   :  { %p4530_p12 = scmp.ne.s32.totalorder %s5599_s29, %s4529_s5  ;;  %p4533_p13 = scmp.lt.u32.totalorder %s4529_s5, %s5599_s29 }
  0x75   :  { %p4535_p0 = pnand %p4533_p13, %p4530_p12 }
  0x77   :  { %4538 = shalt.err (!%p4535_p0)
}
  0x78   :  { %s4539_s26 = scalar_lea.vmem %s4922_s24, 256  ;;  %p4544_p2 = scmp.lt.s32.totalorder %s4922_s24, %s4922_s24 }
  0x79   :  { %p4540_p1 = scmp.ne.s32.totalorder %s4922_s24, %s4539_s26  ;;  %p4545_p3 = scmp.lt.s32.totalorder %s4539_s26, %s4539_s26 }
  0x7b   :  { %p4546_p4 = por %p4545_p3, %p4544_p2 }
  0x7d   :  { %p4547_p5 = pnand %p4546_p4, %p4540_p1 }
  0x7f   :  { %4550 = shalt.err (!%p4547_p5)
}
  0x80   :  { %73 = dma.hbm_to_vmem [thread:$0]  %s5599_s29, 256, %s4922_s24, [#allocation6], %s4723_s0, %s4723_s0, %s4724_s21  }
  0x81   :  { %s4729_s27 = smov [#allocation10]   ;;  %s4730_s12 = smov [#allocation13]  }
  0x82   :  { %s93_s28 = sshll.u32 %s4729_s27, 4  ;;  %s119_s25 = sshll.u32 %s4730_s12, 4  ;;  %s94_s28 = int_to_ptr.vmem [resolvable:$true] %s93_s28  ;;  %s4959_s25 = int_to_ptr.vmem [resolvable:$true] %s119_s25 }
  0x83   :  { %s4551_s23 = scalar_lea.hbm %s5571_s7, 512 }
  0x84   :  { %p4552_p6 = scmp.ne.s32.totalorder %s5571_s7, %s4551_s23  ;;  %p4555_p7 = scmp.lt.u32.totalorder %s4551_s23, %s5571_s7 }
  0x86   :  { %p4557_p8 = pnand %p4555_p7, %p4552_p6 }
  0x88   :  { %4560 = shalt.err (!%p4557_p8)
}
  0x89   :  { %s4561_s24 = scalar_lea.vmem %s94_s28, 512  ;;  %p4566_p10 = scmp.lt.s32.totalorder %s94_s28, %s94_s28 }
  0x8a   :  { %p4562_p9 = scmp.ne.s32.totalorder %s94_s28, %s4561_s24  ;;  %p4567_p11 = scmp.lt.s32.totalorder %s4561_s24, %s4561_s24 }
  0x8c   :  { %p4568_p12 = por %p4567_p11, %p4566_p10 }
  0x8e   :  { %p4569_p13 = pnand %p4568_p12, %p4562_p9 }
  0x90   :  { %4572 = shalt.err (!%p4569_p13)
}
  0x91   :  { %99 = dma.hbm_to_vmem [thread:$0]  %s5571_s7, 512, %s94_s28, [#allocation9], %s4723_s0, %s4723_s0, %s4724_s21  }
  0x92   :  { %s4573_s1 = scalar_lea.hbm %s5574_s10, 512 }
  0x93   :  { %p4574_p0 = scmp.ne.s32.totalorder %s5574_s10, %s4573_s1  ;;  %p4577_p1 = scmp.lt.u32.totalorder %s4573_s1, %s5574_s10 }
  0x95   :  { %p4579_p2 = pnand %p4577_p1, %p4574_p0 }
  0x97   :  { %4582 = shalt.err (!%p4579_p2)
}
  0x98   :  { %s4583_s23 = scalar_lea.vmem %s4959_s25, 512  ;;  %p4588_p4 = scmp.lt.s32.totalorder %s4959_s25, %s4959_s25 }
  0x99   :  { %p4584_p3 = scmp.ne.s32.totalorder %s4959_s25, %s4583_s23  ;;  %p4589_p5 = scmp.lt.s32.totalorder %s4583_s23, %s4583_s23 }
  0x9b   :  { %p4590_p6 = por %p4589_p5, %p4588_p4 }
  0x9d   :  { %p4591_p7 = pnand %p4590_p6, %p4584_p3 }
  0x9f   :  { %4594 = shalt.err (!%p4591_p7)
}
  0xa0   :  { %125 = dma.hbm_to_vmem [thread:$0]  %s5574_s10, 512, %s4959_s25, [#allocation12], %s4723_s0, %s4723_s0, %s4724_s21  }
  0xa1   :  { %s4731_s5 = smov [#allocation16]   ;;  %s4595_s24 = scalar_lea.hbm %s5577_s13, 512 }
  0xa2   :  { %s145_s22 = sshll.u32 %s4731_s5, 4  ;;  %p4596_p8 = scmp.ne.s32.totalorder %s5577_s13, %s4595_s24  ;;  %s146_s22 = int_to_ptr.vmem [resolvable:$true] %s145_s22 }
  0xa3   :  { %p4599_p9 = scmp.lt.u32.totalorder %s4595_s24, %s5577_s13 }
  0xa5   :  { %p4601_p10 = pnand %p4599_p9, %p4596_p8 }
  0xa7   :  { %4604 = shalt.err (!%p4601_p10)
}
  0xa8   :  { %s4605_s1 = scalar_lea.vmem %s146_s22, 512  ;;  %p4610_p12 = scmp.lt.s32.totalorder %s146_s22, %s146_s22 }
  0xa9   :  { %p4606_p11 = scmp.ne.s32.totalorder %s146_s22, %s4605_s1  ;;  %p4611_p13 = scmp.lt.s32.totalorder %s4605_s1, %s4605_s1 }
  0xab   :  { %p4612_p0 = por %p4611_p13, %p4610_p12 }
  0xad   :  { %p4613_p1 = pnand %p4612_p0, %p4606_p11 }
  0xaf   :  { %4616 = shalt.err (!%p4613_p1)
}
  0xb0   :  { %151 = dma.hbm_to_vmem [thread:$0]  %s5577_s13, 512, %s146_s22, [#allocation15], %s4723_s0, %s4723_s0, %s4724_s21  }
  0xb1   :  { %4705 = dma.done.wait [#allocation3], 256  }
  0xb2   :  { %4706 = vsyncadd [#allocation3], 4294967040 }
  0xb3   :  { %4707 = dma.done.wait [#allocation6], 512  }
  0xb4   :  { %4708 = vsyncadd [#allocation6], 4294966784 }
  0xb5   :  { %4709 = dma.done.wait [#allocation9], 1024  }
  0xb6   :  { %4710 = vsyncadd [#allocation9], 4294966272 }
  0xb7   :  { %4711 = dma.done.wait [#allocation12], 1024  }
  0xb8   :  { %4712 = vsyncadd [#allocation12], 4294966272 }
  0xb9   :  { %4713 = dma.done.wait [#allocation15], 1024  }
  0xba   :  { %4714 = vsyncadd [#allocation15], 4294966272  ;;  %v4732_v0 = vmov 0.0|0.0   ;;  %vm4733_vm0 = vmmov 0   ;;  %v4734_v1 = vmov 0.0   ;;  %vm200_vm1 = vcmask 130048  }
  0xbb   :  { %3991 = vmatprep.subr.bf16.mxu1 %v4732_v0  ;;  %3744 = vmatprep.mubr.msk.f32.mxu1 %vm4733_vm0, %v4734_v1  ;;  %v187_v2 = vld [vmem:[#allocation7] sm:$0xff]  ;;  %v188_v3 = vld [vmem:[#allocation7 + $0x8] sm:$0xff]  ;;  %v189_v4 = vld [vmem:[#allocation8] sm:$0xff]  ;;  %s5600_s12 = sld [smem:[#allocation34_spill]]  ;;  %s4735_s4 = smov 32   ;;  %vm284_vm2 = vcmask 261120  }
  0xbc   :  { %v3987_v5 = vpack.c.bf16 %v188_v3, %v187_v2  ;;  %v190_v6 = vld [vmem:[#allocation8 + $0x8] sm:$0xff]  ;;  %v185_v7 = vld [vmem:[#allocation2] sm:$0xff]  ;;  %v192_v10 = vld [vmem:[#allocation8 + $0x18] sm:$0xff]  ;;  %s5601_s7 = sld [smem:[#allocation33_spill]]  ;;  %s4736_s22 = smov 64   ;;  %vm423_vm3 = vcmask 1041409  }
  0xbd   :  { %v5014_v8 = vpack.c.bf16 %v190_v6, %v189_v4  ;;  %3733 = vmatprep.mubr.msk.f32.mxu0 %vm200_vm1, %v185_v7  ;;  %v191_v9 = vld [vmem:[#allocation8 + $0x10] sm:$0xff]  ;;  %v186_v12 = vld [vmem:[#allocation2 + $0x8] sm:$0xff]  ;;  %vm1398_vm4 = vcmask 1040384   ;;  %vm1401_vm5 = vcmask 1041408   ;;  %vm1404_vm6 = vcmask 1042432  }
  0xbe   :  { %3988 = vmatprep.subr.bf16.mxu0 %v3987_v5  ;;  %v5021_v13 = vpack.c.bf16 %v192_v10, %v191_v9  ;;  %v3534_v18 = vld [vmem:[%s5570_s6] ss:$0 sm:$0xff]  ;;  %vm1407_vm7 = vcmask 1043456   ;;  %vm1410_vm8 = vcmask 1044480   ;;  %vm1413_vm9 = vcmask 1045504  }
  0xbf   :  { %3993 = vmatpush3.bf16.msra.mxu1 %v5014_v8  ;;  %3990 = vmatpush3.bf16.msra.mxu0 %v3987_v5  ;;  %vm1416_vm10 = vcmask 1046528   ;;  %vm2867_vm11 = vcmask 64512   ;;  %vm2669_vm12 = vcmask 253952   ;;  %vm2667_vm13 = vcmask 261127  }
  0xc0   :  { %3994 = vmatprep.subr.bf16.mxu1 %v4732_v0  ;;  %3997 = vmatprep.subr.bf16.mxu0 %v4732_v0 }
  0xc1   :  { %v283_v11 = vld [vmem:[%s5600_s12] sm:$0x3] }
  0xc2   :  { %v379_v14 = vrot.slane %v283_v11, 1  ;;  %3734 = vmatmul.mubr.msk.f32.vlgmr.msra.gmra.mrb[0].mxu0 %vm200_vm1, %v186_v12  ;;  %v282_v15 = vld [vmem:[%s5601_s7] sm:$0x3] }
  0xc3   :  { %3996 = vmatpush3.bf16.msra.mxu1 %v5021_v13  ;;  %3999 = vmatpush3.bf16.msra.mxu0 %v5014_v8 }
  0xc4   :  { %382 = vrot.lane.b32.xlu1 %v379_v14, %s4735_s4  ;;  %4000 = vmatprep.subr.bf16.mxu0 %v4732_v0 }
  0xc5   :  { %3755 = vmatprep.mubr.msk.f32.mxu0 %vm4733_vm0, %v4734_v1  ;;  %4003 = vmatprep.subr.bf16.mxu1 %v4732_v0 }
  0xc6   :  { %3745 = vmatmul.mubr.msk.f32.vlgmr.msra.gmra.mrb[0].mxu1 %vm284_vm2, %v282_v15 }
  0xc7   :  { %4002 = vmatpush3.bf16.msra.mxu0 %v5021_v13  ;;  %4005 = vmatpush3.bf16.msra.mxu1 %v5014_v8 }
  0xc8   :  { %380 = vrot.lane.b32.xlu1 %v283_v11, %s4735_s4  ;;  %4006 = vmatprep.subr.bf16.mxu1 %v4732_v0 }
  0xc9   :  { %3766 = vmatprep.mubr.msk.f32.mxu1 %vm4733_vm0, %v4734_v1  ;;  %4009 = vmatprep.subr.bf16.mxu0 %v4732_v0 }
  0xcb   :  { %4008 = vmatpush3.bf16.msra.mxu1 %v5021_v13 }
  0xcc   :  { %4015 = vmatprep.subr.bf16.mxu1 %v4732_v0 }
 0x136   :  { %v383_v40 = vpop.permute.xlu1 %382 }
 0x13a   :  { %v381_v42 = vpop.permute.xlu1 %380 }
 0x195   :  { %v3735_v16 = vpop.f32.mrb[0].mxu0 }
 0x196   :  { %v273_v17 = vpop.f32.mrb[1].mxu0  ;;  %v5049_v19 = vadd.f32 %v3735_v16, %v3534_v18 }
 0x197   :  { %v5051_v23 = vadd.f32 %v3534_v18, %v273_v17 }
 0x199   :  { %v354_v20 = vpop.f32.mrb[0].mxu1 }
 0x19a   :  { %v359_v21 = vrot.slane %v354_v20, 1  ;;  %v3746_v22 = vpop.f32.mrb[1].mxu1  ;;  %v362_v25 = vadd.f32 %v354_v20, %v5051_v23 }
 0x19c   :  { %v363_v24 = vadd.f32 %v359_v21, %v5049_v19  ;;  %v3538_v29 = vmul.f32 -1.442695, %v362_v25 }
 0x19e   :  { %4151 = vtanh.f32 %v363_v24  ;;  %v3539_v28 = vmul.f32 -1.442695, %v363_v24 }
 0x19f   :  { %4153 = vtanh.f32 %v362_v25 }
 0x1a0   :  { %4155 = vpow2.f32 %v3539_v28 }
 0x1a1   :  { %4157 = vpow2.f32 %v3538_v29 }
 0x1a8   :  { %v4152_v26 = vpop.eup %4151 }
 0x1a9   :  { %392 = vrot.lane.b32.xlu0 %v4152_v26, %s4736_s22  ;;  %v4154_v27 = vpop.eup %4153 }
 0x1aa   :  { %v4156_v30 = vpop.eup %4155 }
 0x1ab   :  { %v371_v31 = vadd.f32 1.0, %v4156_v30  ;;  %v4158_v32 = vpop.eup %4157 }
 0x1ac   :  { %v370_v33 = vadd.f32 1.0, %v4158_v32 }
 0x1ad   :  { %390 = vrot.lane.b32.xlu0 %v4154_v27, %s4736_s22  ;;  %4159 = vrcp.f32 %v371_v31 }
 0x1ae   :  { %4161 = vrcp.f32 %v370_v33 }
 0x1b7   :  { %v4160_v34 = vpop.eup %4159 }
 0x1b8   :  { %v4162_v37 = vpop.eup %4161  ;;  %v387_v41 = vmul.f32 %v4160_v34, %v383_v40 }
 0x1b9   :  { %v386_v45 = vmul.f32 %v4162_v37, %v381_v42 }
 0x21b   :  { %v393_v35 = vpop.permute.xlu0 %392 }
 0x21c   :  { %v397_v36 = vmul.f32 %v4160_v34, %v393_v35 }
 0x21e   :  { %402 = vrot.lane.b32.xlu0 %v397_v36, %s4735_s4 }
 0x21f   :  { %v391_v38 = vpop.permute.xlu0 %390 }
 0x220   :  { %v396_v39 = vmul.f32 %v4162_v37, %v391_v38 }
 0x222   :  { %400 = vrot.lane.b32.xlu1 %v396_v39, %s4735_s4 }
 0x290   :  { %v403_v43 = vpop.permute.xlu0 %402 }
 0x291   :  { %v407_v44 = vadd.f32 %v403_v43, %v387_v41 }
 0x293   :  { %4163 = vtanh.f32 %v407_v44  ;;  %v522_v16 = vrot.slane %v407_v44, 7 }
 0x294   :  { %v401_v46 = vpop.permute.xlu1 %400 }
 0x295   :  { %v406_v47 = vadd.f32 %v401_v46, %v386_v45 }
 0x297   :  { %4165 = vtanh.f32 %v406_v47  ;;  %v521_v18 = vrot.slane %v406_v47, 7 }
 0x29d   :  { %v4164_v48 = vpop.eup %4163 }
 0x29e   :  { %414 = vrot.lane.b32.xlu0 %v4164_v48, %s4736_s22 }
 0x2a1   :  { %v4166_v49 = vpop.eup %4165 }
 0x2a2   :  { %412 = vrot.lane.b32.xlu1 %v4166_v49, %s4736_s22 }
 0x310   :  { %v415_v50 = vpop.permute.xlu0 %414 }
 0x311   :  { %v5061_v51 = vmul.f32 %v4160_v34, %v415_v50 }
 0x313   :  { %v422_v53 = vrot.slane %v5061_v51, 7 }
 0x314   :  { %v413_v52 = vpop.permute.xlu1 %412 }
 0x315   :  { %v5064_v54 = vmul.f32 %v4162_v37, %v413_v52 }
 0x317   :  { %v424_v55 = vsel %vm423_vm3, %v422_v53, %v5064_v54 }
 0x318   :  { %425 = vrot.lane.b32.xlu0 %v424_v55, %s4735_s4 }
 0x38a   :  { %v426_v56 = vpop.permute.xlu0 %425 }
 0x38b   :  { %3756 = vmatmul.mubr.msk.f32.vlgmr.msra.gmra.mrb[2].mxu0 %vm284_vm2, %v426_v56 }
 0x38c   :  { %4011 = vmatpush3.bf16.msra.mxu0 %v5014_v8  ;;  %3777 = vmatprep.mubr.msk.f32.mxu0 %vm4733_vm0, %v4734_v1 }
 0x38d   :  { %4012 = vmatprep.subr.bf16.mxu0 %v4732_v0 }
 0x390   :  { %4014 = vmatpush3.bf16.msra.mxu0 %v5021_v13 }
 0x391   :  { %4021 = vmatprep.subr.bf16.mxu0 %v4732_v0 }
 0x45e   :  { %v495_v57 = vpop.f32.mrb[2].mxu0 }
 0x45f   :  { %v500_v58 = vrot.slane %v495_v57, 7  ;;  %v504_v59 = vadd.f32 %v495_v57, %v5049_v19  ;;  %v3757_v60 = vpop.f32.mrb[3].mxu0 }
 0x461   :  { %v503_v61 = vadd.f32 %v500_v58, %v5051_v23  ;;  %4167 = vtanh.f32 %v504_v59  ;;  %v3542_v2 = vmul.f32 -1.442695, %v504_v59 }
 0x463   :  { %4169 = vtanh.f32 %v503_v61  ;;  %v3541_v3 = vmul.f32 -1.442695, %v503_v61 }
 0x464   :  { %4171 = vpow2.f32 %v3542_v2 }
 0x465   :  { %4173 = vpow2.f32 %v3541_v3 }
 0x46b   :  { %v4168_v62 = vpop.eup %4167 }
 0x46c   :  { %531 = vrot.lane.b32.xlu0 %v4168_v62, %s4736_s22 }
 0x46d   :  { %v4170_v63 = vpop.eup %4169 }
 0x46e   :  { %529 = vrot.lane.b32.xlu1 %v4170_v63, %s4736_s22  ;;  %v4172_v4 = vpop.eup %4171 }
 0x46f   :  { %v4174_v5 = vpop.eup %4173  ;;  %v512_v6 = vadd.f32 1.0, %v4172_v4 }
 0x470   :  { %v511_v7 = vadd.f32 1.0, %v4174_v5 }
 0x471   :  { %4175 = vrcp.f32 %v512_v6 }
 0x472   :  { %4177 = vrcp.f32 %v511_v7 }
 0x47b   :  { %v4176_v9 = vpop.eup %4175 }
 0x47c   :  { %v4178_v12 = vpop.eup %4177  ;;  %v526_v17 = vmul.f32 %v4176_v9, %v522_v16 }
 0x47d   :  { %v525_v22 = vmul.f32 %v4178_v12, %v521_v18 }
 0x4de   :  { %v532_v10 = vpop.permute.xlu0 %531 }
 0x4df   :  { %v536_v11 = vmul.f32 %v4176_v9, %v532_v10 }
 0x4e0   :  { %v530_v14 = vpop.permute.xlu1 %529 }
 0x4e1   :  { %541 = vrot.lane.b32.xlu0 %v536_v11, %s4735_s4  ;;  %v535_v15 = vmul.f32 %v4178_v12, %v530_v14 }
 0x4e3   :  { %539 = vrot.lane.b32.xlu1 %v535_v15, %s4735_s4 }
 0x553   :  { %v542_v20 = vpop.permute.xlu0 %541 }
 0x554   :  { %v546_v21 = vadd.f32 %v542_v20, %v526_v17 }
 0x555   :  { %v540_v24 = vpop.permute.xlu1 %539 }
 0x556   :  { %4179 = vtanh.f32 %v546_v21  ;;  %v545_v25 = vadd.f32 %v540_v24, %v525_v22  ;;  %v661_v58 = vrot.slane %v546_v21, 7 }
 0x558   :  { %4181 = vtanh.f32 %v545_v25  ;;  %v660_v57 = vrot.slane %v545_v25, 7 }
 0x560   :  { %v4180_v26 = vpop.eup %4179 }
 0x561   :  { %553 = vrot.lane.b32.xlu0 %v4180_v26, %s4736_s22 }
 0x562   :  { %v4182_v27 = vpop.eup %4181 }
 0x563   :  { %551 = vrot.lane.b32.xlu1 %v4182_v27, %s4736_s22 }
 0x5d3   :  { %v554_v28 = vpop.permute.xlu0 %553 }
 0x5d4   :  { %v5084_v31 = vmul.f32 %v4176_v9, %v554_v28 }
 0x5d5   :  { %v552_v29 = vpop.permute.xlu1 %551 }
 0x5d6   :  { %v557_v30 = vmul.f32 %v4178_v12, %v552_v29  ;;  %v1400_v11 = vsel %vm1398_vm4, %v5061_v51, %v5084_v31 }
 0x5d8   :  { %v561_v32 = vrot.slane %v557_v30, 1  ;;  %v1399_v9 = vsel %vm1398_vm4, %v5064_v54, %v557_v30 }
 0x5da   :  { %v562_v33 = vsel %vm423_vm3, %v5084_v31, %v561_v32 }
 0x5db   :  { %563 = vrot.lane.b32.xlu1 %v562_v33, %s4735_s4 }
 0x64d   :  { %v564_v34 = vpop.permute.xlu1 %563 }
 0x64e   :  { %3767 = vmatmul.mubr.msk.f32.vlgmr.msra.gmra.mrb[2].mxu1 %vm284_vm2, %v564_v34 }
 0x64f   :  { %4017 = vmatpush3.bf16.msra.mxu1 %v5014_v8  ;;  %3788 = vmatprep.mubr.msk.f32.mxu1 %vm4733_vm0, %v4734_v1 }
 0x650   :  { %4018 = vmatprep.subr.bf16.mxu1 %v4732_v0 }
 0x653   :  { %4020 = vmatpush3.bf16.msra.mxu1 %v5021_v13 }
 0x654   :  { %4027 = vmatprep.subr.bf16.mxu1 %v4732_v0 }
 0x721   :  { %v633_v35 = vpop.f32.mrb[2].mxu1 }
 0x722   :  { %v638_v36 = vrot.slane %v633_v35, 6  ;;  %v639_v37 = vrot.slane %v633_v35, 7  ;;  %v3768_v38 = vpop.f32.mrb[3].mxu1 }
 0x724   :  { %v642_v39 = vadd.f32 %v638_v36, %v5051_v23  ;;  %v643_v40 = vadd.f32 %v639_v37, %v5049_v19 }
 0x726   :  { %4183 = vtanh.f32 %v642_v39  ;;  %v3544_v43 = vmul.f32 -1.442695, %v642_v39  ;;  %v3545_v44 = vmul.f32 -1.442695, %v643_v40 }
 0x727   :  { %4185 = vtanh.f32 %v643_v40 }
 0x728   :  { %4187 = vpow2.f32 %v3544_v43 }
 0x729   :  { %4189 = vpow2.f32 %v3545_v44 }
 0x730   :  { %v4184_v41 = vpop.eup %4183 }
 0x731   :  { %v4186_v42 = vpop.eup %4185  ;;  %668 = vrot.lane.b32.xlu0 %v4184_v41, %s4736_s22 }
 0x732   :  { %670 = vrot.lane.b32.xlu1 %v4186_v42, %s4736_s22  ;;  %v4188_v45 = vpop.eup %4187 }
 0x733   :  { %v4190_v46 = vpop.eup %4189  ;;  %v650_v47 = vadd.f32 1.0, %v4188_v45 }
 0x734   :  { %v651_v48 = vadd.f32 1.0, %v4190_v46 }
 0x735   :  { %4191 = vrcp.f32 %v650_v47 }
 0x736   :  { %4193 = vrcp.f32 %v651_v48 }
 0x73f   :  { %v4192_v49 = vpop.eup %4191 }
 0x740   :  { %v4194_v52 = vpop.eup %4193  ;;  %v664_v59 = vmul.f32 %v4192_v49, %v660_v57 }
 0x741   :  { %v665_v60 = vmul.f32 %v4194_v52, %v661_v58 }
 0x7a3   :  { %v669_v50 = vpop.permute.xlu0 %668 }
 0x7a4   :  { %v671_v53 = vpop.permute.xlu1 %670  ;;  %v674_v55 = vmul.f32 %v4192_v49, %v669_v50 }
 0x7a5   :  { %v675_v56 = vmul.f32 %v4194_v52, %v671_v53 }
 0x7a6   :  { %678 = vrot.lane.b32.xlu0 %v674_v55, %s4735_s4 }
 0x7a7   :  { %680 = vrot.lane.b32.xlu1 %v675_v56, %s4735_s4 }
 0x818   :  { %v679_v61 = vpop.permute.xlu0 %678 }
 0x819   :  { %v681_v62 = vpop.permute.xlu1 %680  ;;  %v684_v63 = vadd.f32 %v679_v61, %v664_v59 }
 0x81a   :  { %v685_v2 = vadd.f32 %v681_v62, %v665_v60 }
 0x81b   :  { %4195 = vtanh.f32 %v684_v63  ;;  %v800_v39 = vrot.slane %v684_v63, 7 }
 0x81c   :  { %4197 = vtanh.f32 %v685_v2  ;;  %v801_v40 = vrot.slane %v685_v2, 7 }
 0x825   :  { %v4196_v3 = vpop.eup %4195 }
 0x826   :  { %v4198_v4 = vpop.eup %4197  ;;  %690 = vrot.lane.b32.xlu0 %v4196_v3, %s4736_s22 }
 0x827   :  { %692 = vrot.lane.b32.xlu1 %v4198_v4, %s4736_s22 }
 0x898   :  { %v691_v5 = vpop.permute.xlu0 %690 }
 0x899   :  { %v693_v6 = vpop.permute.xlu1 %692  ;;  %v696_v7 = vmul.f32 %v4192_v49, %v691_v5 }
 0x89a   :  { %v697_v10 = vmul.f32 %v4194_v52, %v693_v6 }
 0x89b   :  { %v700_v12 = vrot.slane %v696_v7, 2  ;;  %v5110_v14 = vsel %vm1401_vm5, %v1399_v9, %v696_v7 }
 0x89c   :  { %v701_v15 = vrot.slane %v697_v10, 1  ;;  %v5113_v16 = vsel %vm1401_vm5, %v1400_v11, %v697_v10 }
 0x89e   :  { %v702_v17 = vsel %vm423_vm3, %v701_v15, %v700_v12 }
 0x89f   :  { %703 = vrot.lane.b32.xlu0 %v702_v17, %s4735_s4 }
 0x911   :  { %v704_v18 = vpop.permute.xlu0 %703 }
 0x912   :  { %3778 = vmatmul.mubr.msk.f32.vlgmr.msra.gmra.mrb[4].mxu0 %vm284_vm2, %v704_v18 }
 0x913   :  { %4023 = vmatpush3.bf16.msra.mxu0 %v5014_v8  ;;  %3799 = vmatprep.mubr.msk.f32.mxu0 %vm4733_vm0, %v4734_v1 }
 0x914   :  { %4024 = vmatprep.subr.bf16.mxu0 %v4732_v0 }
 0x917   :  { %4026 = vmatpush3.bf16.msra.mxu0 %v5021_v13 }
 0x918   :  { %4033 = vmatprep.subr.bf16.mxu0 %v4732_v0 }
 0x9e5   :  { %v773_v51 = vpop.f32.mrb[4].mxu0 }
 0x9e6   :  { %v778_v54 = vrot.slane %v773_v51, 5  ;;  %v779_v20 = vrot.slane %v773_v51, 6  ;;  %v3779_v21 = vpop.f32.mrb[5].mxu0 }
 0x9e8   :  { %v782_v22 = vadd.f32 %v778_v54, %v5051_v23  ;;  %v783_v24 = vadd.f32 %v779_v20, %v5049_v19 }
 0x9ea   :  { %4199 = vtanh.f32 %v782_v22  ;;  %v3547_v27 = vmul.f32 -1.442695, %v782_v22  ;;  %v3548_v28 = vmul.f32 -1.442695, %v783_v24 }
 0x9eb   :  { %4201 = vtanh.f32 %v783_v24 }
 0x9ec   :  { %4203 = vpow2.f32 %v3547_v27 }
 0x9ed   :  { %4205 = vpow2.f32 %v3548_v28 }
 0x9f4   :  { %v4200_v25 = vpop.eup %4199 }
 0x9f5   :  { %v4202_v26 = vpop.eup %4201  ;;  %808 = vrot.lane.b32.xlu1 %v4200_v25, %s4736_s22 }
 0x9f6   :  { %810 = vrot.lane.b32.xlu0 %v4202_v26, %s4736_s22  ;;  %v4204_v29 = vpop.eup %4203 }
 0x9f7   :  { %v4206_v30 = vpop.eup %4205  ;;  %v790_v31 = vadd.f32 1.0, %v4204_v29 }
 0x9f8   :  { %v791_v32 = vadd.f32 1.0, %v4206_v30 }
 0x9f9   :  { %4207 = vrcp.f32 %v790_v31 }
 0x9fa   :  { %4209 = vrcp.f32 %v791_v32 }
 0xa03   :  { %v4208_v33 = vpop.eup %4207 }
 0xa04   :  { %v4210_v35 = vpop.eup %4209  ;;  %v804_v41 = vmul.f32 %v4208_v33, %v800_v39 }
 0xa05   :  { %v805_v42 = vmul.f32 %v4210_v35, %v801_v40 }
 0xa67   :  { %v809_v34 = vpop.permute.xlu1 %808 }
 0xa68   :  { %v811_v36 = vpop.permute.xlu0 %810  ;;  %v814_v37 = vmul.f32 %v4208_v33, %v809_v34 }
 0xa69   :  { %v815_v38 = vmul.f32 %v4210_v35, %v811_v36 }
 0xa6a   :  { %818 = vrot.lane.b32.xlu1 %v814_v37, %s4735_s4 }
 0xa6b   :  { %820 = vrot.lane.b32.xlu0 %v815_v38, %s4735_s4 }
 0xadc   :  { %v819_v43 = vpop.permute.xlu1 %818 }
 0xadd   :  { %v821_v44 = vpop.permute.xlu0 %820  ;;  %v824_v45 = vadd.f32 %v819_v43, %v804_v41 }
 0xade   :  { %v825_v46 = vadd.f32 %v821_v44, %v805_v42 }
 0xadf   :  { %4211 = vtanh.f32 %v824_v45  ;;  %v940_v20 = vrot.slane %v824_v45, 7 }
 0xae0   :  { %4213 = vtanh.f32 %v825_v46  ;;  %v941_v21 = vrot.slane %v825_v46, 7 }
 0xae9   :  { %v4212_v47 = vpop.eup %4211 }
 0xaea   :  { %v4214_v48 = vpop.eup %4213  ;;  %830 = vrot.lane.b32.xlu1 %v4212_v47, %s4736_s22 }
 0xaeb   :  { %832 = vrot.lane.b32.xlu0 %v4214_v48, %s4736_s22 }
 0xb5c   :  { %v831_v49 = vpop.permute.xlu1 %830 }
 0xb5d   :  { %v833_v50 = vpop.permute.xlu0 %832  ;;  %v836_v52 = vmul.f32 %v4208_v33, %v831_v49 }
 0xb5e   :  { %v837_v53 = vmul.f32 %v4210_v35, %v833_v50 }
 0xb5f   :  { %v840_v55 = vrot.slane %v836_v52, 3  ;;  %v1405_v56 = vsel %vm1404_vm6, %v5110_v14, %v836_v52 }
 0xb60   :  { %v841_v57 = vrot.slane %v837_v53, 2  ;;  %v1406_v58 = vsel %vm1404_vm6, %v5113_v16, %v837_v53 }
 0xb62   :  { %v842_v59 = vsel %vm423_vm3, %v841_v57, %v840_v55 }
 0xb63   :  { %843 = vrot.lane.b32.xlu1 %v842_v59, %s4735_s4 }
 0xbd5   :  { %v844_v60 = vpop.permute.xlu1 %843 }
 0xbd6   :  { %3789 = vmatmul.mubr.msk.f32.vlgmr.msra.gmra.mrb[4].mxu1 %vm284_vm2, %v844_v60 }
 0xbd7   :  { %4029 = vmatpush3.bf16.msra.mxu1 %v5014_v8  ;;  %3810 = vmatprep.mubr.msk.f32.mxu1 %vm4733_vm0, %v4734_v1 }
 0xbd8   :  { %4030 = vmatprep.subr.bf16.mxu1 %v4732_v0 }
 0xbdb   :  { %4032 = vmatpush3.bf16.msra.mxu1 %v5021_v13 }
 0xca9   :  { %v913_v61 = vpop.f32.mrb[4].mxu1 }
 0xcaa   :  { %v918_v62 = vrot.slane %v913_v61, 4  ;;  %v919_v63 = vrot.slane %v913_v61, 5  ;;  %v3790_v2 = vpop.f32.mrb[5].mxu1 }
 0xcac   :  { %v922_v3 = vadd.f32 %v918_v62, %v5051_v23  ;;  %v923_v4 = vadd.f32 %v919_v63, %v5049_v19 }
 0xcae   :  { %4215 = vtanh.f32 %v922_v3  ;;  %v3550_v7 = vmul.f32 -1.442695, %v922_v3  ;;  %v3551_v9 = vmul.f32 -1.442695, %v923_v4 }
 0xcaf   :  { %4217 = vtanh.f32 %v923_v4 }
 0xcb0   :  { %4219 = vpow2.f32 %v3550_v7 }
 0xcb1   :  { %4221 = vpow2.f32 %v3551_v9 }
 0xcb8   :  { %v4216_v5 = vpop.eup %4215 }
 0xcb9   :  { %v4218_v6 = vpop.eup %4217  ;;  %948 = vrot.lane.b32.xlu0 %v4216_v5, %s4736_s22 }
 0xcba   :  { %950 = vrot.lane.b32.xlu1 %v4218_v6, %s4736_s22  ;;  %v4220_v10 = vpop.eup %4219 }
 0xcbb   :  { %v4222_v11 = vpop.eup %4221  ;;  %v930_v12 = vadd.f32 1.0, %v4220_v10 }
 0xcbc   :  { %v931_v14 = vadd.f32 1.0, %v4222_v11 }
 0xcbd   :  { %4223 = vrcp.f32 %v930_v12 }
 0xcbe   :  { %4225 = vrcp.f32 %v931_v14 }
 0xcc7   :  { %v4224_v15 = vpop.eup %4223 }
 0xcc8   :  { %v4226_v17 = vpop.eup %4225  ;;  %v944_v22 = vmul.f32 %v4224_v15, %v940_v20 }
 0xcc9   :  { %v945_v24 = vmul.f32 %v4226_v17, %v941_v21 }
 0xd2b   :  { %v949_v16 = vpop.permute.xlu0 %948 }
 0xd2c   :  { %v951_v18 = vpop.permute.xlu1 %950  ;;  %v954_v51 = vmul.f32 %v4224_v15, %v949_v16 }
 0xd2d   :  { %v955_v54 = vmul.f32 %v4226_v17, %v951_v18 }
 0xd2e   :  { %958 = vrot.lane.b32.xlu0 %v954_v51, %s4735_s4 }
 0xd2f   :  { %960 = vrot.lane.b32.xlu1 %v955_v54, %s4735_s4 }
 0xda0   :  { %v959_v25 = vpop.permute.xlu0 %958 }
 0xda1   :  { %v961_v26 = vpop.permute.xlu1 %960  ;;  %v964_v27 = vadd.f32 %v959_v25, %v944_v22 }
 0xda2   :  { %v965_v28 = vadd.f32 %v961_v26, %v945_v24 }
 0xda3   :  { %4227 = vtanh.f32 %v964_v27  ;;  %v1080_v61 = vrot.slane %v964_v27, 7 }
 0xda4   :  { %4229 = vtanh.f32 %v965_v28  ;;  %v1081_v62 = vrot.slane %v965_v28, 7 }
 0xdad   :  { %v4228_v29 = vpop.eup %4227 }
 0xdae   :  { %v4230_v30 = vpop.eup %4229  ;;  %970 = vrot.lane.b32.xlu0 %v4228_v29, %s4736_s22 }
 0xdaf   :  { %972 = vrot.lane.b32.xlu1 %v4230_v30, %s4736_s22 }
 0xe20   :  { %v971_v31 = vpop.permute.xlu0 %970 }
 0xe21   :  { %v973_v32 = vpop.permute.xlu1 %972  ;;  %v976_v33 = vmul.f32 %v4224_v15, %v971_v31 }
 0xe22   :  { %v977_v34 = vmul.f32 %v4226_v17, %v973_v32 }
 0xe23   :  { %v980_v35 = vrot.slane %v976_v33, 4  ;;  %v5153_v36 = vsel %vm1407_vm7, %v1405_v56, %v976_v33 }
 0xe24   :  { %v981_v37 = vrot.slane %v977_v34, 3  ;;  %v5156_v38 = vsel %vm1407_vm7, %v1406_v58, %v977_v34 }
 0xe26   :  { %v982_v39 = vsel %vm423_vm3, %v981_v37, %v980_v35 }
 0xe27   :  { %983 = vrot.lane.b32.xlu0 %v982_v39, %s4735_s4 }
 0xe99   :  { %v984_v40 = vpop.permute.xlu0 %983 }
 0xe9a   :  { %3800 = vmatmul.mubr.msk.f32.vlgmr.msra.gmra.mrb[6].mxu0 %vm284_vm2, %v984_v40 }
 0xe9b   :  { %4035 = vmatpush3.bf16.msra.mxu0 %v5014_v8  ;;  %3821 = vmatprep.mubr.msk.f32.mxu0 %vm4733_vm0, %v4734_v1 }
 0xe9c   :  { %4036 = vmatprep.subr.bf16.mxu0 %v4732_v0 }
 0xe9f   :  { %4038 = vmatpush3.bf16.msra.mxu0 %v5021_v13 }
 0xea0   :  { %4047 = vmatprep.subr.bf16.mxu0 %v4732_v0 }
 0xf6d   :  { %v1053_v41 = vpop.f32.mrb[6].mxu0 }
 0xf6e   :  { %v1058_v42 = vrot.slane %v1053_v41, 3  ;;  %v1059_v43 = vrot.slane %v1053_v41, 4  ;;  %v3801_v44 = vpop.f32.mrb[7].mxu0 }
 0xf70   :  { %v1062_v45 = vadd.f32 %v1058_v42, %v5051_v23  ;;  %v1063_v46 = vadd.f32 %v1059_v43, %v5049_v19 }
 0xf72   :  { %4231 = vtanh.f32 %v1062_v45  ;;  %v3553_v48 = vmul.f32 -1.442695, %v1062_v45  ;;  %v3554_v13 = vmul.f32 -1.442695, %v1063_v46 }
 0xf73   :  { %4233 = vtanh.f32 %v1063_v46 }
 0xf74   :  { %4235 = vpow2.f32 %v3553_v48 }
 0xf75   :  { %4237 = vpow2.f32 %v3554_v13 }
 0xf7c   :  { %v4232_v8 = vpop.eup %4231 }
 0xf7d   :  { %v4234_v47 = vpop.eup %4233  ;;  %1088 = vrot.lane.b32.xlu1 %v4232_v8, %s4736_s22 }
 0xf7e   :  { %1090 = vrot.lane.b32.xlu0 %v4234_v47, %s4736_s22  ;;  %v4236_v49 = vpop.eup %4235 }
 0xf7f   :  { %v4238_v50 = vpop.eup %4237  ;;  %v1070_v52 = vadd.f32 1.0, %v4236_v49 }
 0xf80   :  { %v1071_v53 = vadd.f32 1.0, %v4238_v50 }
 0xf81   :  { %4239 = vrcp.f32 %v1070_v52 }
 0xf82   :  { %4241 = vrcp.f32 %v1071_v53 }
 0xf8b   :  { %v4240_v55 = vpop.eup %4239 }
 0xf8c   :  { %v4242_v57 = vpop.eup %4241  ;;  %v1084_v63 = vmul.f32 %v4240_v55, %v1080_v61 }
 0xf8d   :  { %v1085_v2 = vmul.f32 %v4242_v57, %v1081_v62 }
 0xfef   :  { %v1089_v56 = vpop.permute.xlu1 %1088 }
 0xff0   :  { %v1091_v58 = vpop.permute.xlu0 %1090  ;;  %v1094_v59 = vmul.f32 %v4240_v55, %v1089_v56 }
 0xff1   :  { %v1095_v60 = vmul.f32 %v4242_v57, %v1091_v58 }
 0xff2   :  { %1098 = vrot.lane.b32.xlu1 %v1094_v59, %s4735_s4 }
 0xff3   :  { %1100 = vrot.lane.b32.xlu0 %v1095_v60, %s4735_s4 }
0x1064   :  { %v1099_v3 = vpop.permute.xlu1 %1098 }
0x1065   :  { %v1101_v4 = vpop.permute.xlu0 %1100  ;;  %v1104_v5 = vadd.f32 %v1099_v3, %v1084_v63 }
0x1066   :  { %v1105_v6 = vadd.f32 %v1101_v4, %v1085_v2 }
0x1067   :  { %4243 = vtanh.f32 %v1104_v5  ;;  %v1220_v41 = vrot.slane %v1104_v5, 7 }
0x1068   :  { %4245 = vtanh.f32 %v1105_v6  ;;  %v1221_v42 = vrot.slane %v1105_v6, 7 }
0x1071   :  { %v4244_v7 = vpop.eup %4243 }
0x1072   :  { %v4246_v9 = vpop.eup %4245  ;;  %1110 = vrot.lane.b32.xlu1 %v4244_v7, %s4736_s22 }
0x1073   :  { %1112 = vrot.lane.b32.xlu0 %v4246_v9, %s4736_s22 }
0x10e4   :  { %v1111_v10 = vpop.permute.xlu1 %1110 }
0x10e5   :  { %v1113_v11 = vpop.permute.xlu0 %1112  ;;  %v1116_v12 = vmul.f32 %v4240_v55, %v1111_v10 }
0x10e6   :  { %v1117_v14 = vmul.f32 %v4242_v57, %v1113_v11 }
0x10e7   :  { %v1120_v15 = vrot.slane %v1116_v12, 5  ;;  %v1411_v16 = vsel %vm1410_vm8, %v5153_v36, %v1116_v12 }
0x10e8   :  { %v1121_v17 = vrot.slane %v1117_v14, 4  ;;  %v1412_v18 = vsel %vm1410_vm8, %v5156_v38, %v1117_v14 }
0x10ea   :  { %v1122_v51 = vsel %vm423_vm3, %v1121_v17, %v1120_v15 }
0x10eb   :  { %1123 = vrot.lane.b32.xlu1 %v1122_v51, %s4735_s4 }
0x115d   :  { %v1124_v54 = vpop.permute.xlu1 %1123 }
0x115e   :  { %3811 = vmatmul.mubr.msk.f32.vlgmr.msra.gmra.mrb[6].mxu1 %vm284_vm2, %v1124_v54 }
0x1231   :  { %v1193_v20 = vpop.f32.mrb[6].mxu1 }
0x1232   :  { %v1198_v21 = vrot.slane %v1193_v20, 2  ;;  %v1199_v22 = vrot.slane %v1193_v20, 3  ;;  %v3812_v24 = vpop.f32.mrb[7].mxu1 }
0x1234   :  { %v1202_v25 = vadd.f32 %v1198_v21, %v5051_v23  ;;  %v1203_v26 = vadd.f32 %v1199_v22, %v5049_v19 }
0x1236   :  { %4247 = vtanh.f32 %v1202_v25  ;;  %v3556_v29 = vmul.f32 -1.442695, %v1202_v25  ;;  %v3557_v30 = vmul.f32 -1.442695, %v1203_v26 }
0x1237   :  { %4249 = vtanh.f32 %v1203_v26 }
0x1238   :  { %4251 = vpow2.f32 %v3556_v29  ;;  %v1423_v29 = vld [vmem:[#allocation11] sm:$0xff] }
0x1239   :  { %4253 = vpow2.f32 %v3557_v30 }
0x1240   :  { %v4248_v27 = vpop.eup %4247 }
0x1241   :  { %v4250_v28 = vpop.eup %4249  ;;  %1228 = vrot.lane.b32.xlu0 %v4248_v27, %s4736_s22  ;;  %v1419_v27 = vld [vmem:[#allocation10] sm:$0xff] }
0x1242   :  { %1230 = vrot.lane.b32.xlu1 %v4250_v28, %s4736_s22  ;;  %v4252_v31 = vpop.eup %4251  ;;  %v1420_v28 = vld [vmem:[#allocation10 + $0x8] sm:$0xff] }
0x1243   :  { %v4254_v32 = vpop.eup %4253  ;;  %v1210_v33 = vadd.f32 1.0, %v4252_v31  ;;  %v4039_v30 = vpack.c.bf16 %v1420_v28, %v1419_v27  ;;  %v1424_v31 = vld [vmem:[#allocation11 + $0x8] sm:$0xff] }
0x1244   :  { %v1211_v34 = vadd.f32 1.0, %v4254_v32  ;;  %v1421_v32 = vld [vmem:[#allocation10 + $0x10] sm:$0xff] }
0x1245   :  { %4255 = vrcp.f32 %v1210_v33  ;;  %v1422_v33 = vld [vmem:[#allocation10 + $0x18] sm:$0xff]  ;;  %4040 = vmatprep.subr.bf16.mxu1 %v4039_v30 }
0x1246   :  { %4257 = vrcp.f32 %v1211_v34  ;;  %v5213_v34 = vpack.c.bf16 %v1424_v31, %v1423_v29  ;;  %4042 = vmatpush3.bf16.msra.mxu1 %v4039_v30 }
0x124f   :  { %v4256_v35 = vpop.eup %4255 }
0x1250   :  { %v4258_v37 = vpop.eup %4257  ;;  %v1224_v43 = vmul.f32 %v4256_v35, %v1220_v41  ;;  %v3564_v41 = vld [vmem:[%s5601_s7 + $0x2] sm:$0x3] }
0x1251   :  { %v1225_v44 = vmul.f32 %v4258_v37, %v1221_v42 }
0x12b3   :  { %v1229_v36 = vpop.permute.xlu0 %1228 }
0x12b4   :  { %v1231_v38 = vpop.permute.xlu1 %1230  ;;  %v1234_v39 = vmul.f32 %v4256_v35, %v1229_v36  ;;  %v1425_v36 = vld [vmem:[#allocation11 + $0x10] sm:$0xff] }
0x12b5   :  { %v1235_v40 = vmul.f32 %v4258_v37, %v1231_v38 }
0x12b6   :  { %1238 = vrot.lane.b32.xlu0 %v1234_v39, %s4735_s4 }
0x12b7   :  { %1240 = vrot.lane.b32.xlu1 %v1235_v40, %s4735_s4 }
0x1328   :  { %v1239_v45 = vpop.permute.xlu0 %1238 }
0x1329   :  { %v1241_v46 = vpop.permute.xlu1 %1240  ;;  %v1244_v8 = vadd.f32 %v1239_v45, %v1224_v43 }
0x132a   :  { %v1245_v47 = vadd.f32 %v1241_v46, %v1225_v44 }
0x132b   :  { %4259 = vtanh.f32 %v1244_v8  ;;  %v1360_v51 = vrot.slane %v1244_v8, 7 }
0x132c   :  { %4261 = vtanh.f32 %v1245_v47  ;;  %v1361_v54 = vrot.slane %v1245_v47, 7 }
0x1335   :  { %v4260_v48 = vpop.eup %4259 }
0x1336   :  { %v4262_v13 = vpop.eup %4261  ;;  %1250 = vrot.lane.b32.xlu0 %v4260_v48, %s4736_s22 }
0x1337   :  { %1252 = vrot.lane.b32.xlu1 %v4262_v13, %s4736_s22 }
0x13a8   :  { %v1251_v49 = vpop.permute.xlu0 %1250 }
0x13a9   :  { %v1253_v50 = vpop.permute.xlu1 %1252  ;;  %v1256_v52 = vmul.f32 %v4256_v35, %v1251_v49  ;;  %v4043_v35 = vpack.c.bf16 %v1422_v33, %v1421_v32 }
0x13aa   :  { %v1257_v53 = vmul.f32 %v4258_v37, %v1253_v50  ;;  %v1426_v37 = vld [vmem:[#allocation11 + $0x18] sm:$0xff]  ;;  %v3561_v50 = vld [vmem:[%s5573_s9] ss:$0 sm:$0xff] }
0x13ab   :  { %v1260_v55 = vrot.slane %v1256_v52, 6  ;;  %v5191_v56 = vsel %vm1413_vm9, %v1411_v16, %v1256_v52  ;;  %v5216_v38 = vpack.c.bf16 %v1426_v37, %v1425_v36  ;;  %4044 = vmatprep.subr.bf16.mxu1 %v4043_v35 }
0x13ac   :  { %v1261_v57 = vrot.slane %v1257_v53, 5  ;;  %v5194_v58 = vsel %vm1413_vm9, %v1412_v18, %v1257_v53  ;;  %4046 = vmatpush3.bf16.msra.mxu1 %v4043_v35 }
0x13ad   :  { %4053 = vmatprep.subr.bf16.mxu1 %v4732_v0 }
0x13ae   :  { %v1262_v59 = vsel %vm423_vm3, %v1261_v57, %v1260_v55 }
0x13af   :  { %1263 = vrot.lane.b32.xlu0 %v1262_v59, %s4735_s4 }
0x1421   :  { %v1264_v60 = vpop.permute.xlu0 %1263 }
0x1422   :  { %3822 = vmatmul.mubr.msk.f32.vlgmr.msra.gmra.mrb[8].mxu0 %vm284_vm2, %v1264_v60  ;;  %v3565_v60 = vld [vmem:[%s5600_s12 + $0x2] sm:$0x3] }
0x1423   :  { %3843 = vmatprep.mubr.msk.f32.mxu0 %vm4733_vm0, %v4734_v1  ;;  %4049 = vmatpush3.bf16.msra.mxu0 %v5213_v34 }
0x1424   :  { %4050 = vmatprep.subr.bf16.mxu0 %v4732_v0 }
0x1427   :  { %4052 = vmatpush3.bf16.msra.mxu0 %v5216_v38 }
0x1428   :  { %4059 = vmatprep.subr.bf16.mxu0 %v4732_v0 }
0x142a   :  { %3844 = vmatmul.mubr.msk.f32.vlgmr.msra.gmra.mrb[10].mxu0 %vm284_vm2, %v3564_v41 }
0x142b   :  { %4061 = vmatpush3.bf16.msra.mxu0 %v5213_v34  ;;  %3865 = vmatprep.mubr.msk.f32.mxu0 %vm4733_vm0, %v4734_v1 }
0x142c   :  { %4062 = vmatprep.subr.bf16.mxu0 %v4732_v0 }
0x142f   :  { %4064 = vmatpush3.bf16.msra.mxu0 %v5216_v38 }
0x1430   :  { %4071 = vmatprep.subr.bf16.mxu0 %v4732_v0 }
0x14f5   :  { %v1333_v61 = vpop.f32.mrb[8].mxu0 }
0x14f6   :  { %v1338_v62 = vrot.slane %v1333_v61, 1  ;;  %v1339_v63 = vrot.slane %v1333_v61, 2  ;;  %v3823_v2 = vpop.f32.mrb[9].mxu0 }
0x14f8   :  { %v1342_v3 = vadd.f32 %v1338_v62, %v5051_v23  ;;  %v1343_v4 = vadd.f32 %v1339_v63, %v5049_v19  ;;  %v1617_v63 = vrot.slane %v3565_v60, 1 }
0x14fa   :  { %4263 = vtanh.f32 %v1342_v3  ;;  %v3559_v7 = vmul.f32 -1.442695, %v1342_v3  ;;  %v3560_v9 = vmul.f32 -1.442695, %v1343_v4 }
0x14fb   :  { %4265 = vtanh.f32 %v1343_v4 }
0x14fc   :  { %4267 = vpow2.f32 %v3559_v7 }
0x14fd   :  { %4269 = vpow2.f32 %v3560_v9  ;;  %v1592_v13 = vpop.f32.mrb[10].mxu0 }
0x14fe   :  { %v3845_v49 = vpop.f32.mrb[11].mxu0  ;;  %v1597_v52 = vrot.slane %v1592_v13, 1 }
0x1504   :  { %v4264_v5 = vpop.eup %4263 }
0x1505   :  { %v4266_v6 = vpop.eup %4265  ;;  %1368 = vrot.lane.b32.xlu1 %v4264_v5, %s4736_s22 }
0x1506   :  { %1370 = vrot.lane.b32.xlu0 %v4266_v6, %s4736_s22  ;;  %v4268_v10 = vpop.eup %4267 }
0x1507   :  { %v4270_v11 = vpop.eup %4269  ;;  %v1350_v12 = vadd.f32 1.0, %v4268_v10 }
0x1508   :  { %v1351_v14 = vadd.f32 1.0, %v4270_v11 }
0x1509   :  { %4271 = vrcp.f32 %v1350_v12 }
0x150a   :  { %4273 = vrcp.f32 %v1351_v14 }
0x1513   :  { %v4272_v23 = vpop.eup %4271 }
0x1514   :  { %v4274_v15 = vpop.eup %4273  ;;  %v1364_v20 = vmul.f32 %v4272_v23, %v1360_v51 }
0x1515   :  { %v1365_v21 = vmul.f32 %v4274_v15, %v1361_v54 }
0x1577   :  { %v1369_v19 = vpop.permute.xlu1 %1368 }
0x1578   :  { %v1371_v16 = vpop.permute.xlu0 %1370  ;;  %v1374_v17 = vmul.f32 %v4272_v23, %v1369_v19 }
0x1579   :  { %v1375_v18 = vmul.f32 %v4274_v15, %v1371_v16 }
0x157a   :  { %1378 = vrot.lane.b32.xlu1 %v1374_v17, %s4735_s4 }
0x157b   :  { %1380 = vrot.lane.b32.xlu0 %v1375_v18, %s4735_s4 }
0x15ec   :  { %v1379_v22 = vpop.permute.xlu1 %1378 }
0x15ed   :  { %v1381_v24 = vpop.permute.xlu0 %1380  ;;  %v5207_v25 = vadd.f32 %v1379_v22, %v1364_v20 }
0x15ee   :  { %v5209_v26 = vadd.f32 %v1381_v24, %v1365_v21 }
0x15ef   :  { %4275 = vtanh.f32 %v5207_v25 }
0x15f0   :  { %4277 = vtanh.f32 %v5209_v26 }
0x15f9   :  { %v4276_v39 = vpop.eup %4275 }
0x15fa   :  { %v4278_v40 = vpop.eup %4277  ;;  %1390 = vrot.lane.b32.xlu1 %v4276_v39, %s4736_s22 }
0x15fb   :  { %1392 = vrot.lane.b32.xlu0 %v4278_v40, %s4736_s22 }
0x166c   :  { %v1391_v42 = vpop.permute.xlu1 %1390 }
0x166d   :  { %v1393_v43 = vpop.permute.xlu0 %1392  ;;  %v5234_v44 = vmul.f32 %v4272_v23, %v1391_v42 }
0x166e   :  { %v5236_v45 = vmul.f32 %v4274_v15, %v1393_v43 }
0x166f   :  { %v1417_v46 = vsel %vm1416_vm10, %v5191_v56, %v5234_v44 }
0x1670   :  { %v1418_v8 = vsel %vm1416_vm10, %v5194_v58, %v5236_v45  ;;  %1436 = vrot.lane.b32.xlu1 %v1417_v46, %s4735_s4 }
0x1671   :  { %1438 = vrot.lane.b32.xlu0 %v1418_v8, %s4735_s4 }
0x16e2   :  { %v1437_v47 = vpop.permute.xlu1 %1436 }
0x16e3   :  { %v1439_v48 = vpop.permute.xlu0 %1438  ;;  %3832 = vmatprep.mubr.msk.f32.mxu1 %vm284_vm2, %v1437_v47 }
0x16e4   :  { %3833 = vmatmul.mubr.msk.f32.vlgmr.msra.gmra.mrb[8].mxu1 %vm284_vm2, %v1439_v48 }
0x16e5   :  { %4055 = vmatpush3.bf16.msra.mxu1 %v5213_v34  ;;  %3854 = vmatprep.mubr.msk.f32.mxu1 %vm4733_vm0, %v4734_v1 }
0x16e6   :  { %4056 = vmatprep.subr.bf16.mxu1 %v4732_v0 }
0x16e9   :  { %4058 = vmatpush3.bf16.msra.mxu1 %v5216_v38 }
0x16ea   :  { %4065 = vmatprep.subr.bf16.mxu1 %v4732_v0 }
0x17b7   :  { %v3834_v53 = vpop.f32.mrb[8].mxu1 }
0x17b8   :  { %v5257_v55 = vadd.f32 %v3834_v53, %v3561_v50  ;;  %v1510_v56 = vpop.f32.mrb[9].mxu1 }
0x17b9   :  { %v5259_v57 = vadd.f32 %v3561_v50, %v1510_v56 }
0x17ba   :  { %v1601_v58 = vadd.f32 %v1597_v52, %v5257_v55 }
0x17bb   :  { %v1600_v59 = vadd.f32 %v1592_v13, %v5259_v57 }
0x17bc   :  { %4279 = vtanh.f32 %v1601_v58  ;;  %v3568_v2 = vmul.f32 -1.442695, %v1601_v58 }
0x17bd   :  { %4281 = vtanh.f32 %v1600_v59  ;;  %v3567_v3 = vmul.f32 -1.442695, %v1600_v59 }
0x17be   :  { %4283 = vpow2.f32 %v3568_v2 }
0x17bf   :  { %4285 = vpow2.f32 %v3567_v3 }
0x17c6   :  { %v4280_v61 = vpop.eup %4279 }
0x17c7   :  { %v4282_v62 = vpop.eup %4281  ;;  %1630 = vrot.lane.b32.xlu1 %v4280_v61, %s4736_s22 }
0x17c8   :  { %1628 = vrot.lane.b32.xlu0 %v4282_v62, %s4736_s22  ;;  %v4284_v4 = vpop.eup %4283 }
0x17c9   :  { %v4286_v5 = vpop.eup %4285  ;;  %v1609_v6 = vadd.f32 1.0, %v4284_v4 }
0x17ca   :  { %v1608_v7 = vadd.f32 1.0, %v4286_v5 }
0x17cb   :  { %1620 = vrot.lane.b32.xlu1 %v1617_v63, %s4735_s4  ;;  %4287 = vrcp.f32 %v1609_v6 }
0x17cc   :  { %1618 = vrot.lane.b32.xlu0 %v3565_v60, %s4735_s4  ;;  %4289 = vrcp.f32 %v1608_v7 }
0x17d5   :  { %v4288_v9 = vpop.eup %4287 }
0x17d6   :  { %v4290_v11 = vpop.eup %4289 }
0x1839   :  { %v1631_v10 = vpop.permute.xlu1 %1630 }
0x183a   :  { %v1635_v12 = vmul.f32 %v4288_v9, %v1631_v10  ;;  %v1629_v14 = vpop.permute.xlu0 %1628 }
0x183b   :  { %v1634_v23 = vmul.f32 %v4290_v11, %v1629_v14 }
0x183c   :  { %1640 = vrot.lane.b32.xlu1 %v1635_v12, %s4735_s4 }
0x183d   :  { %1638 = vrot.lane.b32.xlu0 %v1634_v23, %s4735_s4  ;;  %v1621_v19 = vpop.permute.xlu1 %1620 }
0x183e   :  { %v1619_v15 = vpop.permute.xlu0 %1618  ;;  %v1625_v16 = vmul.f32 %v4288_v9, %v1621_v19 }
0x183f   :  { %v1624_v17 = vmul.f32 %v4290_v11, %v1619_v15 }
0x18ae   :  { %v1641_v18 = vpop.permute.xlu1 %1640 }
0x18af   :  { %v1645_v51 = vadd.f32 %v1641_v18, %v1625_v16  ;;  %v1639_v54 = vpop.permute.xlu0 %1638 }
0x18b0   :  { %v1644_v20 = vadd.f32 %v1639_v54, %v1624_v17 }
0x18b1   :  { %4291 = vtanh.f32 %v1645_v51  ;;  %v1759_v58 = vrot.slane %v1645_v51, 7 }
0x18b2   :  { %4293 = vtanh.f32 %v1644_v20  ;;  %v1758_v60 = vrot.slane %v1644_v20, 7 }
0x18bb   :  { %v4292_v21 = vpop.eup %4291 }
0x18bc   :  { %v4294_v22 = vpop.eup %4293  ;;  %1652 = vrot.lane.b32.xlu1 %v4292_v21, %s4736_s22 }
0x18bd   :  { %1650 = vrot.lane.b32.xlu0 %v4294_v22, %s4736_s22 }
0x192e   :  { %v1653_v24 = vpop.permute.xlu1 %1652 }
0x192f   :  { %v5274_v27 = vmul.f32 %v4288_v9, %v1653_v24  ;;  %v1651_v28 = vpop.permute.xlu0 %1650 }
0x1930   :  { %v5276_v29 = vmul.f32 %v4290_v11, %v1651_v28 }
0x1931   :  { %v1660_v30 = vrot.slane %v5274_v27, 7 }
0x1933   :  { %v1661_v31 = vsel %vm423_vm3, %v1660_v30, %v5276_v29 }
0x1934   :  { %1662 = vrot.lane.b32.xlu1 %v1661_v31, %s4735_s4 }
0x19a6   :  { %v1663_v32 = vpop.permute.xlu1 %1662 }
0x19a7   :  { %3855 = vmatmul.mubr.msk.f32.vlgmr.msra.gmra.mrb[10].mxu1 %vm284_vm2, %v1663_v32 }
0x19a8   :  { %4067 = vmatpush3.bf16.msra.mxu1 %v5213_v34  ;;  %3876 = vmatprep.mubr.msk.f32.mxu1 %vm4733_vm0, %v4734_v1 }
0x19a9   :  { %4068 = vmatprep.subr.bf16.mxu1 %v4732_v0 }
0x19ac   :  { %4070 = vmatpush3.bf16.msra.mxu1 %v5216_v38 }
0x19ad   :  { %4077 = vmatprep.subr.bf16.mxu1 %v4732_v0 }
0x1a7a   :  { %v1732_v33 = vpop.f32.mrb[10].mxu1 }
0x1a7b   :  { %v1737_v35 = vrot.slane %v1732_v33, 7  ;;  %v1741_v36 = vadd.f32 %v1732_v33, %v5257_v55  ;;  %v3856_v37 = vpop.f32.mrb[11].mxu1 }
0x1a7d   :  { %v1740_v39 = vadd.f32 %v1737_v35, %v5259_v57  ;;  %4295 = vtanh.f32 %v1741_v36  ;;  %v3571_v42 = vmul.f32 -1.442695, %v1741_v36 }
0x1a7f   :  { %4297 = vtanh.f32 %v1740_v39  ;;  %v3570_v43 = vmul.f32 -1.442695, %v1740_v39 }
0x1a80   :  { %4299 = vpow2.f32 %v3571_v42 }
0x1a81   :  { %4301 = vpow2.f32 %v3570_v43 }
0x1a87   :  { %v4296_v40 = vpop.eup %4295 }
0x1a88   :  { %1768 = vrot.lane.b32.xlu1 %v4296_v40, %s4736_s22 }
0x1a89   :  { %v4298_v41 = vpop.eup %4297 }
0x1a8a   :  { %1766 = vrot.lane.b32.xlu0 %v4298_v41, %s4736_s22  ;;  %v4300_v46 = vpop.eup %4299 }
0x1a8b   :  { %v4302_v8 = vpop.eup %4301  ;;  %v1749_v47 = vadd.f32 1.0, %v4300_v46 }
0x1a8c   :  { %v1748_v48 = vadd.f32 1.0, %v4302_v8 }
0x1a8d   :  { %4303 = vrcp.f32 %v1749_v47 }
0x1a8e   :  { %4305 = vrcp.f32 %v1748_v48 }
0x1a97   :  { %v4304_v13 = vpop.eup %4303 }
0x1a98   :  { %v4306_v52 = vpop.eup %4305  ;;  %v1763_v59 = vmul.f32 %v4304_v13, %v1759_v58 }
0x1a99   :  { %v1762_v63 = vmul.f32 %v4306_v52, %v1758_v60 }
0x1afa   :  { %v1769_v49 = vpop.permute.xlu1 %1768 }
0x1afb   :  { %v1773_v50 = vmul.f32 %v4304_v13, %v1769_v49 }
0x1afc   :  { %v1767_v53 = vpop.permute.xlu0 %1766 }
0x1afd   :  { %1778 = vrot.lane.b32.xlu1 %v1773_v50, %s4735_s4  ;;  %v1772_v56 = vmul.f32 %v4306_v52, %v1767_v53 }
0x1aff   :  { %1776 = vrot.lane.b32.xlu0 %v1772_v56, %s4735_s4 }
0x1b6f   :  { %v1779_v61 = vpop.permute.xlu1 %1778 }
0x1b70   :  { %v1783_v62 = vadd.f32 %v1779_v61, %v1763_v59 }
0x1b71   :  { %v1777_v2 = vpop.permute.xlu0 %1776 }
0x1b72   :  { %4307 = vtanh.f32 %v1783_v62  ;;  %v1782_v3 = vadd.f32 %v1777_v2, %v1762_v63  ;;  %v1898_v40 = vrot.slane %v1783_v62, 7 }
0x1b74   :  { %4309 = vtanh.f32 %v1782_v3  ;;  %v1897_v39 = vrot.slane %v1782_v3, 7 }
0x1b7c   :  { %v4308_v4 = vpop.eup %4307 }
0x1b7d   :  { %1790 = vrot.lane.b32.xlu1 %v4308_v4, %s4736_s22 }
0x1b7e   :  { %v4310_v5 = vpop.eup %4309 }
0x1b7f   :  { %1788 = vrot.lane.b32.xlu0 %v4310_v5, %s4736_s22 }
0x1bef   :  { %v1791_v6 = vpop.permute.xlu1 %1790 }
0x1bf0   :  { %v1795_v10 = vmul.f32 %v4304_v13, %v1791_v6 }
0x1bf1   :  { %v1789_v7 = vpop.permute.xlu0 %1788 }
0x1bf2   :  { %v1794_v9 = vmul.f32 %v4306_v52, %v1789_v7  ;;  %v2636_v58 = vsel %vm1398_vm4, %v5274_v27, %v1795_v10 }
0x1bf4   :  { %v1798_v11 = vrot.slane %v1794_v9, 1  ;;  %v2635_v53 = vsel %vm1398_vm4, %v5276_v29, %v1794_v9 }
0x1bf6   :  { %v1799_v12 = vsel %vm423_vm3, %v1795_v10, %v1798_v11 }
0x1bf7   :  { %1800 = vrot.lane.b32.xlu0 %v1799_v12, %s4735_s4 }
0x1c69   :  { %v1801_v14 = vpop.permute.xlu0 %1800 }
0x1c6a   :  { %3866 = vmatmul.mubr.msk.f32.vlgmr.msra.gmra.mrb[12].mxu0 %vm284_vm2, %v1801_v14 }
0x1c6b   :  { %4073 = vmatpush3.bf16.msra.mxu0 %v5213_v34  ;;  %3887 = vmatprep.mubr.msk.f32.mxu0 %vm4733_vm0, %v4734_v1 }
0x1c6c   :  { %4074 = vmatprep.subr.bf16.mxu0 %v4732_v0 }
0x1c6f   :  { %4076 = vmatpush3.bf16.msra.mxu0 %v5216_v38 }
0x1c70   :  { %4083 = vmatprep.subr.bf16.mxu0 %v4732_v0 }
0x1d3d   :  { %v1870_v23 = vpop.f32.mrb[12].mxu0 }
0x1d3e   :  { %v1875_v19 = vrot.slane %v1870_v23, 6  ;;  %v1876_v15 = vrot.slane %v1870_v23, 7  ;;  %v3867_v16 = vpop.f32.mrb[13].mxu0 }
0x1d40   :  { %v1879_v17 = vadd.f32 %v1875_v19, %v5259_v57  ;;  %v1880_v18 = vadd.f32 %v1876_v15, %v5257_v55 }
0x1d42   :  { %4311 = vtanh.f32 %v1879_v17  ;;  %v3573_v20 = vmul.f32 -1.442695, %v1879_v17  ;;  %v3574_v21 = vmul.f32 -1.442695, %v1880_v18 }
0x1d43   :  { %4313 = vtanh.f32 %v1880_v18 }
0x1d44   :  { %4315 = vpow2.f32 %v3573_v20 }
0x1d45   :  { %4317 = vpow2.f32 %v3574_v21 }
0x1d4c   :  { %v4312_v51 = vpop.eup %4311 }
0x1d4d   :  { %v4314_v54 = vpop.eup %4313  ;;  %1905 = vrot.lane.b32.xlu1 %v4312_v51, %s4736_s22 }
0x1d4e   :  { %1907 = vrot.lane.b32.xlu0 %v4314_v54, %s4736_s22  ;;  %v4316_v22 = vpop.eup %4315 }
0x1d4f   :  { %v4318_v24 = vpop.eup %4317  ;;  %v1887_v28 = vadd.f32 1.0, %v4316_v22 }
0x1d50   :  { %v1888_v30 = vadd.f32 1.0, %v4318_v24 }
0x1d51   :  { %4319 = vrcp.f32 %v1887_v28 }
0x1d52   :  { %4321 = vrcp.f32 %v1888_v30 }
0x1d5b   :  { %v4320_v31 = vpop.eup %4319 }
0x1d5c   :  { %v4322_v33 = vpop.eup %4321  ;;  %v1901_v41 = vmul.f32 %v4320_v31, %v1897_v39 }
0x1d5d   :  { %v1902_v42 = vmul.f32 %v4322_v33, %v1898_v40 }
0x1dbf   :  { %v1906_v32 = vpop.permute.xlu1 %1905 }
0x1dc0   :  { %v1908_v35 = vpop.permute.xlu0 %1907  ;;  %v1911_v36 = vmul.f32 %v4320_v31, %v1906_v32 }
0x1dc1   :  { %v1912_v37 = vmul.f32 %v4322_v33, %v1908_v35 }
0x1dc2   :  { %1915 = vrot.lane.b32.xlu1 %v1911_v36, %s4735_s4 }
0x1dc3   :  { %1917 = vrot.lane.b32.xlu0 %v1912_v37, %s4735_s4 }
0x1e34   :  { %v1916_v43 = vpop.permute.xlu1 %1915 }
0x1e35   :  { %v1918_v46 = vpop.permute.xlu0 %1917  ;;  %v1921_v8 = vadd.f32 %v1916_v43, %v1901_v41 }
0x1e36   :  { %v1922_v47 = vadd.f32 %v1918_v46, %v1902_v42 }
0x1e37   :  { %4323 = vtanh.f32 %v1921_v8  ;;  %v2037_v20 = vrot.slane %v1921_v8, 7 }
0x1e38   :  { %4325 = vtanh.f32 %v1922_v47  ;;  %v2038_v21 = vrot.slane %v1922_v47, 7 }
0x1e41   :  { %v4324_v48 = vpop.eup %4323 }
0x1e42   :  { %v4326_v13 = vpop.eup %4325  ;;  %1927 = vrot.lane.b32.xlu1 %v4324_v48, %s4736_s22 }
0x1e43   :  { %1929 = vrot.lane.b32.xlu0 %v4326_v13, %s4736_s22 }
0x1eb4   :  { %v1928_v49 = vpop.permute.xlu1 %1927 }
0x1eb5   :  { %v1930_v50 = vpop.permute.xlu0 %1929  ;;  %v1933_v52 = vmul.f32 %v4320_v31, %v1928_v49 }
0x1eb6   :  { %v1934_v56 = vmul.f32 %v4322_v33, %v1930_v50 }
0x1eb7   :  { %v1937_v59 = vrot.slane %v1933_v52, 2  ;;  %v2637_v60 = vsel %vm1401_vm5, %v2635_v53, %v1933_v52 }
0x1eb8   :  { %v1938_v61 = vrot.slane %v1934_v56, 1  ;;  %v2638_v62 = vsel %vm1401_vm5, %v2636_v58, %v1934_v56 }
0x1eba   :  { %v1939_v63 = vsel %vm423_vm3, %v1938_v61, %v1937_v59 }
0x1ebb   :  { %1940 = vrot.lane.b32.xlu1 %v1939_v63, %s4735_s4 }
0x1f2d   :  { %v1941_v2 = vpop.permute.xlu1 %1940 }
0x1f2e   :  { %3877 = vmatmul.mubr.msk.f32.vlgmr.msra.gmra.mrb[12].mxu1 %vm284_vm2, %v1941_v2 }
0x1f2f   :  { %4079 = vmatpush3.bf16.msra.mxu1 %v5213_v34  ;;  %3898 = vmatprep.mubr.msk.f32.mxu1 %vm4733_vm0, %v4734_v1 }
0x1f30   :  { %4080 = vmatprep.subr.bf16.mxu1 %v4732_v0 }
0x1f33   :  { %4082 = vmatpush3.bf16.msra.mxu1 %v5216_v38 }
0x1f34   :  { %4089 = vmatprep.subr.bf16.mxu1 %v4732_v0 }
0x2001   :  { %v2010_v27 = vpop.f32.mrb[12].mxu1 }
0x2002   :  { %v2015_v29 = vrot.slane %v2010_v27, 5  ;;  %v2016_v3 = vrot.slane %v2010_v27, 6  ;;  %v3878_v4 = vpop.f32.mrb[13].mxu1 }
0x2004   :  { %v2019_v5 = vadd.f32 %v2015_v29, %v5259_v57  ;;  %v2020_v6 = vadd.f32 %v2016_v3, %v5257_v55 }
0x2006   :  { %4327 = vtanh.f32 %v2019_v5  ;;  %v3576_v10 = vmul.f32 -1.442695, %v2019_v5  ;;  %v3577_v11 = vmul.f32 -1.442695, %v2020_v6 }
0x2007   :  { %4329 = vtanh.f32 %v2020_v6 }
0x2008   :  { %4331 = vpow2.f32 %v3576_v10 }
0x2009   :  { %4333 = vpow2.f32 %v3577_v11 }
0x2010   :  { %v4328_v7 = vpop.eup %4327 }
0x2011   :  { %v4330_v9 = vpop.eup %4329  ;;  %2045 = vrot.lane.b32.xlu0 %v4328_v7, %s4736_s22 }
0x2012   :  { %2047 = vrot.lane.b32.xlu1 %v4330_v9, %s4736_s22  ;;  %v4332_v12 = vpop.eup %4331 }
0x2013   :  { %v4334_v14 = vpop.eup %4333  ;;  %v2027_v23 = vadd.f32 1.0, %v4332_v12 }
0x2014   :  { %v2028_v19 = vadd.f32 1.0, %v4334_v14 }
0x2015   :  { %4335 = vrcp.f32 %v2027_v23 }
0x2016   :  { %4337 = vrcp.f32 %v2028_v19 }
0x201f   :  { %v4336_v15 = vpop.eup %4335 }
0x2020   :  { %v4338_v17 = vpop.eup %4337  ;;  %v2041_v22 = vmul.f32 %v4336_v15, %v2037_v20 }
0x2021   :  { %v2042_v24 = vmul.f32 %v4338_v17, %v2038_v21 }
0x2083   :  { %v2046_v16 = vpop.permute.xlu0 %2045 }
0x2084   :  { %v2048_v18 = vpop.permute.xlu1 %2047  ;;  %v2051_v51 = vmul.f32 %v4336_v15, %v2046_v16 }
0x2085   :  { %v2052_v54 = vmul.f32 %v4338_v17, %v2048_v18 }
0x2086   :  { %2055 = vrot.lane.b32.xlu0 %v2051_v51, %s4735_s4 }
0x2087   :  { %2057 = vrot.lane.b32.xlu1 %v2052_v54, %s4735_s4 }
0x20f8   :  { %v2056_v28 = vpop.permute.xlu0 %2055 }
0x20f9   :  { %v2058_v30 = vpop.permute.xlu1 %2057  ;;  %v2061_v31 = vadd.f32 %v2056_v28, %v2041_v22 }
0x20fa   :  { %v2062_v32 = vadd.f32 %v2058_v30, %v2042_v24 }
0x20fb   :  { %4339 = vtanh.f32 %v2061_v31  ;;  %v2177_v7 = vrot.slane %v2061_v31, 7 }
0x20fc   :  { %4341 = vtanh.f32 %v2062_v32  ;;  %v2178_v9 = vrot.slane %v2062_v32, 7 }
0x2105   :  { %v4340_v33 = vpop.eup %4339 }
0x2106   :  { %v4342_v35 = vpop.eup %4341  ;;  %2067 = vrot.lane.b32.xlu0 %v4340_v33, %s4736_s22 }
0x2107   :  { %2069 = vrot.lane.b32.xlu1 %v4342_v35, %s4736_s22 }
0x2178   :  { %v2068_v36 = vpop.permute.xlu0 %2067 }
0x2179   :  { %v2070_v37 = vpop.permute.xlu1 %2069  ;;  %v2073_v39 = vmul.f32 %v4336_v15, %v2068_v36 }
0x217a   :  { %v2074_v40 = vmul.f32 %v4338_v17, %v2070_v37 }
0x217b   :  { %v2077_v41 = vrot.slane %v2073_v39, 3  ;;  %v2639_v42 = vsel %vm1404_vm6, %v2637_v60, %v2073_v39 }
0x217c   :  { %v2078_v43 = vrot.slane %v2074_v40, 2  ;;  %v2640_v46 = vsel %vm1404_vm6, %v2638_v62, %v2074_v40 }
0x217e   :  { %v2079_v8 = vsel %vm423_vm3, %v2078_v43, %v2077_v41 }
0x217f   :  { %2080 = vrot.lane.b32.xlu0 %v2079_v8, %s4735_s4 }
0x21f1   :  { %v2081_v47 = vpop.permute.xlu0 %2080 }
0x21f2   :  { %3888 = vmatmul.mubr.msk.f32.vlgmr.msra.gmra.mrb[14].mxu0 %vm284_vm2, %v2081_v47 }
0x21f3   :  { %4085 = vmatpush3.bf16.msra.mxu0 %v5213_v34  ;;  %3909 = vmatprep.mubr.msk.f32.mxu0 %vm4733_vm0, %v4734_v1 }
0x21f4   :  { %4086 = vmatprep.subr.bf16.mxu0 %v4732_v0 }
0x21f7   :  { %4088 = vmatpush3.bf16.msra.mxu0 %v5216_v38 }
0x22c5   :  { %v2150_v48 = vpop.f32.mrb[14].mxu0 }
0x22c6   :  { %v2155_v13 = vrot.slane %v2150_v48, 4  ;;  %v2156_v49 = vrot.slane %v2150_v48, 5  ;;  %v3889_v50 = vpop.f32.mrb[15].mxu0 }
0x22c8   :  { %v2159_v52 = vadd.f32 %v2155_v13, %v5259_v57  ;;  %v2160_v53 = vadd.f32 %v2156_v49, %v5257_v55 }
0x22ca   :  { %4343 = vtanh.f32 %v2159_v52  ;;  %v3579_v59 = vmul.f32 -1.442695, %v2159_v52  ;;  %v3580_v60 = vmul.f32 -1.442695, %v2160_v53 }
0x22cb   :  { %4345 = vtanh.f32 %v2160_v53 }
0x22cc   :  { %4347 = vpow2.f32 %v3579_v59 }
0x22cd   :  { %4349 = vpow2.f32 %v3580_v60 }
0x22d4   :  { %v4344_v56 = vpop.eup %4343 }
0x22d5   :  { %v4346_v58 = vpop.eup %4345  ;;  %2185 = vrot.lane.b32.xlu1 %v4344_v56, %s4736_s22 }
0x22d6   :  { %2187 = vrot.lane.b32.xlu0 %v4346_v58, %s4736_s22  ;;  %v4348_v61 = vpop.eup %4347 }
0x22d7   :  { %v4350_v62 = vpop.eup %4349  ;;  %v2167_v63 = vadd.f32 1.0, %v4348_v61 }
0x22d8   :  { %v2168_v2 = vadd.f32 1.0, %v4350_v62 }
0x22d9   :  { %4351 = vrcp.f32 %v2167_v63 }
0x22da   :  { %4353 = vrcp.f32 %v2168_v2 }
0x22e3   :  { %v4352_v27 = vpop.eup %4351 }
0x22e4   :  { %v4354_v3 = vpop.eup %4353  ;;  %v2181_v10 = vmul.f32 %v4352_v27, %v2177_v7 }
0x22e5   :  { %v2182_v11 = vmul.f32 %v4354_v3, %v2178_v9 }
0x2347   :  { %v2186_v29 = vpop.permute.xlu1 %2185 }
0x2348   :  { %v2188_v4 = vpop.permute.xlu0 %2187  ;;  %v2191_v5 = vmul.f32 %v4352_v27, %v2186_v29 }
0x2349   :  { %v2192_v6 = vmul.f32 %v4354_v3, %v2188_v4 }
0x234a   :  { %2195 = vrot.lane.b32.xlu1 %v2191_v5, %s4735_s4 }
0x234b   :  { %2197 = vrot.lane.b32.xlu0 %v2192_v6, %s4735_s4 }
0x23bc   :  { %v2196_v12 = vpop.permute.xlu1 %2195 }
0x23bd   :  { %v2198_v14 = vpop.permute.xlu0 %2197  ;;  %v2201_v23 = vadd.f32 %v2196_v12, %v2181_v10 }
0x23be   :  { %v2202_v19 = vadd.f32 %v2198_v14, %v2182_v11 }
0x23bf   :  { %4355 = vtanh.f32 %v2201_v23  ;;  %v2317_v50 = vrot.slane %v2201_v23, 7 }
0x23c0   :  { %4357 = vtanh.f32 %v2202_v19  ;;  %v2318_v52 = vrot.slane %v2202_v19, 7 }
0x23c9   :  { %v4356_v15 = vpop.eup %4355 }
0x23ca   :  { %v4358_v16 = vpop.eup %4357  ;;  %2207 = vrot.lane.b32.xlu1 %v4356_v15, %s4736_s22 }
0x23cb   :  { %2209 = vrot.lane.b32.xlu0 %v4358_v16, %s4736_s22 }
0x243c   :  { %v2208_v17 = vpop.permute.xlu1 %2207 }
0x243d   :  { %v2210_v18 = vpop.permute.xlu0 %2209  ;;  %v2213_v51 = vmul.f32 %v4352_v27, %v2208_v17 }
0x243e   :  { %v2214_v54 = vmul.f32 %v4354_v3, %v2210_v18 }
0x243f   :  { %v2217_v20 = vrot.slane %v2213_v51, 4  ;;  %v2641_v21 = vsel %vm1407_vm7, %v2639_v42, %v2213_v51 }
0x2440   :  { %v2218_v22 = vrot.slane %v2214_v54, 3  ;;  %v2642_v24 = vsel %vm1407_vm7, %v2640_v46, %v2214_v54 }
0x2442   :  { %v2219_v28 = vsel %vm423_vm3, %v2218_v22, %v2217_v20 }
0x2443   :  { %2220 = vrot.lane.b32.xlu1 %v2219_v28, %s4735_s4 }
0x24b5   :  { %v2221_v30 = vpop.permute.xlu1 %2220 }
0x24b6   :  { %3899 = vmatmul.mubr.msk.f32.vlgmr.msra.gmra.mrb[14].mxu1 %vm284_vm2, %v2221_v30 }
0x24b7   :  { %4091 = vmatpush3.bf16.msra.mxu1 %v5213_v34  ;;  %3920 = vmatprep.mubr.msk.f32.mxu1 %vm4733_vm0, %v4734_v1 }
0x24b8   :  { %4092 = vmatprep.subr.bf16.mxu1 %v4732_v0 }
0x24bb   :  { %4094 = vmatpush3.bf16.msra.mxu1 %v5216_v38 }
0x24bc   :  { %3934 = vmatprep.subr.mxu1 %v4734_v1 }
0x2589   :  { %v2290_v31 = vpop.f32.mrb[14].mxu1 }
0x258a   :  { %v2295_v32 = vrot.slane %v2290_v31, 3  ;;  %v2296_v33 = vrot.slane %v2290_v31, 4  ;;  %v3900_v35 = vpop.f32.mrb[15].mxu1 }
0x258c   :  { %v2299_v36 = vadd.f32 %v2295_v32, %v5259_v57  ;;  %v2300_v37 = vadd.f32 %v2296_v33, %v5257_v55 }
0x258e   :  { %4359 = vtanh.f32 %v2299_v36  ;;  %v3582_v0 = vmul.f32 -1.442695, %v2299_v36  ;;  %v3583_v38 = vmul.f32 -1.442695, %v2300_v37 }
0x258f   :  { %4361 = vtanh.f32 %v2300_v37 }
0x2590   :  { %4363 = vpow2.f32 %v3582_v0 }
0x2591   :  { %4365 = vpow2.f32 %v3583_v38 }
0x2598   :  { %v4360_v34 = vpop.eup %4359 }
0x2599   :  { %v4362_v39 = vpop.eup %4361  ;;  %2325 = vrot.lane.b32.xlu0 %v4360_v34, %s4736_s22 }
0x259a   :  { %2327 = vrot.lane.b32.xlu1 %v4362_v39, %s4736_s22  ;;  %v4364_v40 = vpop.eup %4363 }
0x259b   :  { %v4366_v41 = vpop.eup %4365  ;;  %v2307_v42 = vadd.f32 1.0, %v4364_v40 }
0x259c   :  { %v2308_v43 = vadd.f32 1.0, %v4366_v41 }
0x259d   :  { %4367 = vrcp.f32 %v2307_v42 }
0x259e   :  { %4369 = vrcp.f32 %v2308_v43 }
0x25a7   :  { %v4368_v46 = vpop.eup %4367 }
0x25a8   :  { %v4370_v47 = vpop.eup %4369  ;;  %v2321_v53 = vmul.f32 %v4368_v46, %v2317_v50 }
0x25a9   :  { %v2322_v56 = vmul.f32 %v4370_v47, %v2318_v52 }
0x260b   :  { %v2326_v8 = vpop.permute.xlu0 %2325 }
0x260c   :  { %v2328_v48 = vpop.permute.xlu1 %2327  ;;  %v2331_v13 = vmul.f32 %v4368_v46, %v2326_v8 }
0x260d   :  { %v2332_v49 = vmul.f32 %v4370_v47, %v2328_v48 }
0x260e   :  { %2335 = vrot.lane.b32.xlu0 %v2331_v13, %s4735_s4 }
0x260f   :  { %2337 = vrot.lane.b32.xlu1 %v2332_v49, %s4735_s4 }
0x2680   :  { %v2336_v58 = vpop.permute.xlu0 %2335 }
0x2681   :  { %v2338_v59 = vpop.permute.xlu1 %2337  ;;  %v2341_v60 = vadd.f32 %v2336_v58, %v2321_v53 }
0x2682   :  { %v2342_v61 = vadd.f32 %v2338_v59, %v2322_v56 }
0x2683   :  { %4371 = vtanh.f32 %v2341_v60  ;;  %v2457_v35 = vrot.slane %v2341_v60, 7 }
0x2684   :  { %4373 = vtanh.f32 %v2342_v61  ;;  %v2458_v36 = vrot.slane %v2342_v61, 7 }
0x268d   :  { %v4372_v62 = vpop.eup %4371 }
0x268e   :  { %v4374_v63 = vpop.eup %4373  ;;  %2347 = vrot.lane.b32.xlu0 %v4372_v62, %s4736_s22 }
0x268f   :  { %2349 = vrot.lane.b32.xlu1 %v4374_v63, %s4736_s22 }
0x2700   :  { %v2348_v2 = vpop.permute.xlu0 %2347 }
0x2701   :  { %v2350_v27 = vpop.permute.xlu1 %2349  ;;  %v2353_v29 = vmul.f32 %v4368_v46, %v2348_v2 }
0x2702   :  { %v2354_v3 = vmul.f32 %v4370_v47, %v2350_v27 }
0x2703   :  { %v2357_v4 = vrot.slane %v2353_v29, 5  ;;  %v2643_v5 = vsel %vm1410_vm8, %v2641_v21, %v2353_v29 }
0x2704   :  { %v2358_v6 = vrot.slane %v2354_v3, 4  ;;  %v2644_v7 = vsel %vm1410_vm8, %v2642_v24, %v2354_v3 }
0x2706   :  { %v2359_v9 = vsel %vm423_vm3, %v2358_v6, %v2357_v4 }
0x2707   :  { %2360 = vrot.lane.b32.xlu0 %v2359_v9, %s4735_s4 }
0x2779   :  { %v2361_v10 = vpop.permute.xlu0 %2360 }
0x277a   :  { %3910 = vmatmul.mubr.msk.f32.vlgmr.msra.gmra.mrb[16].mxu0 %vm284_vm2, %v2361_v10 }
0x284d   :  { %v2430_v11 = vpop.f32.mrb[16].mxu0 }
0x284e   :  { %v2435_v12 = vrot.slane %v2430_v11, 2  ;;  %v2436_v14 = vrot.slane %v2430_v11, 3  ;;  %v3911_v23 = vpop.f32.mrb[17].mxu0 }
0x284f   :  { %v2699_v23 = vld [vmem:[#allocation13 + $0x10] sm:$0xff] }
0x2850   :  { %v2439_v19 = vadd.f32 %v2435_v12, %v5259_v57  ;;  %v2440_v15 = vadd.f32 %v2436_v14, %v5257_v55  ;;  %v2697_v12 = vld [vmem:[#allocation13] sm:$0xff]  ;;  %v2698_v14 = vld [vmem:[#allocation13 + $0x8] sm:$0xff] }
0x2852   :  { %4375 = vtanh.f32 %v2439_v19  ;;  %v3585_v18 = vmul.f32 -1.442695, %v2439_v19  ;;  %v3586_v51 = vmul.f32 -1.442695, %v2440_v15  ;;  %v4095_v19 = vpack.c.bf16 %v2698_v14, %v2697_v12 }
0x2853   :  { %4377 = vtanh.f32 %v2440_v15  ;;  %v2700_v15 = vld [vmem:[#allocation13 + $0x18] sm:$0xff] }
0x2854   :  { %4379 = vpow2.f32 %v3585_v18  ;;  %4096 = vmatprep.subr.bf16.mxu0 %v4095_v19  ;;  %v5411_v18 = vld [vmem:[#allocation5 + $0x8] sm:$0xff] }
0x2855   :  { %4381 = vpow2.f32 %v3586_v51  ;;  %4098 = vmatpush3.bf16.msra.mxu0 %v4095_v19 }
0x285c   :  { %v4376_v16 = vpop.eup %4375 }
0x285d   :  { %v4378_v17 = vpop.eup %4377  ;;  %2465 = vrot.lane.b32.xlu1 %v4376_v16, %s4736_s22  ;;  %v2695_v16 = vld [vmem:[#allocation5] sm:$0xff] }
0x285e   :  { %2467 = vrot.lane.b32.xlu0 %v4378_v17, %s4736_s22  ;;  %v4380_v54 = vpop.eup %4379  ;;  %v4099_v17 = vpack.c.bf16 %v2700_v15, %v2699_v23  ;;  %3931 = vmatprep.mubr.msk.f32.mxu0 %vm284_vm2, %v2695_v16 }
0x285f   :  { %v4382_v20 = vpop.eup %4381  ;;  %v2447_v21 = vadd.f32 1.0, %v4380_v54 }
0x2860   :  { %v2448_v22 = vadd.f32 1.0, %v4382_v20  ;;  %4100 = vmatprep.subr.bf16.mxu0 %v4099_v17 }
0x2861   :  { %4383 = vrcp.f32 %v2447_v21  ;;  %4102 = vmatpush3.bf16.msra.mxu0 %v4099_v17 }
0x2862   :  { %4385 = vrcp.f32 %v2448_v22  ;;  %3939 = vmatprep.subr.mxu0 %v4734_v1 }
0x2864   :  { %3932 = vmatmul.mubr.msk.f32.vlgmr.msra.gmra.mrb[18].mxu0 %vm284_vm2, %v5411_v18 }
0x2865   :  { %3940 = vmatpush3.msra.mxu0 %v2695_v16  ;;  %3941 = vmatprep.mubr.msk.f32.mxu0 %vm4733_vm0, %v4734_v1 }
0x2866   :  { %3949 = vmatprep.subr.mxu0 %v4734_v1 }
0x286b   :  { %v4384_v24 = vpop.eup %4383 }
0x286c   :  { %v4386_v30 = vpop.eup %4385  ;;  %v2461_v37 = vmul.f32 %v4384_v24, %v2457_v35 }
0x286d   :  { %v2462_v34 = vmul.f32 %v4386_v30, %v2458_v36 }
0x28cf   :  { %v2466_v28 = vpop.permute.xlu1 %2465 }
0x28d0   :  { %v2468_v31 = vpop.permute.xlu0 %2467  ;;  %v2471_v32 = vmul.f32 %v4384_v24, %v2466_v28 }
0x28d1   :  { %v2472_v33 = vmul.f32 %v4386_v30, %v2468_v31 }
0x28d2   :  { %2475 = vrot.lane.b32.xlu1 %v2471_v32, %s4735_s4 }
0x28d3   :  { %2477 = vrot.lane.b32.xlu0 %v2472_v33, %s4735_s4 }
0x2937   :  { %v3933_v33 = vpop.f32.mrb[18].mxu0 }
0x2938   :  { %v2780_v35 = vpop.f32.mrb[19].mxu0 }
0x2944   :  { %v2476_v39 = vpop.permute.xlu1 %2475 }
0x2945   :  { %v2478_v0 = vpop.permute.xlu0 %2477  ;;  %v5385_v38 = vadd.f32 %v2476_v39, %v2461_v37 }
0x2946   :  { %v5387_v40 = vadd.f32 %v2478_v0, %v2462_v34 }
0x2947   :  { %4387 = vtanh.f32 %v5385_v38  ;;  %v2597_v51 = vrot.slane %v5385_v38, 7 }
0x2948   :  { %4389 = vtanh.f32 %v5387_v40  ;;  %v2598_v54 = vrot.slane %v5387_v40, 7  ;;  %v3590_v40 = vld [vmem:[%s5575_s11] ss:$0 sm:$0xff]  ;;  %s4737_s11 = smov 96  }
0x2951   :  { %v4388_v41 = vpop.eup %4387 }
0x2952   :  { %v4390_v42 = vpop.eup %4389  ;;  %2487 = vrot.lane.b32.xlu1 %v4388_v41, %s4736_s22 }
0x2953   :  { %2489 = vrot.lane.b32.xlu0 %v4390_v42, %s4736_s22  ;;  %v2781_v42 = vadd.f32 %v3590_v40, %v2780_v35  ;;  %v2677_v35 = vrot.slane %v5209_v26, 7 }
0x29c4   :  { %v2488_v43 = vpop.permute.xlu1 %2487 }
0x29c5   :  { %v2490_v46 = vpop.permute.xlu0 %2489  ;;  %v2493_v8 = vmul.f32 %v4384_v24, %v2488_v43 }
0x29c6   :  { %v2494_v47 = vmul.f32 %v4386_v30, %v2490_v46  ;;  %v2786_v46 = vadd.f32 %v3933_v33, %v3590_v40  ;;  %v3203_v40 = vld [vmem:[#allocation16 + $0x10] sm:$0xff] }
0x29c7   :  { %v2497_v48 = vrot.slane %v2493_v8, 6  ;;  %v5394_v13 = vsel %vm1413_vm9, %v2643_v5, %v2493_v8 }
0x29c8   :  { %v2498_v49 = vrot.slane %v2494_v47, 5  ;;  %v5397_v50 = vsel %vm1413_vm9, %v2644_v7, %v2494_v47 }
0x29ca   :  { %v2499_v52 = vsel %vm423_vm3, %v2498_v49, %v2497_v48 }
0x29cb   :  { %2500 = vrot.lane.b32.xlu1 %v2499_v52, %s4735_s4 }
0x2a3d   :  { %v2501_v53 = vpop.permute.xlu1 %2500 }
0x2a3e   :  { %3921 = vmatmul.mubr.msk.f32.vlgmr.msra.gmra.mrb[16].mxu1 %vm284_vm2, %v2501_v53 }
0x2a3f   :  { %3936 = vmatprep.mubr.msk.f32.mxu1 %vm4733_vm0, %v4734_v1 }
0x2b11   :  { %v2570_v56 = vpop.f32.mrb[16].mxu1 }
0x2b12   :  { %v2575_v58 = vrot.slane %v2570_v56, 1  ;;  %v2576_v59 = vrot.slane %v2570_v56, 2  ;;  %v3922_v60 = vpop.f32.mrb[17].mxu1 }
0x2b14   :  { %v2579_v61 = vadd.f32 %v2575_v58, %v5259_v57  ;;  %v2580_v62 = vadd.f32 %v2576_v59, %v5257_v55 }
0x2b16   :  { %4391 = vtanh.f32 %v2579_v61  ;;  %v3588_v27 = vmul.f32 -1.442695, %v2579_v61  ;;  %v3589_v29 = vmul.f32 -1.442695, %v2580_v62 }
0x2b17   :  { %4393 = vtanh.f32 %v2580_v62 }
0x2b18   :  { %4395 = vpow2.f32 %v3588_v27 }
0x2b19   :  { %4397 = vpow2.f32 %v3589_v29 }
0x2b20   :  { %v4392_v63 = vpop.eup %4391 }
0x2b21   :  { %v4394_v2 = vpop.eup %4393  ;;  %2605 = vrot.lane.b32.xlu0 %v4392_v63, %s4736_s22 }
0x2b22   :  { %2607 = vrot.lane.b32.xlu1 %v4394_v2, %s4736_s22  ;;  %v4396_v3 = vpop.eup %4395 }
0x2b23   :  { %v4398_v4 = vpop.eup %4397  ;;  %v2587_v5 = vadd.f32 1.0, %v4396_v3 }
0x2b24   :  { %v2588_v6 = vadd.f32 1.0, %v4398_v4 }
0x2b25   :  { %4399 = vrcp.f32 %v2587_v5 }
0x2b26   :  { %4401 = vrcp.f32 %v2588_v6 }
0x2b2f   :  { %v4400_v57 = vpop.eup %4399 }
0x2b30   :  { %v4402_v7 = vpop.eup %4401  ;;  %v2601_v20 = vmul.f32 %v4400_v57, %v2597_v51 }
0x2b31   :  { %v2602_v21 = vmul.f32 %v4402_v7, %v2598_v54 }
0x2b93   :  { %v2606_v55 = vpop.permute.xlu0 %2605 }
0x2b94   :  { %v2608_v9 = vpop.permute.xlu1 %2607  ;;  %v2611_v10 = vmul.f32 %v4400_v57, %v2606_v55 }
0x2b95   :  { %v2612_v11 = vmul.f32 %v4402_v7, %v2608_v9 }
0x2b96   :  { %2615 = vrot.lane.b32.xlu0 %v2611_v10, %s4735_s4 }
0x2b97   :  { %2617 = vrot.lane.b32.xlu1 %v2612_v11, %s4735_s4 }
0x2c08   :  { %v2616_v22 = vpop.permute.xlu0 %2615 }
0x2c09   :  { %v2618_v24 = vpop.permute.xlu1 %2617  ;;  %v5421_v28 = vadd.f32 %v2616_v22, %v2601_v20 }
0x2c0a   :  { %v5423_v30 = vadd.f32 %v2618_v24, %v2602_v21 }
0x2c0b   :  { %4403 = vtanh.f32 %v5421_v28 }
0x2c0c   :  { %4405 = vtanh.f32 %v5423_v30 }
0x2c15   :  { %v4404_v31 = vpop.eup %4403 }
0x2c16   :  { %v4406_v32 = vpop.eup %4405  ;;  %2627 = vrot.lane.b32.xlu0 %v4404_v31, %s4736_s22 }
0x2c17   :  { %2629 = vrot.lane.b32.xlu1 %v4406_v32, %s4736_s22  ;;  %v2653_v32 = vrot.slane %v5236_v45, 7 }
0x2c88   :  { %v2628_v36 = vpop.permute.xlu0 %2627 }
0x2c89   :  { %v2630_v37 = vpop.permute.xlu1 %2629  ;;  %v5429_v34 = vmul.f32 %v4400_v57, %v2628_v36  ;;  %v3201_v36 = vld [vmem:[#allocation16] sm:$0xff] }
0x2c8a   :  { %v5431_v39 = vmul.f32 %v4402_v7, %v2630_v37  ;;  %v3202_v37 = vld [vmem:[#allocation16 + $0x8] sm:$0xff] }
0x2c8b   :  { %v2647_v0 = vsel %vm1416_vm10, %v5394_v13, %v5429_v34 }
0x2c8c   :  { %v2648_v38 = vsel %vm1416_vm10, %v5397_v50, %v5431_v39  ;;  %2790 = vrot.lane.b32.xlu0 %v2647_v0, %s4735_s4  ;;  %v2654_v33 = vrot.slane %v5431_v39, 7  ;;  %v4103_v0 = vpack.c.bf16 %v3202_v37, %v3201_v36 }
0x2c8d   :  { %2994 = vrot.lane.b32.xlu1 %v2648_v38, %s4735_s4  ;;  %v2678_v38 = vrot.slane %v5423_v30, 7 }
0x2cfe   :  { %v5444_v41 = vpop.permute.xlu0 %2790 }
0x2cff   :  { %3935 = vmatpush3.xpose.msk.msra.mxu1 %vm284_vm2, %v5444_v41  ;;  %v5449_v43 = vpop.permute.xlu1 %2994 }
0x2d00   :  { %3944 = vmatprep.subr.mxu1 %v4734_v1 }
0x2d02   :  { %3937 = vmatmul.mubr.msk.f32.vlgmr.msra.gmra.mrb[18].mxu1 %vm284_vm2, %v2781_v42  ;;  %v3204_v42 = vld [vmem:[#allocation16 + $0x18] sm:$0xff] }
0x2d03   :  { %3945 = vmatpush3.xpose.msk.msra.mxu1 %vm284_vm2, %v5449_v43  ;;  %3946 = vmatprep.mubr.msk.f32.mxu1 %vm4733_vm0, %v4734_v1 }
0x2d04   :  { %4104 = vmatprep.subr.bf16.mxu1 %v4103_v0 }
0x2d06   :  { %3947 = vmatmul.mubr.msk.f32.vlgmr.msra.gmra.mrb[20].mxu1 %vm284_vm2, %v2786_v46  ;;  %v4107_v46 = vpack.c.bf16 %v3204_v42, %v3203_v40 }
0x2d07   :  { %4106 = vmatpush3.bf16.msra.mxu1 %v4103_v0 }
0x2d08   :  { %4108 = vmatprep.subr.bf16.mxu1 %v4107_v46 }
0x2d0b   :  { %4110 = vmatpush3.bf16.msra.mxu1 %v4107_v46 }
0x2dd5   :  { %v2863_v8 = vpop.f32.mrb[18].mxu1 }
0x2dd6   :  { %v2868_v47 = vsel %vm2867_vm11, %v2863_v8, -inf  ;;  %v3938_v48 = vpop.f32.mrb[19].mxu1 }
0x2dd7   :  { %v2869_v13 = vrot.slane %v2868_v47, 4 }
0x2dd9   :  { %v2870_v49 = vmax.f32 %v2868_v47, %v2869_v13  ;;  %v3067_v50 = vpop.f32.mrb[20].mxu1  ;;  %v3198_v47 = vld [vmem:[#allocation14 + $0x8] sm:$0xff] }
0x2dda   :  { %v3071_v52 = vsel %vm2867_vm11, %v3067_v50, -inf  ;;  %v3948_v53 = vpop.f32.mrb[21].mxu1 }
0x2ddb   :  { %v2871_v56 = vrot.slane %v2870_v49, 2  ;;  %v3072_v58 = vrot.slane %v3071_v52, 4 }
0x2ddd   :  { %v2872_v59 = vmax.f32 %v2870_v49, %v2871_v56  ;;  %v3073_v60 = vmax.f32 %v3071_v52, %v3072_v58  ;;  %v3199_v49 = vld [vmem:[#allocation14 + $0x10] sm:$0xff] }
0x2ddf   :  { %v2873_v61 = vrot.slane %v2872_v59, 1  ;;  %v3074_v62 = vrot.slane %v3073_v60, 2 }
0x2de1   :  { %v2874_v63 = vmax.f32 %v2872_v59, %v2873_v61  ;;  %v3075_v2 = vmax.f32 %v3073_v60, %v3074_v62  ;;  %v3372_v59 = vld [vmem:[%s5579_s15] sm:$0xff]  ;;  %v3373_v60 = vld [vmem:[%s5579_s15 + $0x8] sm:$0xff]  ;;  %v3374_v61 = vld [vmem:[%s5579_s15 + $0x10] sm:$0xff] }
0x2de2   :  { %v4119_v62 = vpack.c.bf16 %v3373_v60, %v3372_v59 }
0x2de3   :  { %v2875_v27 = vsub.f32 %v2863_v8, %v2874_v63  ;;  %v3076_v29 = vrot.slane %v3075_v2, 1  ;;  %v3197_v8 = vld [vmem:[#allocation14] sm:$0xff] }
0x2de4   :  { %v4111_v48 = vpack.c.bf16 %v3198_v47, %v3197_v8 }
0x2de5   :  { %v2876_v3 = vmul.f32 1.442695, %v2875_v27  ;;  %v3077_v4 = vmax.f32 %v3075_v2, %v3076_v29 }
0x2de6   :  { %4112 = vmatprep.subr.bf16.mxu1 %v4111_v48 }
0x2de7   :  { %4407 = vpow2.f32 %v2876_v3  ;;  %v3078_v5 = vsub.f32 %v3067_v50, %v3077_v4  ;;  %v3200_v50 = vld [vmem:[#allocation14 + $0x18] sm:$0xff] }
0x2de8   :  { %v4115_v53 = vpack.c.bf16 %v3200_v50, %v3199_v49 }
0x2de9   :  { %v3079_v6 = vmul.f32 1.442695, %v3078_v5 }
0x2deb   :  { %4409 = vpow2.f32 %v3079_v6 }
0x2df1   :  { %v4408_v57 = vpop.eup %4407 }
0x2df2   :  { %v2878_v55 = vsel %vm2867_vm11, %v4408_v57, 0.0 }
0x2df3   :  { %v2879_v7 = vrot.slane %v2878_v55, 4 }
0x2df5   :  { %v4410_v9 = vpop.eup %4409  ;;  %v2880_v10 = vadd.f32 %v2879_v7, %v2878_v55 }
0x2df6   :  { %v3081_v11 = vsel %vm2867_vm11, %v4410_v9, 0.0 }
0x2df7   :  { %v2881_v12 = vrot.slane %v2880_v10, 2  ;;  %v3082_v14 = vrot.slane %v3081_v11, 4 }
0x2df9   :  { %v2882_v23 = vadd.f32 %v2881_v12, %v2880_v10  ;;  %v3083_v19 = vadd.f32 %v3082_v14, %v3081_v11 }
0x2dfb   :  { %v3084_v15 = vrot.slane %v3083_v19, 2  ;;  %v2883_v16 = vrot.slane %v2882_v23, 1 }
0x2dfd   :  { %v3085_v17 = vadd.f32 %v3084_v15, %v3083_v19  ;;  %v2884_v51 = vadd.f32 %v2883_v16, %v2882_v23 }
0x2dff   :  { %4411 = vrcp.f32 %v2884_v51  ;;  %v3086_v54 = vrot.slane %v3085_v17, 1 }
0x2e01   :  { %v3087_v20 = vadd.f32 %v3086_v54, %v3085_v17 }
0x2e03   :  { %4413 = vrcp.f32 %v3087_v20 }
0x2e09   :  { %v4412_v21 = vpop.eup %4411 }
0x2e0a   :  { %v2886_v22 = vmul.f32 %v4412_v21, %v4408_v57 }
0x2e0c   :  { %2888 = vxpose.xlu0.b32.start.end [1/1] (short) (narrow) %v2886_v22, 8  ;;  %2887 = vst.msk [vmem:[#allocation18] sm:$0xff] %vm2867_vm11, %v2886_v22 }
0x2e0d   :  { %v4414_v24 = vpop.eup %4413 }
0x2e0e   :  { %v3089_v31 = vmul.f32 %v4414_v24, %v4410_v9 }
0x2e10   :  { %3092 = vxpose.xlu1.b32.start.end [1/1] (short) (narrow) %v3089_v31, 8  ;;  %3091 = vst.msk [vmem:[#allocation18 + $0x8] sm:$0xff] %vm2867_vm11, %v3089_v31 }
0x2e2e   :  { %2657 = vrot.lane.b32.xlu1 %v2653_v32, %s4735_s4 }
0x2e32   :  { %2661 = vrot.lane.b32.xlu1 %v2654_v33, %s4735_s4 }
0x2e35   :  { %2655 = vrot.lane.b32.xlu0 %v5234_v44, %s4735_s4 }
0x2e36   :  { %2681 = vrot.lane.b32.xlu1 %v2677_v35, %s4737_s11 }
0x2e39   :  { %2659 = vrot.lane.b32.xlu0 %v5429_v34, %s4735_s4 }
0x2e3a   :  { %2685 = vrot.lane.b32.xlu1 %v2678_v38, %s4737_s11 }
0x2e3d   :  { %2679 = vrot.lane.b32.xlu0 %v5207_v25, %s4737_s11 }
0x2e41   :  { %2683 = vrot.lane.b32.xlu0 %v5421_v28, %s4737_s11 }
0x2e8c   :  { %v2904_v26 = vpop.trf.xlu0 }
0x2e8d   :  { %3942 = vmatmul.mubr.msk.f32.vlgmr.msra.gmra.mrb[20].mxu0 %vm2867_vm11, %v2904_v26 }
0x2e8e   :  { %3950 = vmatpush3.msra.mxu0 %v5411_v18  ;;  %3951 = vmatprep.mubr.msk.f32.mxu0 %vm4733_vm0, %v4734_v1 }
0x2e8f   :  { %4120 = vmatprep.subr.bf16.mxu0 %v4119_v62 }
0x2e90   :  { %v3108_v44 = vpop.trf.xlu1 }
0x2e91   :  { %3952 = vmatmul.mubr.msk.f32.vlgmr.msra.gmra.mrb[22].mxu0 %vm2867_vm11, %v3108_v44 }
0x2e92   :  { %4122 = vmatpush3.bf16.msra.mxu0 %v4119_v62 }
0x2ea0   :  { %v2658_v45 = vpop.permute.xlu1 %2657 }
0x2ea1   :  { %2670 = vst.msk [vmem:[#allocation20 + $0x1] sm:$0x1] %vm2669_vm12, %v2658_v45 }
0x2ea4   :  { %v2662_v30 = vpop.permute.xlu1 %2661 }
0x2ea5   :  { %2672 = vst.msk [vmem:[#allocation20 + $0x3] sm:$0x1] %vm2669_vm12, %v2662_v30 }
0x2ea7   :  { %v2656_v25 = vpop.permute.xlu0 %2655 }
0x2ea8   :  { %2668 = vst.msk [vmem:[#allocation20 - $0x7] sm:$0x80] %vm2667_vm13, %v2656_v25  ;;  %v2682_v28 = vpop.permute.xlu1 %2681 }
0x2ea9   :  { %2692 = vst.msk [vmem:[#allocation21 + $0x1] sm:$0x1] %vm2669_vm12, %v2682_v28 }
0x2eab   :  { %v2660_v34 = vpop.permute.xlu0 %2659 }
0x2eac   :  { %2671 = vst.msk [vmem:[#allocation20 - $0x5] sm:$0x80] %vm2667_vm13, %v2660_v34  ;;  %v2686_v39 = vpop.permute.xlu1 %2685 }
0x2ead   :  { %2694 = vst.msk [vmem:[#allocation21 + $0x3] sm:$0x1] %vm2669_vm12, %v2686_v39 }
0x2eaf   :  { %v2680_v18 = vpop.permute.xlu0 %2679 }
0x2eb0   :  { %2691 = vst.msk [vmem:[#allocation21 - $0x7] sm:$0x80] %vm2667_vm13, %v2680_v18 }
0x2eb3   :  { %v2684_v1 = vpop.permute.xlu0 %2683 }
0x2eb4   :  { %2693 = vst.msk [vmem:[#allocation21 - $0x5] sm:$0x80] %vm2667_vm13, %v2684_v1 }
0x2f60   :  { %v2989_v13 = vpop.f32.mrb[20].mxu0 }
0x2f61   :  { %v3943_v52 = vpop.f32.mrb[21].mxu0  ;;  %3962 = vmatprep.mubr.msk.f32.mxu1 %vm284_vm2, %v2989_v13 }
0x2f64   :  { %v3193_v56 = vpop.f32.mrb[22].mxu0 }
0x2f65   :  { %v3953_v58 = vpop.f32.mrb[23].mxu0  ;;  %3963 = vmatmul.mubr.msk.f32.vlgmr.msra.gmra.mrb[22].mxu1 %vm284_vm2, %v3193_v56 }
0x2f66   :  { %4114 = vmatpush3.bf16.msra.mxu1 %v4111_v48  ;;  %3973 = vmatprep.mubr.msk.f32.mxu1 %vm284_vm2, %v5444_v41  ;;  %v3375_v41 = vld [vmem:[%s5579_s15 + $0x18] sm:$0xff]  ;;  %s4738_s15 = smov [#allocation18]  }
0x2f67   :  { %4116 = vmatprep.subr.bf16.mxu1 %v4115_v53  ;;  %v4123_v63 = vpack.c.bf16 %v3375_v41, %v3374_v61  ;;  %s3483_s28 = sshll.u32 %s4738_s15, 4  ;;  %s3484_s28 = int_to_ptr.vmem [resolvable:$true] %s3483_s28 }
0x2f68   :  { %s4617_s5 = scalar_lea.vmem %s3484_s28, 256  ;;  %p4622_p3 = scmp.lt.s32.totalorder %s3484_s28, %s3484_s28 }
0x2f69   :  { %4124 = vmatprep.subr.bf16.mxu0 %v4123_v63  ;;  %p4618_p2 = scmp.ne.s32.totalorder %s3484_s28, %s4617_s5  ;;  %p4623_p4 = scmp.lt.s32.totalorder %s4617_s5, %s4617_s5 }
0x2f6a   :  { %4118 = vmatpush3.bf16.msra.mxu1 %v4115_v53  ;;  %4126 = vmatpush3.bf16.msra.mxu0 %v4123_v63 }
0x2f6b   :  { %p4624_p5 = por %p4623_p4, %p4622_p3 }
0x2f6d   :  { %3974 = vmatmul.mubr.msk.f32.vlgmr.msra.gmra.mrb[22].mxu1 %vm284_vm2, %v5449_v43  ;;  %v3603_v43 = vld [vmem:[%s5578_s14] ss:$0 sm:$0xff]  ;;  %p4625_p6 = pnand %p4624_p5, %p4618_p2 }
0x3040   :  { %v3975_v2 = vpop.f32.mrb[22].mxu1 }
0x3041   :  { %v3369_v27 = vadd.f32 %v3975_v2, %v3603_v43  ;;  %v3352_v29 = vpop.f32.mrb[23].mxu1 }
0x3042   :  { %v3368_v3 = vadd.f32 %v3603_v43, %v3352_v29 }
0x3044   :  { %4415 = vtanh.f32 %v3368_v3 }
0x3045   :  { %4417 = vtanh.f32 %v3369_v27 }
0x304e   :  { %v4416_v4 = vpop.eup %4415 }
0x304f   :  { %v4418_v5 = vpop.eup %4417  ;;  %3984 = vmatprep.mubr.msk.f32.mxu0 %vm284_vm2, %v4416_v4 }
0x3050   :  { %3985 = vmatmul.mubr.msk.f32.vlgmr.msra.gmra.mrb[24].mxu0 %vm284_vm2, %v4418_v5 }
0x3051   :  { %4628 = shalt.err (!%p4625_p6)
}
0x3052   :  { %s4629_s6 = scalar_lea.hbm %s5582_s18, 256 }
0x3053   :  { %p4630_p7 = scmp.ne.s32.totalorder %s5582_s18, %s4629_s6  ;;  %p4633_p8 = scmp.lt.u32.totalorder %s4629_s6, %s5582_s18 }
0x3055   :  { %p4635_p9 = pnand %p4633_p8, %p4630_p7 }
0x3057   :  { %4638 = shalt.err (!%p4635_p9)
}
0x3058   :  { %3489 = dma.vmem_to_hbm [thread:$0]  %s3484_s28, 256, %s5582_s18, [#allocation19], %s4723_s0, %s4723_s0, %s4724_s21  }
0x3059   :  { %s4739_s26 = smov [#allocation20]  }
0x305a   :  { %s3495_s11 = sshll.u32 %s4739_s26, 4  ;;  %s3496_s11 = int_to_ptr.vmem [resolvable:$true] %s3495_s11 }
0x305b   :  { %s4639_s30 = scalar_lea.vmem %s3496_s11, 64  ;;  %p4644_p11 = scmp.lt.s32.totalorder %s3496_s11, %s3496_s11 }
0x305c   :  { %p4640_p10 = scmp.ne.s32.totalorder %s3496_s11, %s4639_s30  ;;  %p4645_p12 = scmp.lt.s32.totalorder %s4639_s30, %s4639_s30 }
0x305e   :  { %p4646_p13 = por %p4645_p12, %p4644_p11 }
0x3060   :  { %p4647_p0 = pnand %p4646_p13, %p4640_p10 }
0x3062   :  { %4650 = shalt.err (!%p4647_p0)
}
0x3063   :  { %s4651_s25 = scalar_lea.hbm %s5583_s19, 64 }
0x3064   :  { %p4652_p1 = scmp.ne.s32.totalorder %s5583_s19, %s4651_s25  ;;  %p4655_p2 = scmp.lt.u32.totalorder %s4651_s25, %s5583_s19 }
0x3066   :  { %p4657_p3 = pnand %p4655_p2, %p4652_p1 }
0x3068   :  { %4660 = shalt.err (!%p4657_p3)
}
0x3069   :  { %s4740_s8 = smov 2   ;;  %s4741_s15 = smov [#allocation21]  }
0x306a   :  { %3501 = dma.vmem_to_hbm [thread:$0]  %s3496_s11, 64, %s5583_s19, [#allocation19], %s4735_s4, %s4735_s4, %s4740_s8  }
0x306b   :  { %s3507_s28 = sshll.u32 %s4741_s15, 4  ;;  %s3508_s28 = int_to_ptr.vmem [resolvable:$true] %s3507_s28 }
0x306c   :  { %s4661_s5 = scalar_lea.vmem %s3508_s28, 64  ;;  %p4666_p5 = scmp.lt.s32.totalorder %s3508_s28, %s3508_s28 }
0x306d   :  { %p4662_p4 = scmp.ne.s32.totalorder %s3508_s28, %s4661_s5  ;;  %p4667_p6 = scmp.lt.s32.totalorder %s4661_s5, %s4661_s5 }
0x306f   :  { %p4668_p7 = por %p4667_p6, %p4666_p5 }
0x3071   :  { %p4669_p8 = pnand %p4668_p7, %p4662_p4 }
0x3073   :  { %4672 = shalt.err (!%p4669_p8)
}
0x3074   :  { %s4673_s6 = scalar_lea.hbm %s5584_s20, 64 }
0x3075   :  { %p4674_p9 = scmp.ne.s32.totalorder %s5584_s20, %s4673_s6  ;;  %p4677_p10 = scmp.lt.u32.totalorder %s4673_s6, %s5584_s20 }
0x3077   :  { %p4679_p11 = pnand %p4677_p10, %p4674_p9 }
0x3079   :  { %4682 = shalt.err (!%p4679_p11)
}
0x307a   :  { %3513 = dma.vmem_to_hbm [thread:$0]  %s3508_s28, 64, %s5584_s20, [#allocation22], %s4735_s4, %s4735_s4, %s4740_s8  }
0x307b   :  { %v3604_v6 = vld [vmem:[%s5580_s16] ss:$0 sm:$0xff]  ;;  %s4742_s11 = smov [#allocation17]  }
0x307c   :  { %s3471_s30 = sshll.u32 %s4742_s11, 4  ;;  %s3472_s30 = int_to_ptr.vmem [resolvable:$true] %s3471_s30 }
0x307d   :  { %s4683_s1 = scalar_lea.vmem %s3472_s30, 256  ;;  %p4688_p13 = scmp.lt.s32.totalorder %s3472_s30, %s3472_s30 }
0x307e   :  { %p4684_p12 = scmp.ne.s32.totalorder %s3472_s30, %s4683_s1  ;;  %p4689_p0 = scmp.lt.s32.totalorder %s4683_s1, %s4683_s1 }
0x3080   :  { %p4690_p1 = por %p4689_p0, %p4688_p13 }
0x3082   :  { %p4691_p2 = pnand %p4690_p1, %p4684_p12 }
0x3123   :  { %v3986_v57 = vpop.f32.mrb[24].mxu0 }
0x3124   :  { %v3461_v55 = vadd.f32 %v3986_v57, %v3604_v6  ;;  %v3455_v7 = vpop.f32.mrb[25].mxu0 }
0x3125   :  { %v3456_v9 = vadd.f32 %v3604_v6, %v3455_v7 }
0x3126   :  { %3465 = vst [vmem:[#allocation17 + $0x8] sm:$0xff] %v3461_v55 }
0x3127   :  { %3464 = vst [vmem:[#allocation17] sm:$0xff] %v3456_v9 }
0x3128   :  { %4694 = shalt.err (!%p4691_p2)
}
0x3129   :  { %s5602_s10 = sld [smem:[#allocation36_spill]] }
0x312f   :  { %s4695_s16 = scalar_lea.hbm %s5602_s10, 256 }
0x3130   :  { %p4696_p3 = scmp.ne.s32.totalorder %s5602_s10, %s4695_s16  ;;  %p4699_p4 = scmp.lt.u32.totalorder %s4695_s16, %s5602_s10 }
0x3132   :  { %p4701_p5 = pnand %p4699_p4, %p4696_p3 }
0x3134   :  { %4704 = shalt.err (!%p4701_p5)
}
0x3135   :  { %3477 = dma.vmem_to_hbm [thread:$0]  %s3472_s30, 256, %s5602_s10, [#allocation4], %s4723_s0, %s4723_s0, %s4724_s21  }
0x3136   :  { %4715 = dma.done.wait [#allocation4], 256  }
0x3137   :  { %4716 = vsyncadd [#allocation4], 4294967040 }
0x3138   :  { %4717 = dma.done.wait [#allocation19], 320  }
0x3139   :  { %4718 = vsyncadd [#allocation19], 4294966976 }
0x313a   :  { %4719 = dma.done.wait [#allocation22], 64  }
0x313b   :  { %4720 = vsyncadd [#allocation22], 4294967232 }
0x313c   :  { %3526 = vsyncpa [#allocation3], 1 }
0x313d   :  { %3527 = vsyncpa [#allocation6], 1 }
0x313e   :  { %3528 = vsyncpa [#allocation9], 1 }
0x313f   :  { %3529 = vsyncpa [#allocation12], 1 }
0x3140   :  { %3530 = vsyncpa [#allocation15], 1 }
0x3141   :  { %3531 = vsyncpa [#allocation4], 1 }
0x3142   :  { %3532 = vsyncpa [#allocation19], 1 }
0x3143   :  { %3533 = vsyncpa [#allocation22], 1 }

</bundles_post_ra>
